<compile_context>
chip_gen: v5e
topology: v5e:2x2
jax: 0.10.0
libtpu: 0.0.40
codegen_flags: <defaults>
</compile_context>

<pallas_src>
import jax
import jax.numpy as jnp
from jax import lax
from jax.experimental import pallas as pl
from jax.experimental.pallas import tpu as pltpu


# ----------------------------------------------------------------------------
# Pre-pass: pooled key / value projections.
# ----------------------------------------------------------------------------
def _pooled_kv_kernel(xc_ref, w1_ref, w3_ref, c1p_ref, vp_ref):
    """Grid step = (batch n, pooled-position tile q).

    xc_ref : (1, 4, C, TP) bf16  corner-grouped input (4 = the 2x2 corners)
    w1_ref : (C/2, C) bf16       conv_1 weight (out x in)
    w3_ref : (C,   C) bf16       conv_3 weight (out x in)
    c1p_ref: (1, C/2, TP) bf16   pooled key projections  (max + avg)
    vp_ref : (1, C,   TP) bf16   pooled value projections (max + avg)
    """
    w1 = w1_ref[...]
    w3 = w3_ref[...]

    def proj(k):
        xk = xc_ref[0, k]                                            # (C, TP)
        c1 = jnp.dot(w1, xk, preferred_element_type=jnp.float32)     # (C/2, TP)
        c3 = jnp.dot(w3, xk, preferred_element_type=jnp.float32)     # (C,   TP)
        return c1, c3

    c1, c3 = proj(0)
    c1_mx, c1_sm, c3_mx, c3_sm = c1, c1, c3, c3
    for k in range(1, 4):                                            # corners 1..3
        c1, c3 = proj(k)
        c1_mx = jnp.maximum(c1_mx, c1)
        c1_sm = c1_sm + c1
        c3_mx = jnp.maximum(c3_mx, c3)
        c3_sm = c3_sm + c3

    c1p_ref[0] = (c1_mx + 0.25 * c1_sm).astype(c1p_ref.dtype)   # maxpool + avgpool
    vp_ref[0] = (c3_mx + 0.25 * c3_sm).astype(vp_ref.dtype)


# ----------------------------------------------------------------------------
# Main pass: attention + gamma-scaled residual, NCHW-native.
# ----------------------------------------------------------------------------
def _attention_kernel(x_ref, kp_ref, vp_ref, g_ref, o_ref):
    """Grid step = (batch n, query tile j).

    x_ref  : (1, C, TS)       query slab of x in natural NCHW-flat order
    kp_ref : (1, P, C)  bf16  pooled keys with w2 folded in
    vp_ref : (1, C, P)  bf16  pooled values
    g_ref  : (1,)       f32   gamma (SMEM)
    o_ref  : (1, C, TS)       output slab (lane-dense along TS)
    """
    xq = x_ref[0]                                                    # (C, TS)
    kp = kp_ref[0]                                                   # (P, C)
    vp = vp_ref[0]                                                   # (C, P)

    scores = jnp.dot(kp, xq.astype(jnp.bfloat16),
                     preferred_element_type=jnp.float32)             # (P, TS)

    # softmax over the pooled-position axis (axis 0 in this orientation)
    m = jnp.max(scores, axis=0, keepdims=True)                       # (1, TS)
    e = jnp.exp(scores - m)
    denom = jnp.sum(e, axis=0, keepdims=True)
    att = (e * pl.reciprocal(denom, approx=True)).astype(jnp.bfloat16)

    refined = jnp.dot(vp, att, preferred_element_type=jnp.float32)   # (C, TS)

    g = g_ref[0]
    o_ref[0] = (g * refined + xq.astype(jnp.float32)).astype(o_ref.dtype)


# ----------------------------------------------------------------------------
# Wrapper
# ----------------------------------------------------------------------------
def _pick_tile(n, cap=512):
    """Largest legal tile <= cap: the full dim if it fits, else the largest
    divisor of n that is a multiple of 128, else the full dim."""
    if n <= cap:
        return n
    for t in range(cap - cap % 128, 127, -128):
        if n % t == 0:
            return t
    return n


@jax.jit
def self_spatial_attention_forward(x, w1, w2, w3, gamma):
    """x: (N, C, H, W); w1, w2: (C//2, C); w3: (C, C); gamma: scalar."""
    N, C, H, W = x.shape
    assert H % 2 == 0 and W % 2 == 0 and C % 2 == 0
    S = H * W
    P = (H // 2) * (W // 2)
    Ch = C // 2

    # Corner-grouped bf16 copy of x for the pooling pre-pass only.
    # corner k = 2*dh + dw, pooled position p = h2*(W//2) + w2.
    xc = (x.reshape(N, C, H // 2, 2, W // 2, 2)
            .transpose(0, 3, 5, 1, 2, 4)
            .reshape(N, 4, C, P)
            .astype(jnp.bfloat16))

    w1b = jnp.asarray(w1, jnp.bfloat16).reshape(Ch, C)
    w3b = jnp.asarray(w3, jnp.bfloat16).reshape(C, C)
    w2f = jnp.asarray(w2, jnp.float32).reshape(Ch, C)
    g = jnp.asarray(gamma, jnp.float32).reshape(1)

    # ---- pre-pass: pooled projections ---------------------------------------
    TP = _pick_tile(P)
    c1p, vp = pl.pallas_call(
        _pooled_kv_kernel,
        out_shape=(jax.ShapeDtypeStruct((N, Ch, P), jnp.bfloat16),
                   jax.ShapeDtypeStruct((N, C, P), jnp.bfloat16)),
        grid=(N, P // TP),
        in_specs=[
            pl.BlockSpec((1, 4, C, TP), lambda n, q: (n, 0, 0, q)),
            pl.BlockSpec((Ch, C), lambda n, q: (0, 0)),
            pl.BlockSpec((C, C), lambda n, q: (0, 0)),
        ],
        out_specs=(
            pl.BlockSpec((1, Ch, TP), lambda n, q: (n, 0, q)),
            pl.BlockSpec((1, C, TP), lambda n, q: (n, 0, q)),
        ),
        compiler_params=pltpu.CompilerParams(
            dimension_semantics=("parallel", "parallel")),
    )(xc, w1b, w3b)

    # Fold the query projection into the keys: Kp[n,p,c] = sum_ch c1p[n,ch,p]*w2[ch,c].
    # Tiny batched matmul; removes the per-tile c2 matmul from the main pass.
    kp = jnp.einsum("nkp,kc->npc", c1p.astype(jnp.float32), w2f).astype(jnp.bfloat16)

    # ---- main pass: attention + residual ------------------------------------
    # Keep the live (P, TS) softmax tile modest (vreg / VMEM pressure).
    ts_cap = 512
    while ts_cap > 128 and 4 * P * ts_cap > (2 << 20):
        ts_cap //= 2
    TS = _pick_tile(S, ts_cap)

    x_flat = x.reshape(N, C, S)
    out = pl.pallas_call(
        _attention_kernel,
        out_shape=jax.ShapeDtypeStruct((N, C, S), x.dtype),
        grid=(N, S // TS),
        in_specs=[
            pl.BlockSpec((1, C, TS), lambda n, j: (n, 0, j)),
            pl.BlockSpec((1, P, C), lambda n, j: (n, 0, 0)),
            pl.BlockSpec((1, C, P), lambda n, j: (n, 0, 0)),
            pl.BlockSpec(memory_space=pltpu.MemorySpace.SMEM),
        ],
        out_specs=pl.BlockSpec((1, C, TS), lambda n, j: (n, 0, j)),
        compiler_params=pltpu.CompilerParams(
            dimension_semantics=("parallel", "parallel")),
    )(x_flat, kp, vp, g)

    return out.reshape(N, C, H, W)


# ----------------------------------------------------------------------------
# Pure-JAX reference (mirrors the PyTorch module, f32 / HIGHEST precision)
# ----------------------------------------------------------------------------
def ref_forward(x, w1, w2, w3, gamma):
    N, C, H, W = x.shape
    hi = lax.Precision.HIGHEST
    conv = lambda t, w: jnp.einsum("nchw,oc->nohw", t, w, precision=hi)
    c1, c2, c3 = conv(x, w1), conv(x, w2), conv(x, w3)

    def pool(y):
        n, c, h, w = y.shape
        y = y.reshape(n, c, h // 2, 2, w // 2, 2)
        return jnp.max(y, axis=(3, 5)) + jnp.mean(y, axis=(3, 5))

    c1p, c3p = pool(c1), pool(c3)
    S, P = H * W, (H // 2) * (W // 2)
    mat = jnp.einsum("ncs,ncp->nsp", c2.reshape(N, -1, S),
                     c1p.reshape(N, -1, P), precision=hi)
    att = jax.nn.softmax(mat, axis=-1)
    refined = jnp.einsum("ncp,nsp->ncs", c3p.reshape(N, C, P), att, precision=hi)
    return gamma * refined.reshape(N, C, H, W) + x


# ----------------------------------------------------------------------------
if __name__ == "__main__":
    key = jax.random.PRNGKey(0)
    k_x, k1, k2, k3, k_x2, k4, k5, k6 = jax.random.split(key, 8)

    # PyTorch initialises gamma to 0 (output == input); use a nonzero value so
    # the attention path is actually exercised by the check.
    gamma = jnp.float32(0.7)

    def check(x, w1, w2, w3, name):
        out = jax.block_until_ready(
            self_spatial_attention_forward(x, w1, w2, w3, gamma))
        ref = ref_forward(x, w1, w2, w3, gamma)
        assert out.shape == x.shape, (name, out.shape)
        rel = float(jnp.linalg.norm(out - ref) / jnp.linalg.norm(ref))
        mx = float(jnp.max(jnp.abs(out - ref)))
        # bf16 MXU operands (with f32 accumulation) => loosened tolerance.
        assert rel < 3.5e-2, (name, rel)
        assert mx < 0.3, (name, mx)

    # Case 1: N=2, C=16, H=W=32  (S=1024 -> 2 query tiles of 512, P=256)
    N, C, H, W = 2, 16, 32, 32
    x = jax.random.normal(k_x, (N, C, H, W), jnp.float32)
    w1 = 0.2 * jax.random.normal(k1, (C // 2, C), jnp.float32)
    w2 = 0.2 * jax.random.normal(k2, (C // 2, C), jnp.float32)
    w3 = 0.2 * jax.random.normal(k3, (C, C), jnp.float32)
    check(x, w1, w2, w3, "case1")

    # Case 2: N=1, C=8, H=W=8 (small full-dim single-tile path)
    N2, C2, H2, W2 = 1, 8, 8, 8
    x2 = jax.random.normal(k_x2, (N2, C2, H2, W2), jnp.float32)
    w1b = 0.2 * jax.random.normal(k4, (C2 // 2, C2), jnp.float32)
    w2b = 0.2 * jax.random.normal(k5, (C2 // 2, C2), jnp.float32)
    w3b = 0.2 * jax.random.normal(k6, (C2, C2), jnp.float32)
    check(x2, w1b, w2b, w3b, "case2")

    print("KERNEL_OK")
</pallas_src>

<mosaic_0001>
module attributes {stable_mosaic.version = 11 : i64} {
  func.func @_pooled_kv_kernel(%arg0: i32, %arg1: i32, %arg2: memref<1x4x16x256xbf16, #tpu.memory_space<vmem>>, %arg3: memref<8x16xbf16, #tpu.memory_space<vmem>>, %arg4: memref<16x16xbf16, #tpu.memory_space<vmem>>, %arg5: memref<1x8x256xbf16, #tpu.memory_space<vmem>>, %arg6: memref<1x16x256xbf16, #tpu.memory_space<vmem>>) attributes {dimension_semantics = [#tpu.dimension_semantics<parallel>, #tpu.dimension_semantics<parallel>], iteration_bounds = array<i64: 2, 1>, scalar_prefetch = 0 : i64, scratch_operands = 0 : i64, tpu.core_type = #tpu.core_type<tc>, window_params = [{transform_indices = @transform_0, window_bounds = array<i64: 1, 4, 16, 256>}, {pipeline_mode = #tpu.pipeline_mode<synchronous>, transform_indices = @transform_1, window_bounds = array<i64: 8, 16>}, {pipeline_mode = #tpu.pipeline_mode<synchronous>, transform_indices = @transform_2, window_bounds = array<i64: 16, 16>}, {transform_indices = @transform_3, window_bounds = array<i64: 1, 8, 256>}, {transform_indices = @transform_4, window_bounds = array<i64: 1, 16, 256>}]} {
    %c0 = arith.constant 0 : index
    %c0_0 = arith.constant 0 : index
    %0 = vector.load %arg3[%c0, %c0_0] : memref<8x16xbf16, #tpu.memory_space<vmem>>, vector<8x16xbf16>
    %c0_1 = arith.constant 0 : index
    %c0_2 = arith.constant 0 : index
    %1 = vector.load %arg4[%c0_1, %c0_2] : memref<16x16xbf16, #tpu.memory_space<vmem>>, vector<16x16xbf16>
    %c0_3 = arith.constant 0 : index
    %c0_4 = arith.constant 0 : index
    %c0_5 = arith.constant 0 : index
    %c0_6 = arith.constant 0 : index
    %2 = vector.load %arg2[%c0_3, %c0_4, %c0_5, %c0_6] : memref<1x4x16x256xbf16, #tpu.memory_space<vmem>>, vector<1x1x16x256xbf16>
    %3 = vector.shape_cast %2 : vector<1x1x16x256xbf16> to vector<16x256xbf16>
    %cst = arith.constant dense<0.000000e+00> : vector<8x256xf32>
    %4 = tpu.matmul %0, %3, %cst {dimension_numbers = #tpu.dot_dimension_numbers<[1], [0], [0], [1], [0, 0, 1, 1], [], []>} : vector<8x16xbf16>, vector<16x256xbf16>, vector<8x256xf32> -> vector<8x256xf32>
    %cst_7 = arith.constant dense<0.000000e+00> : vector<16x256xf32>
    %5 = tpu.matmul %1, %3, %cst_7 {dimension_numbers = #tpu.dot_dimension_numbers<[1], [0], [0], [1], [0, 0, 1, 1], [], []>} : vector<16x16xbf16>, vector<16x256xbf16>, vector<16x256xf32> -> vector<16x256xf32>
    %c0_8 = arith.constant 0 : index
    %c1 = arith.constant 1 : index
    %c0_9 = arith.constant 0 : index
    %c0_10 = arith.constant 0 : index
    %6 = vector.load %arg2[%c0_8, %c1, %c0_9, %c0_10] : memref<1x4x16x256xbf16, #tpu.memory_space<vmem>>, vector<1x1x16x256xbf16>
    %7 = vector.shape_cast %6 : vector<1x1x16x256xbf16> to vector<16x256xbf16>
    %cst_11 = arith.constant dense<0.000000e+00> : vector<8x256xf32>
    %8 = tpu.matmul %0, %7, %cst_11 {dimension_numbers = #tpu.dot_dimension_numbers<[1], [0], [0], [1], [0, 0, 1, 1], [], []>} : vector<8x16xbf16>, vector<16x256xbf16>, vector<8x256xf32> -> vector<8x256xf32>
    %cst_12 = arith.constant dense<0.000000e+00> : vector<16x256xf32>
    %9 = tpu.matmul %1, %7, %cst_12 {dimension_numbers = #tpu.dot_dimension_numbers<[1], [0], [0], [1], [0, 0, 1, 1], [], []>} : vector<16x16xbf16>, vector<16x256xbf16>, vector<16x256xf32> -> vector<16x256xf32>
    %10 = arith.maximumf %4, %8 : vector<8x256xf32>
    %11 = arith.addf %4, %8 : vector<8x256xf32>
    %12 = arith.maximumf %5, %9 : vector<16x256xf32>
    %13 = arith.addf %5, %9 : vector<16x256xf32>
    %c0_13 = arith.constant 0 : index
    %c2 = arith.constant 2 : index
    %c0_14 = arith.constant 0 : index
    %c0_15 = arith.constant 0 : index
    %14 = vector.load %arg2[%c0_13, %c2, %c0_14, %c0_15] : memref<1x4x16x256xbf16, #tpu.memory_space<vmem>>, vector<1x1x16x256xbf16>
    %15 = vector.shape_cast %14 : vector<1x1x16x256xbf16> to vector<16x256xbf16>
    %cst_16 = arith.constant dense<0.000000e+00> : vector<8x256xf32>
    %16 = tpu.matmul %0, %15, %cst_16 {dimension_numbers = #tpu.dot_dimension_numbers<[1], [0], [0], [1], [0, 0, 1, 1], [], []>} : vector<8x16xbf16>, vector<16x256xbf16>, vector<8x256xf32> -> vector<8x256xf32>
    %cst_17 = arith.constant dense<0.000000e+00> : vector<16x256xf32>
    %17 = tpu.matmul %1, %15, %cst_17 {dimension_numbers = #tpu.dot_dimension_numbers<[1], [0], [0], [1], [0, 0, 1, 1], [], []>} : vector<16x16xbf16>, vector<16x256xbf16>, vector<16x256xf32> -> vector<16x256xf32>
    %18 = arith.maximumf %10, %16 : vector<8x256xf32>
    %19 = arith.addf %11, %16 : vector<8x256xf32>
    %20 = arith.maximumf %12, %17 : vector<16x256xf32>
    %21 = arith.addf %13, %17 : vector<16x256xf32>
    %c0_18 = arith.constant 0 : index
    %c3 = arith.constant 3 : index
    %c0_19 = arith.constant 0 : index
    %c0_20 = arith.constant 0 : index
    %22 = vector.load %arg2[%c0_18, %c3, %c0_19, %c0_20] : memref<1x4x16x256xbf16, #tpu.memory_space<vmem>>, vector<1x1x16x256xbf16>
    %23 = vector.shape_cast %22 : vector<1x1x16x256xbf16> to vector<16x256xbf16>
    %cst_21 = arith.constant dense<0.000000e+00> : vector<8x256xf32>
    %24 = tpu.matmul %0, %23, %cst_21 {dimension_numbers = #tpu.dot_dimension_numbers<[1], [0], [0], [1], [0, 0, 1, 1], [], []>} : vector<8x16xbf16>, vector<16x256xbf16>, vector<8x256xf32> -> vector<8x256xf32>
    %cst_22 = arith.constant dense<0.000000e+00> : vector<16x256xf32>
    %25 = tpu.matmul %1, %23, %cst_22 {dimension_numbers = #tpu.dot_dimension_numbers<[1], [0], [0], [1], [0, 0, 1, 1], [], []>} : vector<16x16xbf16>, vector<16x256xbf16>, vector<16x256xf32> -> vector<16x256xf32>
    %26 = arith.maximumf %18, %24 : vector<8x256xf32>
    %27 = arith.addf %19, %24 : vector<8x256xf32>
    %28 = arith.maximumf %20, %25 : vector<16x256xf32>
    %29 = arith.addf %21, %25 : vector<16x256xf32>
    %cst_23 = arith.constant 2.500000e-01 : f32
    %30 = vector.broadcast %cst_23 : f32 to vector<8x256xf32>
    %31 = arith.mulf %30, %27 : vector<8x256xf32>
    %32 = arith.addf %26, %31 : vector<8x256xf32>
    %33 = arith.truncf %32 : vector<8x256xf32> to vector<8x256xbf16>
    %c0_24 = arith.constant 0 : index
    %c0_25 = arith.constant 0 : index
    %c0_26 = arith.constant 0 : index
    %34 = vector.load %arg5[%c0_24, %c0_25, %c0_26] : memref<1x8x256xbf16, #tpu.memory_space<vmem>>, vector<1x8x256xbf16>
    %35 = vector.shape_cast %34 : vector<1x8x256xbf16> to vector<8x256xbf16>
    %36 = vector.shape_cast %33 : vector<8x256xbf16> to vector<1x8x256xbf16>
    tpu.vector_store %arg5[%c0_24, %c0_25, %c0_26], %36 {strides = array<i32>} : memref<1x8x256xbf16, #tpu.memory_space<vmem>>, vector<1x8x256xbf16>,
    %cst_27 = arith.constant 2.500000e-01 : f32
    %37 = vector.broadcast %cst_27 : f32 to vector<16x256xf32>
    %38 = arith.mulf %37, %29 : vector<16x256xf32>
    %39 = arith.addf %28, %38 : vector<16x256xf32>
    %40 = arith.truncf %39 : vector<16x256xf32> to vector<16x256xbf16>
    %c0_28 = arith.constant 0 : index
    %c0_29 = arith.constant 0 : index
    %c0_30 = arith.constant 0 : index
    %41 = vector.load %arg6[%c0_28, %c0_29, %c0_30] : memref<1x16x256xbf16, #tpu.memory_space<vmem>>, vector<1x16x256xbf16>
    %42 = vector.shape_cast %41 : vector<1x16x256xbf16> to vector<16x256xbf16>
    %43 = vector.shape_cast %40 : vector<16x256xbf16> to vector<1x16x256xbf16>
    tpu.vector_store %arg6[%c0_28, %c0_29, %c0_30], %43 {strides = array<i32>} : memref<1x16x256xbf16, #tpu.memory_space<vmem>>, vector<1x16x256xbf16>,
    return
  }
  func.func @transform_0(%arg0: i32, %arg1: i32) -> (i32, i32, i32, i32) {
    %c0_i32 = arith.constant 0 : i32
    %c0_i32_0 = arith.constant 0 : i32
    %c0_i32_1 = arith.constant 0 : i32
    return %arg0, %c0_i32, %c0_i32_0, %arg1 : i32, i32, i32, i32
  }
  func.func @transform_1(%arg0: i32, %arg1: i32) -> (i32, i32) {
    %c0_i32 = arith.constant 0 : i32
    %c0_i32_0 = arith.constant 0 : i32
    %c0_i32_1 = arith.constant 0 : i32
    return %c0_i32, %c0_i32_0 : i32, i32
  }
  func.func @transform_2(%arg0: i32, %arg1: i32) -> (i32, i32) {
    %c0_i32 = arith.constant 0 : i32
    %c0_i32_0 = arith.constant 0 : i32
    %c0_i32_1 = arith.constant 0 : i32
    return %c0_i32, %c0_i32_0 : i32, i32
  }
  func.func @transform_3(%arg0: i32, %arg1: i32) -> (i32, i32, i32) {
    %c0_i32 = arith.constant 0 : i32
    %c0_i32_0 = arith.constant 0 : i32
    return %arg0, %c0_i32, %arg1 : i32, i32, i32
  }
  func.func @transform_4(%arg0: i32, %arg1: i32) -> (i32, i32, i32) {
    %c0_i32 = arith.constant 0 : i32
    %c0_i32_0 = arith.constant 0 : i32
    return %arg0, %c0_i32, %arg1 : i32, i32, i32
  }
}

module attributes {stable_mosaic.version = 11 : i64} {
  func.func @_attention_kernel(%arg0: i32, %arg1: i32, %arg2: memref<1x16x512xf32, #tpu.memory_space<vmem>>, %arg3: memref<1x256x16xbf16, #tpu.memory_space<vmem>>, %arg4: memref<1x16x256xbf16, #tpu.memory_space<vmem>>, %arg5: memref<1xf32, #tpu.memory_space<smem>>, %arg6: memref<1x16x512xf32, #tpu.memory_space<vmem>>) attributes {dimension_semantics = [#tpu.dimension_semantics<parallel>, #tpu.dimension_semantics<parallel>], iteration_bounds = array<i64: 2, 2>, scalar_prefetch = 0 : i64, scratch_operands = 0 : i64, tpu.core_type = #tpu.core_type<tc>, window_params = [{transform_indices = @transform_0, window_bounds = array<i64: 1, 16, 512>}, {transform_indices = @transform_1, window_bounds = array<i64: 1, 256, 16>}, {transform_indices = @transform_2, window_bounds = array<i64: 1, 16, 256>}, {transform_indices = @transform_3, window_bounds = array<i64: 1>}, {transform_indices = @transform_4, window_bounds = array<i64: 1, 16, 512>}]} {
    %c0 = arith.constant 0 : index
    %c0_0 = arith.constant 0 : index
    %c0_1 = arith.constant 0 : index
    %0 = vector.load %arg2[%c0, %c0_0, %c0_1] : memref<1x16x512xf32, #tpu.memory_space<vmem>>, vector<1x16x512xf32>
    %1 = vector.shape_cast %0 : vector<1x16x512xf32> to vector<16x512xf32>
    %c0_2 = arith.constant 0 : index
    %c0_3 = arith.constant 0 : index
    %c0_4 = arith.constant 0 : index
    %2 = vector.load %arg3[%c0_2, %c0_3, %c0_4] : memref<1x256x16xbf16, #tpu.memory_space<vmem>>, vector<1x256x16xbf16>
    %3 = vector.shape_cast %2 : vector<1x256x16xbf16> to vector<256x16xbf16>
    %c0_5 = arith.constant 0 : index
    %c0_6 = arith.constant 0 : index
    %c0_7 = arith.constant 0 : index
    %4 = vector.load %arg4[%c0_5, %c0_6, %c0_7] : memref<1x16x256xbf16, #tpu.memory_space<vmem>>, vector<1x16x256xbf16>
    %5 = vector.shape_cast %4 : vector<1x16x256xbf16> to vector<16x256xbf16>
    %6 = arith.truncf %1 : vector<16x512xf32> to vector<16x512xbf16>
    %cst = arith.constant dense<0.000000e+00> : vector<256x512xf32>
    %7 = tpu.matmul %3, %6, %cst {dimension_numbers = #tpu.dot_dimension_numbers<[1], [0], [0], [1], [0, 0, 1, 1], [], []>} : vector<256x16xbf16>, vector<16x512xbf16>, vector<256x512xf32> -> vector<256x512xf32>
    %cst_8 = arith.constant dense<0xFF800000> : vector<512xf32>
    %8 = vector.multi_reduction <maximumf>, %7, %cst_8 [0] : vector<256x512xf32> to vector<512xf32>
    %9 = vector.shape_cast %8 : vector<512xf32> to vector<1x512xf32>
    %10 = vector.broadcast %9 : vector<1x512xf32> to vector<256x512xf32>
    %11 = arith.subf %7, %10 : vector<256x512xf32>
    %12 = math.exp %11 : vector<256x512xf32>
    %cst_9 = arith.constant dense<0.000000e+00> : vector<512xf32>
    %13 = vector.multi_reduction <add>, %12, %cst_9 [0] : vector<256x512xf32> to vector<512xf32>
    %14 = vector.shape_cast %13 : vector<512xf32> to vector<1x512xf32>
    %15 = tpu.reciprocal %14 {approx = true} : vector<1x512xf32> -> vector<1x512xf32>
    %16 = vector.broadcast %15 : vector<1x512xf32> to vector<256x512xf32>
    %17 = arith.mulf %12, %16 : vector<256x512xf32>
    %18 = arith.truncf %17 : vector<256x512xf32> to vector<256x512xbf16>
    %cst_10 = arith.constant dense<0.000000e+00> : vector<16x512xf32>
    %19 = tpu.matmul %5, %18, %cst_10 {dimension_numbers = #tpu.dot_dimension_numbers<[1], [0], [0], [1], [0, 0, 1, 1], [], []>} : vector<16x256xbf16>, vector<256x512xbf16>, vector<16x512xf32> -> vector<16x512xf32>
    %c0_11 = arith.constant 0 : index
    %20 = memref.load %arg5[%c0_11] : memref<1xf32, #tpu.memory_space<smem>>
    %21 = vector.broadcast %20 : f32 to vector<16x512xf32>
    %22 = arith.mulf %21, %19 : vector<16x512xf32>
    %23 = arith.addf %22, %1 : vector<16x512xf32>
    %c0_12 = arith.constant 0 : index
    %c0_13 = arith.constant 0 : index
    %c0_14 = arith.constant 0 : index
    %24 = vector.load %arg6[%c0_12, %c0_13, %c0_14] : memref<1x16x512xf32, #tpu.memory_space<vmem>>, vector<1x16x512xf32>
    %25 = vector.shape_cast %24 : vector<1x16x512xf32> to vector<16x512xf32>
    %26 = vector.shape_cast %23 : vector<16x512xf32> to vector<1x16x512xf32>
    tpu.vector_store %arg6[%c0_12, %c0_13, %c0_14], %26 {strides = array<i32>} : memref<1x16x512xf32, #tpu.memory_space<vmem>>, vector<1x16x512xf32>,
    return
  }
  func.func @transform_0(%arg0: i32, %arg1: i32) -> (i32, i32, i32) {
    %c0_i32 = arith.constant 0 : i32
    %c0_i32_0 = arith.constant 0 : i32
    return %arg0, %c0_i32, %arg1 : i32, i32, i32
  }
  func.func @transform_1(%arg0: i32, %arg1: i32) -> (i32, i32, i32) {
    %c0_i32 = arith.constant 0 : i32
    %c0_i32_0 = arith.constant 0 : i32
    %c0_i32_1 = arith.constant 0 : i32
    return %arg0, %c0_i32, %c0_i32_0 : i32, i32, i32
  }
  func.func @transform_2(%arg0: i32, %arg1: i32) -> (i32, i32, i32) {
    %c0_i32 = arith.constant 0 : i32
    %c0_i32_0 = arith.constant 0 : i32
    %c0_i32_1 = arith.constant 0 : i32
    return %arg0, %c0_i32, %c0_i32_0 : i32, i32, i32
  }
  func.func @transform_3(%arg0: i32, %arg1: i32) -> i32 {
    %c0_i32 = arith.constant 0 : i32
    %c0_i32_0 = arith.constant 0 : i32
    return %c0_i32 : i32
  }
  func.func @transform_4(%arg0: i32, %arg1: i32) -> (i32, i32, i32) {
    %c0_i32 = arith.constant 0 : i32
    %c0_i32_0 = arith.constant 0 : i32
    return %arg0, %c0_i32, %arg1 : i32, i32, i32
  }
}

</mosaic_0001>

<bundles_post_ra>
// kernel: self_spatial_attention_forward.2
= control target key start
LH: loop header
LB: loop body
LE: loop exit
PB: predicated region body
PF: predicated region fallthrough
CT: control target
= control target key end

     0   :  { %s891_s15 = smov 0   ;;  %s893_s16 = smov 0   ;;  %s988_s0 = inlined_call_operand.vmem [shape: bf16[2,4,16,256], index: 0, kind: input, shape index: {}]   ;;  %s989_s1 = inlined_call_operand.vmem [shape: bf16[8,16], index: 1, kind: input, shape index: {}]   ;;  %s990_s2 = inlined_call_operand.vmem [shape: bf16[16,16], index: 2, kind: input, shape index: {}]   ;;  %s991_s3 = inlined_call_operand.vmem [shape: bf16[2,8,256], index: 3, kind: output, shape index: {0}]   ;;  %s992_s4 = inlined_call_operand.vmem [shape: bf16[2,16,256], index: 4, kind: output, shape index: {1}]  }
   0x1   :  { %s895_s17 = smov 0  }
   0x2 LB: > { %s27_s18 = sadd.s32 1, %s860_s16  ;;  %p739_p0 = scmp.ge.s32.totalorder %s864_s17, 1  ;;  %s864_s17 = sphi %s895_s17, %s15_s17   ;;  %s860_s16 = sphi %s893_s16, %s994_s16   ;;  %s856_s15 = sphi %s891_s15, %s993_s15  }
   0x3   : > { %p29_p1 = scmp.ge.s32.totalorder %s27_s18, 2  ;;  %p188_p2 = scmp.lt.s32.totalorder %s864_s17, 3 }
   0x5   : > { %s996_s18 = smov (%p29_p1, %s27_s18), 0  ;;  %p189_p3 = pnand %p739_p0, %p188_p2 }
   0x6   : > { %p232_p4 = scmp.lt.s32.totalorder (!%p189_p3), %s856_s15, 1 }
   0x7   : > { %192 = sbr.rel (%p189_p3) target bundleno = 221 (0xdd), region = 32 }
   0xc   : > { %s998_s15 = smov (!%p232_p4, %s856_s15), 1  ;;  %vm277_vm0 = vcmask 130048   ;;  %v809_v3 = vld [vmem:[%s990_s2] sm:$0xff] }
   0xd   : > { %s806_s19 = sshll.u32 %s998_s15, 6  ;;  %v262_v6 = vld [vmem:[%s989_s1] sm:$0xf]  ;;  %s807_s27 = sshll.u32 %s998_s15, 3 }
   0xe   : > { %s915_s22 = scalar_lea.vmem %s988_s0, %s806_s19  ;;  %s249_s30 = scalar_lea.vmem %s991_s3, %s807_s27 }
   0xf   : > { %v748_v0 = vld [vmem:[%s915_s22] sm:$0xf]  ;;  %v811_v1 = vld [vmem:[%s915_s22 + $0x4] sm:$0xf0]  ;;  %v810_v2 = vld [vmem:[%s915_s22 + $0x4] sm:$0xf] }
  0x10   : > { %v749_v4 = vor.u32 %v811_v1, %v748_v0  ;;  %v750_v5 = vld [vmem:[%s915_s22 + $0x8] sm:$0xf0]  ;;  %v766_v7 = vld [vmem:[%s915_s22 + $0x10] sm:$0xf]  ;;  %v813_v8 = vld [vmem:[%s915_s22 + $0x14] sm:$0xf0] }
  0x11   : > { %v753_v9 = vor.u32 %v810_v2, %v750_v5  ;;  %v767_v10 = vor.u32 %v813_v8, %v766_v7  ;;  %v812_v11 = vld [vmem:[%s915_s22 + $0x14] sm:$0xf]  ;;  %v768_v12 = vld [vmem:[%s915_s22 + $0x18] sm:$0xf0]  ;;  %v780_v13 = vld [vmem:[%s915_s22 + $0x20] sm:$0xf] }
  0x12   : > { %288 = vmatpush.bf16.msra.mxu0 %v749_v4  ;;  %322 = vmatpush.bf16.msra.mxu2 %v749_v4  ;;  %v771_v14 = vor.u32 %v812_v11, %v768_v12  ;;  %v815_v15 = vld [vmem:[%s915_s22 + $0x24] sm:$0xf0]  ;;  %v814_v16 = vld [vmem:[%s915_s22 + $0x24] sm:$0xf]  ;;  %v782_v17 = vld [vmem:[%s915_s22 + $0x28] sm:$0xf0] }
  0x13   : > { %301 = vmatpush.bf16.msra.mxu1 %v753_v9  ;;  %336 = vmatpush.bf16.msra.mxu3 %v753_v9  ;;  %v781_v18 = vor.u32 %v815_v15, %v780_v13  ;;  %v785_v19 = vor.u32 %v814_v16, %v782_v17  ;;  %v794_v20 = vld [vmem:[%s915_s22 + $0x30] sm:$0xf]  ;;  %v817_v21 = vld [vmem:[%s915_s22 + $0x34] sm:$0xf0]  ;;  %v816_v22 = vld [vmem:[%s915_s22 + $0x34] sm:$0xf] }
  0x14   : > { %v796_v23 = vld [vmem:[%s915_s22 + $0x38] sm:$0xf0]  ;;  %v795_v24 = vor.u32 %v817_v21, %v794_v20  ;;  %s808_s5 = sshll.u32 %s998_s15, 4 }
  0x15   : > { %754 = vmatmul.msk.bf16.vlgmr.msra.gmra.mxu0 %vm277_vm0, %v262_v6  ;;  %760 = vmatmul.msk.bf16.vlgmr.msra.gmra.mxu2 %vm277_vm0, %v809_v3  ;;  %v799_v25 = vor.u32 %v816_v22, %v796_v23  ;;  %s259_s8 = scalar_lea.vmem %s992_s4, %s808_s5 }
  0x16   : > { %389 = vmatpush.bf16.msrb.mxu2 %v767_v10  ;;  %755 = vmatmul.msk.bf16.vlgmr.msra.gmra.mxu1 %vm277_vm0, %v262_v6 }
  0x17   : > { %403 = vmatpush.bf16.msrb.mxu3 %v771_v14  ;;  %363 = vmatpush.bf16.msrb.mxu0 %v767_v10 }
  0x18   : > { %761 = vmatmul.msk.bf16.vlgmr.msra.gmra.mxu3 %vm277_vm0, %v809_v3  ;;  %376 = vmatpush.bf16.msrb.mxu1 %v771_v14 }
  0x1a   : > { %468 = vmatpush.bf16.msra.mxu2 %v781_v18 }
  0x1b   : > { %482 = vmatpush.bf16.msra.mxu3 %v785_v19  ;;  %442 = vmatpush.bf16.msra.mxu0 %v781_v18 }
  0x1c   : > { %455 = vmatpush.bf16.msra.mxu1 %v785_v19 }
  0x25   : > { %772 = vmatmul.msk.bf16.vlgmr.msrb.gmra.mxu0 %vm277_vm0, %v262_v6  ;;  %774 = vmatmul.msk.bf16.vlgmr.msrb.gmra.mxu2 %vm277_vm0, %v809_v3 }
  0x26   : > { %773 = vmatmul.msk.bf16.vlgmr.msrb.gmra.mxu1 %vm277_vm0, %v262_v6  ;;  %547 = vmatpush.bf16.msrb.mxu2 %v795_v24 }
  0x27   : > { %521 = vmatpush.bf16.msrb.mxu0 %v795_v24  ;;  %534 = vmatpush.bf16.msrb.mxu1 %v799_v25 }
  0x28   : > { %775 = vmatmul.msk.bf16.vlgmr.msrb.gmra.mxu3 %vm277_vm0, %v809_v3 }
  0x29   : > { %561 = vmatpush.bf16.msrb.mxu3 %v799_v25 }
  0x35   : > { %786 = vmatmul.msk.bf16.vlgmr.msra.gmra.mxu0 %vm277_vm0, %v262_v6  ;;  %788 = vmatmul.msk.bf16.vlgmr.msra.gmra.mxu2 %vm277_vm0, %v809_v3 }
  0x36   : > { %787 = vmatmul.msk.bf16.vlgmr.msra.gmra.mxu1 %vm277_vm0, %v262_v6 }
  0x38   : > { %789 = vmatmul.msk.bf16.vlgmr.msra.gmra.mxu3 %vm277_vm0, %v809_v3 }
  0x45   : > { %800 = vmatmul.msk.bf16.vlgmr.msrb.gmra.mxu0 %vm277_vm0, %v262_v6  ;;  %802 = vmatmul.msk.bf16.vlgmr.msrb.gmra.mxu2 %vm277_vm0, %v809_v3 }
  0x46   : > { %801 = vmatmul.msk.bf16.vlgmr.msrb.gmra.mxu1 %vm277_vm0, %v262_v6 }
  0x48   : > { %803 = vmatmul.msk.bf16.vlgmr.msrb.gmra.mxu3 %vm277_vm0, %v809_v3 }
  0x92   : > { %v290_v26 = vpop.f32.mrf.mxu0 }
  0x93   : > { %v303_v27 = vpop.f32.mrf.mxu1 }
  0x98   : > { %v324_v28 = vpop.f32.mrf.mxu2 }
  0x9a   : > { %v292_v30 = vpop.f32.mrf.mxu0 }
  0x9b   : > { %v338_v29 = vpop.f32.mrf.mxu3  ;;  %v305_v31 = vpop.f32.mrf.mxu1 }
  0xa0   : > { %v955_v32 = vpop.f32.mrf.mxu2 }
  0xa2   : > { %v365_v34 = vpop.f32.mrf.mxu0 }
  0xa3   : > { %v957_v33 = vpop.f32.mrf.mxu3  ;;  %v378_v35 = vpop.f32.mrf.mxu1  ;;  %v412_v48 = vadd.f32 %v365_v34, %v290_v26  ;;  %v410_v51 = vmax.f32 %v290_v26, %v365_v34 }
  0xa4   : > { %v413_v49 = vadd.f32 %v378_v35, %v303_v27  ;;  %v411_v54 = vmax.f32 %v303_v27, %v378_v35 }
  0xa8   : > { %v391_v36 = vpop.f32.mrf.mxu2 }
  0xa9   : > { %v418_v62 = vadd.f32 %v391_v36, %v324_v28  ;;  %v414_v4 = vmax.f32 %v324_v28, %v391_v36 }
  0xaa   : > { %v367_v38 = vpop.f32.mrf.mxu0 }
  0xab   : > { %v405_v37 = vpop.f32.mrf.mxu3  ;;  %v380_v39 = vpop.f32.mrf.mxu1 }
  0xac   : > { %v419_v1 = vadd.f32 %v405_v37, %v338_v29  ;;  %v415_v7 = vmax.f32 %v338_v29, %v405_v37 }
  0xb0   : > { %v959_v40 = vpop.f32.mrf.mxu2 }
  0xb1   : > { %v420_v23 = vadd.f32 %v959_v40, %v955_v32  ;;  %v416_v27 = vmax.f32 %v955_v32, %v959_v40 }
  0xb2   : > { %v444_v42 = vpop.f32.mrf.mxu0 }
  0xb3   : > { %v961_v41 = vpop.f32.mrf.mxu3  ;;  %v457_v43 = vpop.f32.mrf.mxu1  ;;  %v491_v52 = vadd.f32 %v444_v42, %v412_v48  ;;  %v489_v57 = vmax.f32 %v410_v51, %v444_v42 }
  0xb4   : > { %v492_v55 = vadd.f32 %v457_v43, %v413_v49  ;;  %v490_v60 = vmax.f32 %v411_v54, %v457_v43  ;;  %v421_v25 = vadd.f32 %v961_v41, %v957_v33  ;;  %v417_v29 = vmax.f32 %v957_v33, %v961_v41 }
  0xb8   : > { %v470_v44 = vpop.f32.mrf.mxu2 }
  0xb9   : > { %v497_v5 = vadd.f32 %v470_v44, %v418_v62  ;;  %v493_v11 = vmax.f32 %v414_v4, %v470_v44 }
  0xba   : > { %v446_v46 = vpop.f32.mrf.mxu0 }
  0xbb   : > { %v484_v45 = vpop.f32.mrf.mxu3  ;;  %v459_v47 = vpop.f32.mrf.mxu1 }
  0xbc   : > { %v498_v8 = vadd.f32 %v484_v45, %v419_v1  ;;  %v494_v14 = vmax.f32 %v415_v7, %v484_v45 }
  0xc0   : > { %v472_v50 = vpop.f32.mrf.mxu2 }
  0xc1   : > { %v499_v28 = vadd.f32 %v472_v50, %v420_v23  ;;  %v495_v35 = vmax.f32 %v416_v27, %v472_v50 }
  0xc2   : > { %v523_v56 = vpop.f32.mrf.mxu0 }
  0xc3   : > { %v486_v53 = vpop.f32.mrf.mxu3  ;;  %v570_v58 = vadd.f32 %v523_v56, %v491_v52  ;;  %v536_v59 = vpop.f32.mrf.mxu1  ;;  %v568_v63 = vmax.f32 %v489_v57, %v523_v56 }
  0xc4   : > { %v571_v61 = vadd.f32 %v536_v59, %v492_v55  ;;  %v569_v2 = vmax.f32 %v490_v60, %v536_v59  ;;  %v500_v30 = vadd.f32 %v486_v53, %v421_v25  ;;  %v496_v38 = vmax.f32 %v417_v29, %v486_v53 }
  0xc5   : > { %v580_v0 = vmul.f32 0.25, %v570_v58 }
  0xc6   : > { %v581_v3 = vmul.f32 0.25, %v571_v61 }
  0xc7   : > { %v582_v6 = vadd.f32 %v580_v0, %v568_v63 }
  0xc8   : > { %v583_v9 = vadd.f32 %v581_v3, %v569_v2  ;;  %v549_v10 = vpop.f32.mrf.mxu2 }
  0xc9   : > { %v576_v12 = vadd.f32 %v549_v10, %v497_v5  ;;  %v572_v18 = vmax.f32 %v493_v11, %v549_v10 }
  0xca   : > { %v584_v15 = vpack.c.bf16 %v583_v9, %v582_v6  ;;  %v525_v17 = vpop.f32.mrf.mxu0 }
  0xcb   : > { %v563_v13 = vpop.f32.mrf.mxu3  ;;  %v586_v19 = vmul.f32 0.25, %v576_v12  ;;  %v538_v20 = vpop.f32.mrf.mxu1 }
  0xcc   : > { %v577_v16 = vadd.f32 %v563_v13, %v498_v8  ;;  %585 = vst [vmem:[%s249_s30] sm:$0xff] %v584_v15  ;;  %v573_v21 = vmax.f32 %v494_v14, %v563_v13 }
  0xcd   : > { %v590_v24 = vadd.f32 %v586_v19, %v572_v18 }
  0xce   : > { %v587_v22 = vmul.f32 0.25, %v577_v16 }
  0xd0   : > { %v591_v26 = vadd.f32 %v587_v22, %v573_v21  ;;  %v551_v34 = vpop.f32.mrf.mxu2 }
  0xd1   : > { %v578_v36 = vadd.f32 %v551_v34, %v499_v28  ;;  %v574_v42 = vmax.f32 %v495_v35, %v551_v34 }
  0xd2   : > { %v594_v31 = vpack.c.bf16 %v591_v26, %v590_v24 }
  0xd3   : > { %v565_v37 = vpop.f32.mrf.mxu3  ;;  %v588_v43 = vmul.f32 0.25, %v578_v36 }
  0xd4   : > { %v579_v39 = vadd.f32 %v565_v37, %v500_v30  ;;  %596 = vst [vmem:[%s259_s8] sm:$0xff] %v594_v31  ;;  %v575_v32 = vmax.f32 %v496_v38, %v565_v37 }
  0xd5   : > { %v592_v44 = vadd.f32 %v588_v43, %v574_v42 }
  0xd6   : > { %v589_v40 = vmul.f32 0.25, %v579_v39 }
  0xd8   : > { %v593_v45 = vadd.f32 %v589_v40, %v575_v32 }
  0xda   : > { %v595_v46 = vpack.c.bf16 %v593_v45, %v592_v44 }
  0xdc   : > { %597 = vst [vmem:[%s259_s8 + $0x8] sm:$0xff] %v595_v46 }
  0xdd PF: > { %s15_s17 = sadd.s32 1, %s864_s17   ;;  %s993_s15 = smov %s860_s16 }
  0xde   : > { %p12_p5 = scmp.ge.s32.totalorder %s15_s17, 4   ;;  %s994_s16 = smov %s996_s18 }
  0xe0   :  { %14 = sbr.rel (!%p12_p5) target bundleno = 2 (0x2), region = 77 }

// kernel: self_spatial_attention_forward.3
= control target key start
LH: loop header
LB: loop body
LE: loop exit
PB: predicated region body
PF: predicated region fallthrough
CT: control target
= control target key end

     0   :  { %s4117_s0 = inlined_call_operand.vmem [shape: f32[2,16,1024], index: 0, kind: input, shape index: {}]   ;;  %s4118_s1 = inlined_call_operand.vmem [shape: bf16[2,256,16], index: 1, kind: input, shape index: {}]   ;;  %s4119_s2 = inlined_call_operand.vmem [shape: bf16[2,16,256], index: 2, kind: input, shape index: {}]   ;;  %s4120_s3 = inlined_call_operand.<no memory space> [shape: f32[1], index: 3, kind: input, shape index: {}]   ;;  %s4121_s4 = inlined_call_operand.vmem [shape: f32[2,16,1024], index: 4, kind: output, shape index: {}]  }
   0x1   :  { %9 = sst [smem:[#allocation2]] %s4120_s3 }
   0x2   :  { %s2573_s17 = smov 0   ;;  %s2575_s18 = smov 0  }
   0x3   :  { %s2577_s19 = smov 0   ;;  %s2579_s20 = smov 0  }
   0x4   :  { %s2581_s21 = smov 0   ;;  %s2583_s22 = smov 0  }
   0x5   :  { %s2585_s23 = smov 0  }
   0x6 LB: > { %s24_s3 = sadd.s32 1, %s2535_s21  ;;  %s27_s24 = sadd.s32 1, %s2539_s22  ;;  %s2543_s23 = sphi %s2585_s23, %s15_s23   ;;  %s2539_s22 = sphi %s2583_s22, %s4632_s22   ;;  %s2535_s21 = sphi %s2581_s21, %s4631_s21   ;;  %s2531_s20 = sphi %s2579_s20, %s4630_s20   ;;  %s2527_s19 = sphi %s2577_s19, %s4629_s19   ;;  %s2523_s18 = sphi %s2575_s18, %s4628_s18   ;;  %s2519_s17 = sphi %s2573_s17, %s4627_s17  }
   0x7   : > { %p25_p0 = scmp.ge.s32.totalorder %s24_s3, 2  ;;  %s1984_s25 = sadd.s32 4294967295, %s2543_s23  }
   0x8   : > { %p43_p1 = scmp.ne.s32.totalorder %s2523_s18, %s2519_s17  ;;  %p44_p2 = scmp.eq.s32.totalorder %s2543_s23, 0 }
   0x9   : > { %s4634_s3 = smov (%p25_p0, %s24_s3), 0  ;;  %s4636_s24 = smov (!%p25_p0, %s27_s24), %s2539_s22 }
   0xa   : > { %p29_p3 = scmp.ge.s32.totalorder %s4636_s24, 2  ;;  %p148_p4 = scmp.eq.s32.totalorder %s1984_s25, 3 }
   0xb   : > { %s32_s26 = ssub.s32 %s2535_s21, %s4634_s3  ;;  %p45_p5 = por %p44_p2, %p43_p1 }
   0xc   : > { %s4638_s24 = smov (%p29_p3, %s4636_s24), 0  ;;  %p2621_p6 = por %p148_p4, %p43_p1 }
   0xd   : > { %s31_s28 = ssub.s32 %s2539_s22, %s4638_s24  ;;  %s36_s30 = sadd.s32 1, %s2523_s18 }
   0xe   : > { %s33_s29 = sor.u32 %s32_s26, %s31_s28  ;;  %p1987_p8 = scmp.ge.s32.totalorder %s2543_s23, 4 }
   0xf   : > { %p34_p7 = scmp.eq.s32.totalorder %s33_s29, 0 }
  0x10   : > { %173 = sbr.rel (%p1987_p8) target bundleno = 36 (0x24), region = 20 }
  0x11   : > { %s2629_s5 = scalar_select %p34_p7, %s2523_s18, %s36_s30  }
  0x15   : > { %176 = sbr.rel (!%p45_p5) target bundleno = 36 (0x24), region = 24  ;;  %s178_s6 = sand.u32 (%p45_p5), 1, %s2523_s18  }
  0x16   : > { %s1989_s7 = sshll.u32 (%p45_p5), %s2535_s21, 2  ;;  %s1988_s8 = sshll.u32 (%p45_p5), %s178_s6, 6 }
  0x17   : > { %s1990_s9 = sshll.u32 (%p45_p5), %s2539_s22, 4  ;;  %s180_s15 = scalar_lea.vmem (%p45_p5), [#allocation3], %s1988_s8 }
  0x18   : > { %s183_s10 = sadd.s32 (%p45_p5), %s1990_s9, %s1989_s7 }
  0x19   : > { %s1991_s11 = sshll.u32 (%p45_p5), %s183_s10, 3 }
  0x1a   : > { %s185_s14 = scalar_lea.vmem %s4117_s0, %s1991_s11 }
  0x1b   : > { %v198_v0 = vld [vmem:[%s185_s14] sm:$0xff]  ;;  %v200_v1 = vld [vmem:[%s185_s14 + $0x8] sm:$0xff]  ;;  %v202_v2 = vld [vmem:[%s185_s14 + $0x10] sm:$0xff] }
  0x1c   : > { %199 = vst [vmem:[%s180_s15] sm:$0xff] %v198_v0  ;;  %v204_v3 = vld [vmem:[%s185_s14 + $0x18] sm:$0xff]  ;;  %v206_v4 = vld [vmem:[%s185_s14 + $0x40] sm:$0xff]  ;;  %v208_v5 = vld [vmem:[%s185_s14 + $0x48] sm:$0xff] }
  0x1d   : > { %201 = vst [vmem:[%s180_s15 + $0x8] sm:$0xff] %v200_v1  ;;  %v210_v6 = vld [vmem:[%s185_s14 + $0x50] sm:$0xff]  ;;  %v212_v7 = vld [vmem:[%s185_s14 + $0x58] sm:$0xff] }
  0x1e   : > { %203 = vst [vmem:[%s180_s15 + $0x10] sm:$0xff] %v202_v2 }
  0x1f   : > { %205 = vst [vmem:[%s180_s15 + $0x18] sm:$0xff] %v204_v3 }
  0x20   : > { %207 = vst [vmem:[%s180_s15 + $0x20] sm:$0xff] %v206_v4 }
  0x21   : > { %209 = vst [vmem:[%s180_s15 + $0x28] sm:$0xff] %v208_v5 }
  0x22   : > { %211 = vst [vmem:[%s180_s15 + $0x30] sm:$0xff] %v210_v6 }
  0x23   : > { %213 = vst [vmem:[%s180_s15 + $0x38] sm:$0xff] %v212_v7 }
  0x24 PF: > { %p1992_p9 = scmp.ge.s32.totalorder %s2543_s23, 1  ;;  %p234_p10 = scmp.lt.s32.totalorder %s2543_s23, 5 }
  0x26   : > { %p235_p11 = pnand %p1992_p9, %p234_p10 }
  0x28   : > { %238 = sbr.rel (%p235_p11) target bundleno = 832 (0x340), region = 55 }
  0x2d   : > { %s241_s16 = sand.u32 1, %s2519_s17   ;;  %p276_p12 = scmp.lt.s32.totalorder %s2531_s20, 1  ;;  %vm414_vm0 = vcmask 130048  }
  0x2e   : > { %s2642_s25 = sshll.u32 %s241_s16, 6  ;;  %s1817_s11 = sld [smem:[#allocation2]] }
  0x2f   : > { %s2645_s26 = scalar_lea.vmem [#allocation3], %s2642_s25  ;;  %s4064_s12 = scalar_lea.vmem [#allocation4], %s2642_s25 }
  0x30   : > { %v288_v8 = vld [vmem:[%s2645_s26] sm:$0xff]  ;;  %v289_v10 = vld [vmem:[%s2645_s26 + $0x8] sm:$0xff]  ;;  %s2651_s28 = scalar_select %p276_p12, %s2531_s20, 1  ;;  %v290_v13 = vld [vmem:[%s2645_s26 + $0x10] sm:$0xff] }
  0x31   : > { %v292_v9 = vld [vmem:[%s2645_s26 + $0x20] sm:$0xff]  ;;  %v293_v12 = vld [vmem:[%s2645_s26 + $0x28] sm:$0xff]  ;;  %v294_v14 = vld [vmem:[%s2645_s26 + $0x30] sm:$0xff]  ;;  %s2136_s13 = sshll.u32 (%p2621_p6), %s2527_s19, 2  ;;  %s2137_s14 = sshll.u32 (%p2621_p6), %s2531_s20, 4 }
  0x32   : > { %v330_v11 = vpack.c.bf16 %v292_v9, %v288_v8  ;;  %v331_v15 = vpack.c.bf16 %v293_v12, %v289_v10  ;;  %v332_v16 = vpack.c.bf16 %v294_v14, %v290_v13  ;;  %v291_v17 = vld [vmem:[%s2645_s26 + $0x18] sm:$0xff]  ;;  %s2141_s17 = sshll.u32 %s2651_s28, 7  ;;  %s2142_s7 = sshll.u32 %s2651_s28, 4 }
  0x33   : > { %v295_v18 = vld [vmem:[%s2645_s26 + $0x38] sm:$0xff]  ;;  %s2662_s6 = scalar_lea.vmem %s4118_s1, %s2141_s17  ;;  %s285_s10 = scalar_lea.vmem %s4119_s2, %s2142_s7 }
  0x34   : > { %470 = vmatpush.bf16.msra.mxu0 %v330_v11  ;;  %v333_v19 = vpack.c.bf16 %v295_v18, %v291_v17  ;;  %559 = vmatpush.bf16.msra.mxu1 %v331_v15  ;;  %v2143_v20 = vld [vmem:[%s2662_s6] sm:$0xff]  ;;  %v2144_v21 = vld [vmem:[%s2662_s6 + $0x8] sm:$0xff]  ;;  %v2145_v22 = vld [vmem:[%s2662_s6 + $0x10] sm:$0xff]  ;;  %s1852_s15 = sadd.s32 (%p2621_p6), %s2137_s14, %s2136_s13 }
  0x35   : > { %648 = vmatpush.bf16.msra.mxu2 %v332_v16  ;;  %v2146_v23 = vld [vmem:[%s2662_s6 + $0x18] sm:$0xff]  ;;  %v2147_v24 = vld [vmem:[%s2662_s6 + $0x20] sm:$0xff]  ;;  %v2148_v25 = vld [vmem:[%s2662_s6 + $0x28] sm:$0xff]  ;;  %s2138_s16 = sshll.u32 (%p2621_p6), %s1852_s15, 3 }
  0x36   : > { %737 = vmatpush.bf16.msra.mxu3 %v333_v19  ;;  %v2149_v26 = vld [vmem:[%s2662_s6 + $0x30] sm:$0xff]  ;;  %v2150_v27 = vld [vmem:[%s2662_s6 + $0x38] sm:$0xff]  ;;  %v2151_v28 = vld [vmem:[%s2662_s6 + $0x40] sm:$0xff]  ;;  %s1854_s27 = scalar_lea.vmem (%p2621_p6), %s4121_s4, %s2138_s16 }
  0x37   : > { %2063 = vmatmul.msk.bf16.vlgmr.msra.gmra.mxu0 %vm414_vm0, %v2143_v20  ;;  %2079 = vmatmul.msk.bf16.vlgmr.msra.gmra.mxu1 %vm414_vm0, %v2143_v20  ;;  %v2152_v35 = vld [vmem:[%s2662_s6 + $0x48] sm:$0xff]  ;;  %v2153_v42 = vld [vmem:[%s2662_s6 + $0x50] sm:$0xff]  ;;  %v2154_v50 = vld [vmem:[%s2662_s6 + $0x58] sm:$0xff] }
  0x38   : > { %2095 = vmatmul.msk.bf16.vlgmr.msra.gmra.mxu2 %vm414_vm0, %v2143_v20  ;;  %v2155_v58 = vld [vmem:[%s2662_s6 + $0x60] sm:$0xff]  ;;  %v2156_v3 = vld [vmem:[%s2662_s6 + $0x68] sm:$0xff]  ;;  %v2157_v10 = vld [vmem:[%s2662_s6 + $0x70] sm:$0xff] }
  0x39   : > { %2111 = vmatmul.msk.bf16.vlgmr.msra.gmra.mxu3 %vm414_vm0, %v2143_v20  ;;  %v2158_v19 = vld [vmem:[%s2662_s6 + $0x78] sm:$0xff] }
  0x47   : > { %2064 = vmatmul.msk.bf16.gmra.mxu0 %vm414_vm0, %v2144_v21  ;;  %2080 = vmatmul.msk.bf16.gmra.mxu1 %vm414_vm0, %v2144_v21 }
  0x48   : > { %2096 = vmatmul.msk.bf16.gmra.mxu2 %vm414_vm0, %v2144_v21 }
  0x49   : > { %2112 = vmatmul.msk.bf16.gmra.mxu3 %vm414_vm0, %v2144_v21 }
  0x57   : > { %2065 = vmatmul.msk.bf16.gmra.mxu0 %vm414_vm0, %v2145_v22  ;;  %2081 = vmatmul.msk.bf16.gmra.mxu1 %vm414_vm0, %v2145_v22 }
  0x58   : > { %2097 = vmatmul.msk.bf16.gmra.mxu2 %vm414_vm0, %v2145_v22 }
  0x59   : > { %2113 = vmatmul.msk.bf16.gmra.mxu3 %vm414_vm0, %v2145_v22 }
  0x67   : > { %2066 = vmatmul.msk.bf16.gmra.mxu0 %vm414_vm0, %v2146_v23  ;;  %2082 = vmatmul.msk.bf16.gmra.mxu1 %vm414_vm0, %v2146_v23 }
  0x68   : > { %2098 = vmatmul.msk.bf16.gmra.mxu2 %vm414_vm0, %v2146_v23 }
  0x69   : > { %2114 = vmatmul.msk.bf16.gmra.mxu3 %vm414_vm0, %v2146_v23 }
  0x77   : > { %2067 = vmatmul.msk.bf16.gmra.mxu0 %vm414_vm0, %v2147_v24  ;;  %2083 = vmatmul.msk.bf16.gmra.mxu1 %vm414_vm0, %v2147_v24 }
  0x78   : > { %2099 = vmatmul.msk.bf16.gmra.mxu2 %vm414_vm0, %v2147_v24 }
  0x79   : > { %2115 = vmatmul.msk.bf16.gmra.mxu3 %vm414_vm0, %v2147_v24 }
  0x87   : > { %2068 = vmatmul.msk.bf16.gmra.mxu0 %vm414_vm0, %v2148_v25  ;;  %2084 = vmatmul.msk.bf16.gmra.mxu1 %vm414_vm0, %v2148_v25 }
  0x88   : > { %2100 = vmatmul.msk.bf16.gmra.mxu2 %vm414_vm0, %v2148_v25 }
  0x89   : > { %2116 = vmatmul.msk.bf16.gmra.mxu3 %vm414_vm0, %v2148_v25 }
  0x97   : > { %2069 = vmatmul.msk.bf16.gmra.mxu0 %vm414_vm0, %v2149_v26  ;;  %2085 = vmatmul.msk.bf16.gmra.mxu1 %vm414_vm0, %v2149_v26 }
  0x98   : > { %2101 = vmatmul.msk.bf16.gmra.mxu2 %vm414_vm0, %v2149_v26 }
  0x99   : > { %2117 = vmatmul.msk.bf16.gmra.mxu3 %vm414_vm0, %v2149_v26 }
  0xa7   : > { %2070 = vmatmul.msk.bf16.gmra.mxu0 %vm414_vm0, %v2150_v27  ;;  %2086 = vmatmul.msk.bf16.gmra.mxu1 %vm414_vm0, %v2150_v27 }
  0xa8   : > { %2102 = vmatmul.msk.bf16.gmra.mxu2 %vm414_vm0, %v2150_v27 }
  0xa9   : > { %2118 = vmatmul.msk.bf16.gmra.mxu3 %vm414_vm0, %v2150_v27 }
  0xb4   : > { %v2705_v29 = vpop.f32.mrf.mxu0  ;;  %v2707_v30 = vpop.f32.mrf.mxu1 }
  0xb5   : > { %4282 = vst [vmem:[#allocation5_spill] sm:$0xff] %v2707_v30 }
  0xb7   : > { %2071 = vmatmul.msk.bf16.gmra.mxu0 %vm414_vm0, %v2151_v28  ;;  %2087 = vmatmul.msk.bf16.gmra.mxu1 %vm414_vm0, %v2151_v28 }
  0xb8   : > { %2103 = vmatmul.msk.bf16.gmra.mxu2 %vm414_vm0, %v2151_v28 }
  0xb9   : > { %2119 = vmatmul.msk.bf16.gmra.mxu3 %vm414_vm0, %v2151_v28 }
  0xbb   : > { %v2713_v31 = vpop.f32.mrf.mxu2 }
  0xbc   : > { %4283 = vst [vmem:[#allocation6_spill] sm:$0xff] %v2713_v31  ;;  %v2715_v32 = vpop.f32.mrf.mxu0  ;;  %v2717_v33 = vpop.f32.mrf.mxu1 }
  0xbd   : > { %4284 = vst [vmem:[#allocation7_spill] sm:$0xff] %v2717_v33  ;;  %v2746_v45 = vpop.f32.mrf.mxu3 }
  0xbe   : > { %4293 = vst [vmem:[#allocation16_spill] sm:$0xff] %v2746_v45 }
  0xc3   : > { %v2719_v34 = vpop.f32.mrf.mxu2 }
  0xc4   : > { %4285 = vst [vmem:[#allocation8_spill] sm:$0xff] %v2719_v34  ;;  %v2722_v36 = vpop.f32.mrf.mxu0  ;;  %v2724_v37 = vpop.f32.mrf.mxu1 }
  0xc5   : > { %4286 = vst [vmem:[#allocation9_spill] sm:$0xff] %v2722_v36  ;;  %v2755_v49 = vpop.f32.mrf.mxu3 }
  0xc6   : > { %4296 = vst [vmem:[#allocation19_spill] sm:$0xff] %v2755_v49 }
  0xc7   : > { %2072 = vmatmul.msk.bf16.gmra.mxu0 %vm414_vm0, %v2152_v35  ;;  %2088 = vmatmul.msk.bf16.gmra.mxu1 %vm414_vm0, %v2152_v35 }
  0xc8   : > { %2104 = vmatmul.msk.bf16.gmra.mxu2 %vm414_vm0, %v2152_v35 }
  0xc9   : > { %2120 = vmatmul.msk.bf16.gmra.mxu3 %vm414_vm0, %v2152_v35 }
  0xcb   : > { %v2730_v38 = vpop.f32.mrf.mxu2 }
  0xcc   : > { %4287 = vst [vmem:[#allocation10_spill] sm:$0xff] %v2730_v38  ;;  %v2732_v39 = vpop.f32.mrf.mxu0  ;;  %v2734_v40 = vpop.f32.mrf.mxu1 }
  0xcd   : > { %4288 = vst [vmem:[#allocation11_spill] sm:$0xff] %v2732_v39  ;;  %v2770_v55 = vpop.f32.mrf.mxu3 }
  0xce   : > { %4289 = vst [vmem:[#allocation12_spill] sm:$0xff] %v2734_v40 }
  0xcf   : > { %4299 = vst [vmem:[#allocation22_spill] sm:$0xff] %v2770_v55 }
  0xd3   : > { %v2736_v41 = vpop.f32.mrf.mxu2 }
  0xd4   : > { %4290 = vst [vmem:[#allocation13_spill] sm:$0xff] %v2736_v41  ;;  %v2739_v43 = vpop.f32.mrf.mxu0  ;;  %v2741_v44 = vpop.f32.mrf.mxu1 }
  0xd5   : > { %4291 = vst [vmem:[#allocation14_spill] sm:$0xff] %v2739_v43  ;;  %v2781_v61 = vpop.f32.mrf.mxu3 }
  0xd6   : > { %4292 = vst [vmem:[#allocation15_spill] sm:$0xff] %v2741_v44 }
  0xd7   : > { %2073 = vmatmul.msk.bf16.gmra.mxu0 %vm414_vm0, %v2153_v42  ;;  %2089 = vmatmul.msk.bf16.gmra.mxu1 %vm414_vm0, %v2153_v42  ;;  %4301 = vst [vmem:[#allocation24_spill] sm:$0xff] %v2781_v61 }
  0xd8   : > { %2105 = vmatmul.msk.bf16.gmra.mxu2 %vm414_vm0, %v2153_v42 }
  0xd9   : > { %2121 = vmatmul.msk.bf16.gmra.mxu3 %vm414_vm0, %v2153_v42 }
  0xdb   : > { %v2749_v46 = vpop.f32.mrf.mxu2 }
  0xdc   : > { %4294 = vst [vmem:[#allocation17_spill] sm:$0xff] %v2749_v46  ;;  %v2751_v47 = vpop.f32.mrf.mxu0  ;;  %v2753_v48 = vpop.f32.mrf.mxu1 }
  0xdd   : > { %4295 = vst [vmem:[#allocation18_spill] sm:$0xff] %v2753_v48  ;;  %v2793_v1 = vpop.f32.mrf.mxu3 }
  0xde   : > { %4305 = vst [vmem:[#allocation28_spill] sm:$0xff] %v2793_v1 }
  0xe3   : > { %v2758_v51 = vpop.f32.mrf.mxu2 }
  0xe4   : > { %4297 = vst [vmem:[#allocation20_spill] sm:$0xff] %v2758_v51  ;;  %v2760_v52 = vpop.f32.mrf.mxu0  ;;  %v2762_v53 = vpop.f32.mrf.mxu1 }
  0xe5   : > { %4298 = vst [vmem:[#allocation21_spill] sm:$0xff] %v2762_v53  ;;  %v2806_v6 = vpop.f32.mrf.mxu3 }
  0xe6   : > { %4309 = vst [vmem:[#allocation32_spill] sm:$0xff] %v2806_v6 }
  0xe7   : > { %2074 = vmatmul.msk.bf16.gmra.mxu0 %vm414_vm0, %v2154_v50  ;;  %2090 = vmatmul.msk.bf16.gmra.mxu1 %vm414_vm0, %v2154_v50 }
  0xe8   : > { %2106 = vmatmul.msk.bf16.gmra.mxu2 %vm414_vm0, %v2154_v50 }
  0xe9   : > { %2122 = vmatmul.msk.bf16.gmra.mxu3 %vm414_vm0, %v2154_v50 }
  0xeb   : > { %v2774_v57 = vpop.f32.mrf.mxu2 }
  0xec   : > { %v2768_v54 = vpop.f32.mrf.mxu0  ;;  %v2772_v56 = vpop.f32.mrf.mxu1  ;;  %4300 = vst [vmem:[#allocation23_spill] sm:$0xff] %v2774_v57 }
  0xed   : > { %v2817_v12 = vpop.f32.mrf.mxu3 }
  0xee   : > { %4312 = vst [vmem:[#allocation35_spill] sm:$0xff] %v2817_v12 }
  0xf3   : > { %v2784_v62 = vpop.f32.mrf.mxu2 }
  0xf4   : > { %v2777_v59 = vpop.f32.mrf.mxu0  ;;  %v2779_v60 = vpop.f32.mrf.mxu1  ;;  %4302 = vst [vmem:[#allocation25_spill] sm:$0xff] %v2784_v62 }
  0xf5   : > { %v2831_v17 = vpop.f32.mrf.mxu3 }
  0xf6   : > { %4315 = vst [vmem:[#allocation38_spill] sm:$0xff] %v2831_v17 }
  0xf7   : > { %2075 = vmatmul.msk.bf16.gmra.mxu0 %vm414_vm0, %v2155_v58  ;;  %2091 = vmatmul.msk.bf16.gmra.mxu1 %vm414_vm0, %v2155_v58 }
  0xf8   : > { %2107 = vmatmul.msk.bf16.gmra.mxu2 %vm414_vm0, %v2155_v58 }
  0xf9   : > { %2123 = vmatmul.msk.bf16.gmra.mxu3 %vm414_vm0, %v2155_v58 }
  0xfb   : > { %v2795_v2 = vpop.f32.mrf.mxu2 }
  0xfc   : > { %v2789_v63 = vpop.f32.mrf.mxu0  ;;  %v2791_v0 = vpop.f32.mrf.mxu1  ;;  %4306 = vst [vmem:[#allocation29_spill] sm:$0xff] %v2795_v2 }
  0xfd   : > { %4303 = vst [vmem:[#allocation26_spill] sm:$0xff] %v2789_v63  ;;  %v2843_v22 = vpop.f32.mrf.mxu3 }
  0xfe   : > { %4304 = vst [vmem:[#allocation27_spill] sm:$0xff] %v2791_v0 }
  0xff   : > { %4318 = vst [vmem:[#allocation41_spill] sm:$0xff] %v2843_v22 }
 0x103   : > { %v2808_v7 = vpop.f32.mrf.mxu2 }
 0x104   : > { %v2798_v4 = vpop.f32.mrf.mxu0  ;;  %v2800_v5 = vpop.f32.mrf.mxu1  ;;  %4310 = vst [vmem:[#allocation33_spill] sm:$0xff] %v2808_v7 }
 0x105   : > { %4307 = vst [vmem:[#allocation30_spill] sm:$0xff] %v2798_v4  ;;  %v2852_v26 = vpop.f32.mrf.mxu3 }
 0x106   : > { %4308 = vst [vmem:[#allocation31_spill] sm:$0xff] %v2800_v5 }
 0x107   : > { %2076 = vmatmul.msk.bf16.gmra.mxu0 %vm414_vm0, %v2156_v3  ;;  %2092 = vmatmul.msk.bf16.gmra.mxu1 %vm414_vm0, %v2156_v3  ;;  %4321 = vst [vmem:[#allocation44_spill] sm:$0xff] %v2852_v26 }
 0x108   : > { %2108 = vmatmul.msk.bf16.gmra.mxu2 %vm414_vm0, %v2156_v3 }
 0x109   : > { %2124 = vmatmul.msk.bf16.gmra.mxu3 %vm414_vm0, %v2156_v3 }
 0x10b   : > { %v2821_v14 = vpop.f32.mrf.mxu2 }
 0x10c   : > { %v2810_v8 = vpop.f32.mrf.mxu0  ;;  %v2812_v9 = vpop.f32.mrf.mxu1  ;;  %4313 = vst [vmem:[#allocation36_spill] sm:$0xff] %v2821_v14 }
 0x10d   : > { %4311 = vst [vmem:[#allocation34_spill] sm:$0xff] %v2812_v9  ;;  %v2862_v50 = vpop.f32.mrf.mxu3 }
 0x10e   : > { %4324 = vst [vmem:[#allocation47_spill] sm:$0xff] %v2862_v50 }
 0x113   : > { %v2833_v18 = vpop.f32.mrf.mxu2 }
 0x114   : > { %v2815_v11 = vpop.f32.mrf.mxu0  ;;  %v2819_v13 = vpop.f32.mrf.mxu1  ;;  %4316 = vst [vmem:[#allocation39_spill] sm:$0xff] %v2833_v18 }
 0x115   : > { %v2872_v22 = vpop.f32.mrf.mxu3 }
 0x116   : > { %4328 = vst [vmem:[#allocation51_spill] sm:$0xff] %v2872_v22 }
 0x117   : > { %2077 = vmatmul.msk.bf16.gmra.mxu0 %vm414_vm0, %v2157_v10  ;;  %2093 = vmatmul.msk.bf16.gmra.mxu1 %vm414_vm0, %v2157_v10 }
 0x118   : > { %2109 = vmatmul.msk.bf16.gmra.mxu2 %vm414_vm0, %v2157_v10 }
 0x119   : > { %2125 = vmatmul.msk.bf16.gmra.mxu3 %vm414_vm0, %v2157_v10 }
 0x11b   : > { %v2846_v23 = vpop.f32.mrf.mxu2 }
 0x11c   : > { %v2827_v15 = vpop.f32.mrf.mxu0  ;;  %v2829_v16 = vpop.f32.mrf.mxu1  ;;  %4319 = vst [vmem:[#allocation42_spill] sm:$0xff] %v2846_v23 }
 0x11d   : > { %4314 = vst [vmem:[#allocation37_spill] sm:$0xff] %v2829_v16  ;;  %v2880_v6 = vpop.f32.mrf.mxu3 }
 0x11e   : > { %4331 = vst [vmem:[#allocation54_spill] sm:$0xff] %v2880_v6 }
 0x123   : > { %v2854_v27 = vpop.f32.mrf.mxu2 }
 0x124   : > { %v2836_v20 = vpop.f32.mrf.mxu0  ;;  %v2838_v21 = vpop.f32.mrf.mxu1  ;;  %4322 = vst [vmem:[#allocation45_spill] sm:$0xff] %v2854_v27 }
 0x125   : > { %4317 = vst [vmem:[#allocation40_spill] sm:$0xff] %v2838_v21 }
 0x127   : > { %2078 = vmatmul.msk.bf16.gmra.mxu0 %vm414_vm0, %v2158_v19  ;;  %2094 = vmatmul.msk.bf16.gmra.mxu1 %vm414_vm0, %v2158_v19 }
 0x128   : > { %2110 = vmatmul.msk.bf16.gmra.mxu2 %vm414_vm0, %v2158_v19 }
 0x129   : > { %2126 = vmatmul.msk.bf16.gmra.mxu3 %vm414_vm0, %v2158_v19 }
 0x12b   : > { %v2866_v3 = vpop.f32.mrf.mxu2 }
 0x12c   : > { %v2848_v24 = vpop.f32.mrf.mxu0  ;;  %v2850_v25 = vpop.f32.mrf.mxu1  ;;  %4326 = vst [vmem:[#allocation49_spill] sm:$0xff] %v2866_v3 }
 0x12d   : > { %4320 = vst [vmem:[#allocation43_spill] sm:$0xff] %v2850_v25  ;;  %v2888_v3 = vpop.f32.mrf.mxu3 }
 0x12e   : > { %4334 = vst [vmem:[#allocation57_spill] sm:$0xff] %v2888_v3 }
 0x133   : > { %v2874_v26 = vpop.f32.mrf.mxu2 }
 0x134   : > { %v2856_v28 = vpop.f32.mrf.mxu0  ;;  %v2858_v35 = vpop.f32.mrf.mxu1  ;;  %4329 = vst [vmem:[#allocation52_spill] sm:$0xff] %v2874_v26 }
 0x135   : > { %4323 = vst [vmem:[#allocation46_spill] sm:$0xff] %v2858_v35  ;;  %v2898_v23 = vpop.f32.mrf.mxu3 }
 0x136   : > { %4336 = vst [vmem:[#allocation59_spill] sm:$0xff] %v2898_v23 }
 0x13b   : > { %v2882_v1 = vpop.f32.mrf.mxu2 }
 0x13c   : > { %v2860_v42 = vpop.f32.mrf.mxu0  ;;  %v2864_v58 = vpop.f32.mrf.mxu1  ;;  %4332 = vst [vmem:[#allocation55_spill] sm:$0xff] %v2882_v1 }
 0x13d   : > { %4325 = vst [vmem:[#allocation48_spill] sm:$0xff] %v2864_v58  ;;  %v2908_v49 = vpop.f32.mrf.mxu3 }
 0x13e   : > { %4339 = vst [vmem:[#allocation62_spill] sm:$0xff] %v2908_v49 }
 0x143   : > { %v2890_v27 = vpop.f32.mrf.mxu2 }
 0x144   : > { %v2868_v10 = vpop.f32.mrf.mxu0  ;;  %v2870_v19 = vpop.f32.mrf.mxu1  ;;  %4335 = vst [vmem:[#allocation58_spill] sm:$0xff] %v2890_v27  ;;  %v819_v27 = vmax.f32 %v2705_v29, %v2715_v32 }
 0x145   : > { %4327 = vst [vmem:[#allocation50_spill] sm:$0xff] %v2870_v19  ;;  %v2922_v57 = vpop.f32.mrf.mxu3 }
 0x146   : > { %v820_v14 = vmax.f32 %v819_v27, %v2722_v36  ;;  %4342 = vst [vmem:[#allocation65_spill] sm:$0xff] %v2922_v57 }
 0x148   : > { %v821_v23 = vmax.f32 %v820_v14, %v2732_v39 }
 0x14a   : > { %v822_v2 = vmax.f32 %v821_v23, %v2739_v43 }
 0x14b   : > { %v2902_v6 = vpop.f32.mrf.mxu2 }
 0x14c   : > { %v2876_v17 = vpop.f32.mrf.mxu0  ;;  %v2878_v12 = vpop.f32.mrf.mxu1  ;;  %4337 = vst [vmem:[#allocation60_spill] sm:$0xff] %v2902_v6  ;;  %v823_v62 = vmax.f32 %v822_v2, %v2751_v47 }
 0x14d   : > { %4330 = vst [vmem:[#allocation53_spill] sm:$0xff] %v2878_v12  ;;  %v2935_v43 = vpop.f32.mrf.mxu3 }
 0x14e   : > { %4345 = vst [vmem:[#allocation68_spill] sm:$0xff] %v2935_v43 }
 0x153   : > { %v2910_v3 = vpop.f32.mrf.mxu2 }
 0x154   : > { %v2884_v50 = vpop.f32.mrf.mxu0  ;;  %v2886_v61 = vpop.f32.mrf.mxu1  ;;  %4340 = vst [vmem:[#allocation63_spill] sm:$0xff] %v2910_v3  ;;  %v824_v3 = vmax.f32 %v823_v62, %v2760_v52  ;;  %v856_v62 = vmax.f32 %v2707_v30, %v2717_v33 }
 0x155   : > { %4333 = vst [vmem:[#allocation56_spill] sm:$0xff] %v2886_v61  ;;  %v2956_v30 = vpop.f32.mrf.mxu3 }
 0x156   : > { %v825_v27 = vmax.f32 %v824_v3, %v2768_v54  ;;  %v857_v3 = vmax.f32 %v856_v62, %v2724_v37 }
 0x158   : > { %v826_v36 = vmax.f32 %v825_v27, %v2777_v59 }
 0x15a   : > { %v827_v14 = vmax.f32 %v826_v36, %v2789_v63  ;;  %v858_v36 = vmax.f32 %v857_v3, %v2734_v40 }
 0x15b   : > { %v2924_v49 = vpop.f32.mrf.mxu2 }
 0x15c   : > { %v2892_v55 = vpop.f32.mrf.mxu0  ;;  %v2894_v22 = vpop.f32.mrf.mxu1  ;;  %4343 = vst [vmem:[#allocation66_spill] sm:$0xff] %v2924_v49  ;;  %v828_v23 = vmax.f32 %v827_v14, %v2798_v4  ;;  %v859_v14 = vmax.f32 %v858_v36, %v2741_v44 }
 0x15e   : > { %v829_v49 = vmax.f32 %v828_v23, %v2810_v8  ;;  %v860_v33 = vmax.f32 %v859_v14, %v2753_v48 }
 0x160   : > { %v830_v27 = vmax.f32 %v829_v49, %v2815_v11  ;;  %v861_v49 = vmax.f32 %v860_v33, %v2762_v53  ;;  %v2973_v53 = vpop.f32.mrf.mxu3 }
 0x161   : > { %4349 = vst [vmem:[#allocation72_spill] sm:$0xff] %v2973_v53 }
 0x162   : > { %v831_v63 = vmax.f32 %v830_v27, %v2827_v15  ;;  %v862_v27 = vmax.f32 %v861_v49, %v2772_v56 }
 0x163   : > { %v2937_v2 = vpop.f32.mrf.mxu2 }
 0x164   : > { %v2896_v26 = vpop.f32.mrf.mxu0  ;;  %v2900_v18 = vpop.f32.mrf.mxu1  ;;  %4346 = vst [vmem:[#allocation69_spill] sm:$0xff] %v2937_v2  ;;  %v832_v43 = vmax.f32 %v831_v63, %v2836_v20  ;;  %v863_v36 = vmax.f32 %v862_v27, %v2779_v60 }
 0x166   : > { %v833_v23 = vmax.f32 %v832_v43, %v2848_v24  ;;  %v864_v43 = vmax.f32 %v863_v36, %v2791_v0 }
 0x168   : > { %v834_v3 = vmax.f32 %v833_v23, %v2856_v28  ;;  %v865_v33 = vmax.f32 %v864_v43, %v2800_v5 }
 0x16a   : > { %v835_v63 = vmax.f32 %v834_v3, %v2860_v42  ;;  %v866_v3 = vmax.f32 %v865_v33, %v2812_v9  ;;  %v2991_v9 = vpop.f32.mrf.mxu3 }
 0x16b   : > { %v2958_v62 = vpop.f32.mrf.mxu2  ;;  %4351 = vst [vmem:[#allocation74_spill] sm:$0xff] %v2991_v9 }
 0x16c   : > { %v2904_v1 = vpop.f32.mrf.mxu0  ;;  %v2906_v45 = vpop.f32.mrf.mxu1  ;;  %v836_v44 = vmax.f32 %v835_v63, %v2868_v10  ;;  %v867_v63 = vmax.f32 %v866_v3, %v2819_v13  ;;  %v893_v3 = vmax.f32 %v2713_v31, %v2719_v34 }
 0x16d   : > { %4338 = vst [vmem:[#allocation61_spill] sm:$0xff] %v2906_v45 }
 0x16e   : > { %v837_v14 = vmax.f32 %v836_v44, %v2876_v17  ;;  %v868_v44 = vmax.f32 %v867_v63, %v2829_v16 }
 0x170   : > { %v838_v23 = vmax.f32 %v837_v14, %v2884_v50  ;;  %v869_v53 = vmax.f32 %v868_v44, %v2838_v21 }
 0x172   : > { %v839_v27 = vmax.f32 %v838_v23, %v2892_v55  ;;  %v870_v33 = vmax.f32 %v869_v53, %v2850_v25  ;;  %v894_v53 = vmax.f32 %v893_v3, %v2730_v38  ;;  %v3013_v25 = vpop.f32.mrf.mxu3 }
 0x173   : > { %v2976_v49 = vpop.f32.mrf.mxu2  ;;  %4353 = vst [vmem:[#allocation76_spill] sm:$0xff] %v3013_v25  ;;  %v4357_v25 = vld [vmem:[#allocation25_spill] sm:$0xff] }
 0x174   : > { %v2915_v7 = vpop.f32.mrf.mxu0  ;;  %v2919_v6 = vpop.f32.mrf.mxu1  ;;  %v840_v36 = vmax.f32 %v839_v27, %v2896_v26  ;;  %v871_v63 = vmax.f32 %v870_v33, %v2858_v35  ;;  %v895_v33 = vmax.f32 %v894_v53, %v2736_v41 }
 0x175   : > { %4341 = vst [vmem:[#allocation64_spill] sm:$0xff] %v2919_v6 }
 0x176   : > { %v841_v43 = vmax.f32 %v840_v36, %v2904_v1 }
 0x178   : > { %v842_v14 = vmax.f32 %v841_v43, %v2915_v7  ;;  %v872_v43 = vmax.f32 %v871_v63, %v2864_v58 }
 0x17a   : > { %v873_v9 = vmax.f32 %v872_v43, %v2870_v19  ;;  %v896_v43 = vmax.f32 %v895_v33, %v2749_v46  ;;  %v3033_v46 = vpop.f32.mrf.mxu3 }
 0x17b   : > { %v2996_v27 = vpop.f32.mrf.mxu2 }
 0x17c   : > { %v2927_v45 = vpop.f32.mrf.mxu0  ;;  %v2932_v39 = vpop.f32.mrf.mxu1  ;;  %v874_v34 = vmax.f32 %v873_v9, %v2878_v12  ;;  %v897_v41 = vmax.f32 %v896_v43, %v2758_v51  ;;  %v4356_v12 = vld [vmem:[#allocation23_spill] sm:$0xff]  ;;  %v4363_v51 = vld [vmem:[#allocation16_spill] sm:$0xff] }
 0x17d   : > { %4344 = vst [vmem:[#allocation67_spill] sm:$0xff] %v2932_v39  ;;  %v843_v23 = vmax.f32 %v842_v14, %v2927_v45 }
 0x184   : > { %v2939_v57 = vpop.f32.mrf.mxu0  ;;  %v2950_v4 = vpop.f32.mrf.mxu1 }
 0x185   : > { %4347 = vst [vmem:[#allocation70_spill] sm:$0xff] %v2950_v4  ;;  %v844_v36 = vmax.f32 %v843_v23, %v2939_v57  ;;  %v875_v23 = vmax.f32 %v874_v34, %v2886_v61  ;;  %v4355_v34 = vld [vmem:[#allocation61_spill] sm:$0xff] }
 0x18c   : > { %v2952_v2 = vpop.f32.mrf.mxu0  ;;  %v2970_v48 = vpop.f32.mrf.mxu1 }
 0x18d   : > { %4348 = vst [vmem:[#allocation71_spill] sm:$0xff] %v2970_v48  ;;  %v845_v21 = vmax.f32 %v844_v36, %v2952_v2  ;;  %v3016_v36 = vpop.f32.mrf.mxu2 }
 0x194   : > { %v2966_v40 = vpop.f32.mrf.mxu0  ;;  %v2988_v5 = vpop.f32.mrf.mxu1 }
 0x195   : > { %4350 = vst [vmem:[#allocation73_spill] sm:$0xff] %v2988_v5  ;;  %v846_v14 = vmax.f32 %v845_v21, %v2966_v40  ;;  %v876_v21 = vmax.f32 %v875_v23, %v2894_v22  ;;  %v3035_v43 = vpop.f32.mrf.mxu2 }
 0x197   : > { %v877_v53 = vmax.f32 %v876_v21, %v2900_v18 }
 0x199   : > { %v878_v38 = vmax.f32 %v877_v53, %v4355_v34 }
 0x19b   : > { %v879_v19 = vmax.f32 %v878_v38, %v2919_v6 }
 0x19c   : > { %v2982_v0 = vpop.f32.mrf.mxu0  ;;  %v3010_v35 = vpop.f32.mrf.mxu1 }
 0x19d   : > { %v847_v31 = vmax.f32 %v846_v14, %v2982_v0  ;;  %4352 = vst [vmem:[#allocation75_spill] sm:$0xff] %v3010_v35 }
 0x1a4   : > { %v3000_v44 = vpop.f32.mrf.mxu0  ;;  %v3029_v23 = vpop.f32.mrf.mxu1 }
 0x1a5   : > { %v848_v63 = vmax.f32 %v847_v31, %v3000_v44  ;;  %v898_v31 = vmax.f32 %v897_v41, %v4356_v12  ;;  %4358 = vst [vmem:[#allocation78_spill] sm:$0xff] %v3029_v23  ;;  %v4360_v41 = vld [vmem:[#allocation33_spill] sm:$0xff]  ;;  %v4361_v12 = vld [vmem:[#allocation36_spill] sm:$0xff] }
 0x1a7   : > { %v899_v16 = vmax.f32 %v898_v31, %v4357_v25  ;;  %v4362_v25 = vld [vmem:[#allocation19_spill] sm:$0xff] }
 0x1a8   : > { %v930_v6 = vmax.f32 %v4363_v51, %v4362_v25  ;;  %v3058_v25 = vpop.f32.mrf.mxu3 }
 0x1ac   : > { %v3018_v3 = vpop.f32.mrf.mxu0 }
 0x1ad   : > { %4354 = vst [vmem:[#allocation77_spill] sm:$0xff] %v3018_v3  ;;  %v849_v9 = vmax.f32 %v848_v63, %v3018_v3  ;;  %v880_v63 = vmax.f32 %v879_v19, %v2932_v39  ;;  %v4359_v3 = vld [vmem:[#allocation29_spill] sm:$0xff]  ;;  %v4365_v39 = vld [vmem:[#allocation42_spill] sm:$0xff] }
 0x1ae   : > { %v900_v21 = vmax.f32 %v899_v16, %v4359_v3  ;;  %v4364_v16 = vld [vmem:[#allocation39_spill] sm:$0xff] }
 0x1af   : > { %v850_v14 = vrot.slane %v849_v9, 4 }
 0x1b1   : > { %v851_v61 = vmax.f32 %v849_v9, %v850_v14  ;;  %v881_v9 = vmax.f32 %v880_v63, %v2950_v4  ;;  %v901_v14 = vmax.f32 %v900_v21, %v4360_v41  ;;  %v3049_v4 = vpop.f32.mrf.mxu1  ;;  %v4367_v21 = vld [vmem:[#allocation22_spill] sm:$0xff] }
 0x1b2   : > { %4366 = vst [vmem:[#allocation79_spill] sm:$0xff] %v3049_v4  ;;  %v931_v41 = vmax.f32 %v930_v6, %v4367_v21  ;;  %v4370_v6 = vld [vmem:[#allocation49_spill] sm:$0xff] }
 0x1b3   : > { %v852_v58 = vrot.slane %v851_v61, 2  ;;  %v882_v38 = vmax.f32 %v881_v9, %v2970_v48  ;;  %v902_v31 = vmax.f32 %v901_v14, %v4361_v12  ;;  %v4375_v48 = vld [vmem:[#allocation28_spill] sm:$0xff] }
 0x1b5   : > { %v853_v33 = vmax.f32 %v851_v61, %v852_v58  ;;  %v883_v61 = vmax.f32 %v882_v38, %v2988_v5  ;;  %v903_v19 = vmax.f32 %v902_v31, %v4364_v16  ;;  %v3060_v31 = vpop.f32.mrf.mxu2 }
 0x1b7   : > { %v854_v53 = vrot.slane %v853_v33, 1  ;;  %v884_v3 = vmax.f32 %v883_v61, %v3010_v35  ;;  %v904_v63 = vmax.f32 %v903_v19, %v4365_v39  ;;  %v4369_v61 = vld [vmem:[#allocation9_spill] sm:$0xff] }
 0x1b9   : > { %v3044_v58 = vmax.f32 %v853_v33, %v854_v53  ;;  %v885_v9 = vmax.f32 %v884_v3, %v3029_v23  ;;  %v4368_v33 = vld [vmem:[#allocation45_spill] sm:$0xff]  ;;  %v4371_v3 = vld [vmem:[#allocation11_spill] sm:$0xff]  ;;  %v4373_v23 = vld [vmem:[#allocation52_spill] sm:$0xff] }
 0x1ba   : > { %v905_v53 = vmax.f32 %v904_v63, %v4368_v33  ;;  %v4374_v33 = vld [vmem:[#allocation14_spill] sm:$0xff] }
 0x1bb   : > { %v967_v14 = vsub.f32 %v2705_v29, %v3044_v58  ;;  %v971_v38 = vsub.f32 %v2715_v32, %v3044_v58  ;;  %v975_v19 = vsub.f32 %v4369_v61, %v3044_v58  ;;  %v886_v51 = vmax.f32 %v885_v9, %v3049_v4  ;;  %v4372_v29 = vld [vmem:[#allocation24_spill] sm:$0xff]  ;;  %v4376_v9 = vld [vmem:[#allocation55_spill] sm:$0xff] }
 0x1bc   : > { %v906_v21 = vmax.f32 %v905_v53, %v4370_v6  ;;  %v979_v39 = vsub.f32 %v4371_v3, %v3044_v58  ;;  %v932_v16 = vmax.f32 %v931_v41, %v4372_v29  ;;  %v983_v35 = vsub.f32 %v4374_v33, %v3044_v58  ;;  %v4377_v41 = vld [vmem:[#allocation32_spill] sm:$0xff] }
 0x1bd   : > { %v1095_v12 = vmul.f32 1.442695, %v967_v14  ;;  %v1103_v32 = vmul.f32 1.442695, %v971_v38  ;;  %v1111_v5 = vmul.f32 1.442695, %v975_v19  ;;  %v987_v53 = vsub.f32 %v2751_v47, %v3044_v58 }
 0x1be   : > { %v907_v63 = vmax.f32 %v906_v21, %v4373_v23  ;;  %v933_v34 = vmax.f32 %v932_v16, %v4375_v48  ;;  %v887_v61 = vrot.slane %v886_v51, 4  ;;  %v1119_v3 = vmul.f32 1.442695, %v979_v39  ;;  %v4378_v38 = vld [vmem:[#allocation58_spill] sm:$0xff]  ;;  %v4379_v19 = vld [vmem:[#allocation35_spill] sm:$0xff]  ;;  %v4380_v48 = vld [vmem:[#allocation60_spill] sm:$0xff] }
 0x1bf   : > { %2217 = vpow2.f32 %v1095_v12  ;;  %v991_v21 = vsub.f32 %v2760_v52, %v3044_v58  ;;  %v1127_v33 = vmul.f32 1.442695, %v983_v35  ;;  %v995_v39 = vsub.f32 %v2768_v54, %v3044_v58  ;;  %v4384_v35 = vld [vmem:[#allocation63_spill] sm:$0xff] }
 0x1c0   : > { %v908_v4 = vmax.f32 %v907_v63, %v4376_v9  ;;  %2219 = vpow2.f32 %v1103_v32  ;;  %v934_v14 = vmax.f32 %v933_v34, %v4377_v41  ;;  %v888_v12 = vmax.f32 %v886_v51, %v887_v61  ;;  %v3082_v63 = vpop.f32.mrf.mxu3  ;;  %v3084_v9 = vpop.f32.mrf.mxu2  ;;  %v4382_v34 = vld [vmem:[#allocation38_spill] sm:$0xff]  ;;  %v4385_v61 = vld [vmem:[#allocation41_spill] sm:$0xff] }
 0x1c1   : > { %2221 = vpow2.f32 %v1111_v5  ;;  %v1135_v47 = vmul.f32 1.442695, %v987_v53  ;;  %v999_v51 = vsub.f32 %v2777_v59, %v3044_v58 }
 0x1c2   : > { %v909_v29 = vmax.f32 %v908_v4, %v4378_v38  ;;  %v935_v16 = vmax.f32 %v934_v14, %v4379_v19  ;;  %2223 = vpow2.f32 %v1119_v3  ;;  %v889_v3 = vrot.slane %v888_v12, 2  ;;  %v4387_v19 = vld [vmem:[#allocation66_spill] sm:$0xff]  ;;  %v4393_v38 = vld [vmem:[#allocation47_spill] sm:$0xff] }
 0x1c3   : > { %2225 = vpow2.f32 %v1127_v33  ;;  %v4391_v33 = vld [vmem:[#allocation69_spill] sm:$0xff] }
 0x1c4   : > { %v910_v23 = vmax.f32 %v909_v29, %v4380_v48  ;;  %v936_v52 = vmax.f32 %v935_v16, %v4382_v34  ;;  %v1143_v29 = vmul.f32 1.442695, %v991_v21  ;;  %v4388_v16 = vld [vmem:[#allocation26_spill] sm:$0xff]  ;;  %2227 = vpow2.f32 %v1135_v47 }
 0x1c5   : > { %v3088_v4 = vpop.eup %2217  ;;  %v1003_v34 = vsub.f32 %v4388_v16, %v3044_v58  ;;  %v890_v16 = vmax.f32 %v888_v12, %v889_v3  ;;  %v1015_v3 = vsub.f32 %v2815_v11, %v3044_v58 }
 0x1c6   : > { %4381 = vst [vmem:[#allocation9_spill] sm:$0xff] %v3088_v4  ;;  %v3091_v5 = vpop.eup %2219  ;;  %v911_v32 = vmax.f32 %v910_v23, %v4384_v35  ;;  %v937_v14 = vmax.f32 %v936_v52, %v4385_v61  ;;  %v1151_v23 = vmul.f32 1.442695, %v995_v39  ;;  %v4389_v35 = vld [vmem:[#allocation44_spill] sm:$0xff]  ;;  %2229 = vpow2.f32 %v1143_v29 }
 0x1c7   : > { %4383 = vst [vmem:[#allocation49_spill] sm:$0xff] %v3091_v5  ;;  %v1351_v54 = vadd.f32 %v3091_v5, %v3088_v4  ;;  %v3099_v53 = vpop.eup %2221  ;;  %v4392_v5 = vld [vmem:[#allocation30_spill] sm:$0xff]  ;;  %v1159_v61 = vmul.f32 1.442695, %v999_v51 }
 0x1c8   : > { %4386 = vst [vmem:[#allocation11_spill] sm:$0xff] %v3099_v53  ;;  %v912_v41 = vmax.f32 %v911_v32, %v4387_v19  ;;  %v938_v48 = vmax.f32 %v937_v14, %v4389_v35  ;;  %v3106_v21 = vpop.eup %2223  ;;  %v1007_v4 = vsub.f32 %v4392_v5, %v3044_v58  ;;  %v1011_v14 = vsub.f32 %v2810_v8, %v3044_v58  ;;  %v3123_v51 = vpop.f32.mrf.mxu3  ;;  %v4397_v8 = vld [vmem:[#allocation54_spill] sm:$0xff] }
 0x1c9   : > { %v1352_v59 = vadd.f32 %v3099_v53, %v1351_v54  ;;  %4390 = vst [vmem:[#allocation14_spill] sm:$0xff] %v3106_v21  ;;  %v3113_v47 = vpop.eup %2225  ;;  %2231 = vpow2.f32 %v1151_v23  ;;  %v1167_v54 = vmul.f32 1.442695, %v1003_v34  ;;  %v3125_v12 = vpop.f32.mrf.mxu2 }
 0x1ca   : > { %v913_v52 = vmax.f32 %v912_v41, %v4391_v33  ;;  %v939_v32 = vmax.f32 %v938_v48, %v4393_v38  ;;  %4394 = vst [vmem:[#allocation26_spill] sm:$0xff] %v3113_v47  ;;  %v4395_v41 = vld [vmem:[#allocation51_spill] sm:$0xff]  ;;  %v3120_v29 = vpop.eup %2227  ;;  %2233 = vpow2.f32 %v1159_v61 }
 0x1cb   : > { %v1353_v19 = vadd.f32 %v3106_v21, %v1352_v59  ;;  %4396 = vst [vmem:[#allocation44_spill] sm:$0xff] %v3120_v29  ;;  %v1175_v59 = vmul.f32 1.442695, %v1007_v4  ;;  %2235 = vpow2.f32 %v1167_v54  ;;  %v1183_v21 = vmul.f32 1.442695, %v1011_v14 }
 0x1cc   : > { %v914_v39 = vmax.f32 %v913_v52, %v2958_v62  ;;  %v940_v53 = vmax.f32 %v939_v32, %v4395_v41  ;;  %v891_v52 = vrot.slane %v890_v16, 1  ;;  %v3131_v32 = vpop.eup %2229 }
 0x1cd   : > { %v1354_v5 = vadd.f32 %v3113_v47, %v1353_v19  ;;  %4398 = vst [vmem:[#allocation69_spill] sm:$0xff] %v3131_v32  ;;  %v4399_v47 = vld [vmem:[#allocation57_spill] sm:$0xff]  ;;  %2237 = vpow2.f32 %v1175_v59  ;;  %v1035_v59 = vsub.f32 %v2860_v42, %v3044_v58  ;;  %v4408_v42 = vld [vmem:[#allocation7_spill] sm:$0xff] }
 0x1ce   : > { %v915_v48 = vmax.f32 %v914_v39, %v2976_v49  ;;  %v941_v23 = vmax.f32 %v940_v53, %v4397_v8  ;;  %v1019_v39 = vsub.f32 %v2827_v15, %v3044_v58  ;;  %v1023_v53 = vsub.f32 %v2836_v20, %v3044_v58 }
 0x1cf   : > { %v1355_v34 = vadd.f32 %v3120_v29, %v1354_v5  ;;  %v3138_v61 = vpop.eup %2231  ;;  %v1191_v5 = vmul.f32 1.442695, %v1015_v3  ;;  %v4401_v29 = vld [vmem:[#allocation59_spill] sm:$0xff]  ;;  %v3145_v15 = vmax.f32 %v890_v16, %v891_v52  ;;  %2239 = vpow2.f32 %v1183_v21 }
 0x1d0   : > { %v916_v19 = vmax.f32 %v915_v48, %v2996_v27  ;;  %v942_v41 = vmax.f32 %v941_v23, %v4399_v47  ;;  %4400 = vst [vmem:[#allocation30_spill] sm:$0xff] %v3138_v61  ;;  %v3147_v14 = vpop.eup %2233  ;;  %v1027_v23 = vsub.f32 %v2848_v24, %v3044_v58  ;;  %v1031_v20 = vsub.f32 %v2856_v28, %v3044_v58  ;;  %v3167_v28 = vpop.f32.mrf.mxu3 }
 0x1d1   : > { %v1356_v11 = vadd.f32 %v3131_v32, %v1355_v34  ;;  %4402 = vst [vmem:[#allocation47_spill] sm:$0xff] %v3147_v14  ;;  %v1199_v34 = vmul.f32 1.442695, %v1019_v39  ;;  %v3156_v3 = vpop.eup %2235  ;;  %2241 = vpow2.f32 %v1191_v5  ;;  %v1207_v52 = vmul.f32 1.442695, %v1023_v53  ;;  %v4406_v39 = vld [vmem:[#allocation5_spill] sm:$0xff] }
 0x1d2   : > { %v917_v4 = vmax.f32 %v916_v19, %v3016_v36  ;;  %v943_v48 = vmax.f32 %v942_v41, %v4401_v29  ;;  %v4403_v19 = vld [vmem:[#allocation62_spill] sm:$0xff]  ;;  %4404 = vst [vmem:[#allocation57_spill] sm:$0xff] %v3156_v3  ;;  %v972_v53 = vsub.f32 %v4408_v42, %v3145_v15  ;;  %v4409_v5 = vld [vmem:[#allocation68_spill] sm:$0xff] }
 0x1d3   : > { %v1357_v8 = vadd.f32 %v3138_v61, %v1356_v11  ;;  %v4405_v11 = vld [vmem:[#allocation65_spill] sm:$0xff]  ;;  %v3170_v61 = vpop.f32.mrf.mxu2  ;;  %2243 = vpow2.f32 %v1199_v34 }
 0x1d4   : > { %v918_v54 = vmax.f32 %v917_v4, %v3035_v43  ;;  %v944_v32 = vmax.f32 %v943_v48, %v4403_v19  ;;  %v968_v4 = vsub.f32 %v4406_v39, %v3145_v15  ;;  %v3165_v48 = vpop.eup %2237  ;;  %2245 = vpow2.f32 %v1207_v52  ;;  %v4412_v52 = vld [vmem:[#allocation12_spill] sm:$0xff] }
 0x1d5   : > { %v1358_v41 = vadd.f32 %v3147_v14, %v1357_v8  ;;  %4407 = vst [vmem:[#allocation59_spill] sm:$0xff] %v3165_v48  ;;  %v3178_v14 = vpop.eup %2239 }
 0x1d6   : > { %v919_v16 = vmax.f32 %v918_v54, %v3060_v31  ;;  %v945_v24 = vmax.f32 %v944_v32, %v4405_v11  ;;  %v1215_v54 = vmul.f32 1.442695, %v1027_v23  ;;  %4410 = vst [vmem:[#allocation62_spill] sm:$0xff] %v3178_v14  ;;  %v976_v23 = vsub.f32 %v2724_v37, %v3145_v15 }
 0x1d7   : > { %v1359_v21 = vadd.f32 %v3156_v3, %v1358_v41  ;;  %v1039_v41 = vsub.f32 %v2868_v10, %v3044_v58  ;;  %v1223_v3 = vmul.f32 1.442695, %v1031_v20  ;;  %v1097_v20 = vmul.f32 1.442695, %v968_v4  ;;  %v3189_v42 = vpop.eup %2241 }
 0x1d8   : > { %v920_v8 = vmax.f32 %v919_v16, %v3084_v9  ;;  %v946_v32 = vmax.f32 %v945_v24, %v4409_v5  ;;  %v1231_v16 = vmul.f32 1.442695, %v1035_v59  ;;  %v1043_v24 = vsub.f32 %v2876_v17, %v3044_v58  ;;  %4411 = vst [vmem:[#allocation5_spill] sm:$0xff] %v3189_v42 }
 0x1d9   : > { %v1360_v39 = vadd.f32 %v3165_v48, %v1359_v21  ;;  %2247 = vpow2.f32 %v1215_v54  ;;  %v980_v59 = vsub.f32 %v4412_v52, %v3145_v15  ;;  %v1047_v37 = vsub.f32 %v2884_v50, %v3044_v58  ;;  %v3197_v17 = vpop.eup %2243 }
 0x1da   : > { %v921_v11 = vmax.f32 %v920_v8, %v3125_v12  ;;  %v3184_v34 = vmax.f32 %v946_v32, %v2956_v30  ;;  %v1105_v8 = vmul.f32 1.442695, %v972_v53  ;;  %2249 = vpow2.f32 %v1223_v3  ;;  %4413 = vst [vmem:[#allocation7_spill] sm:$0xff] %v3197_v17  ;;  %v3206_v3 = vpop.eup %2245 }
 0x1db   : > { %v1361_v10 = vadd.f32 %v3178_v14, %v1360_v39  ;;  %v1239_v32 = vmul.f32 1.442695, %v1039_v41  ;;  %v1051_v4 = vsub.f32 %v2892_v55, %v3044_v58  ;;  %2251 = vpow2.f32 %v1231_v16 }
 0x1dc   : > { %v922_v21 = vmax.f32 %v921_v11, %v3170_v61  ;;  %v4414_v11 = vld [vmem:[#allocation15_spill] sm:$0xff]  ;;  %v1113_v39 = vmul.f32 1.442695, %v976_v23  ;;  %v1055_v53 = vsub.f32 %v2896_v26, %v3044_v58  ;;  %v1247_v52 = vmul.f32 1.442695, %v1043_v24 }
 0x1dd   : > { %v1362_v48 = vadd.f32 %v3189_v42, %v1361_v10  ;;  %v984_v54 = vsub.f32 %v4414_v11, %v3145_v15  ;;  %2253 = vpow2.f32 %v1097_v20  ;;  %v1059_v41 = vsub.f32 %v2904_v1, %v3044_v58  ;;  %v4415_v10 = vld [vmem:[#allocation18_spill] sm:$0xff]  ;;  %v4417_v1 = vld [vmem:[#allocation21_spill] sm:$0xff] }
 0x1de   : > { %v988_v55 = vsub.f32 %v4415_v10, %v3145_v15  ;;  %2255 = vpow2.f32 %v1105_v8  ;;  %v1121_v16 = vmul.f32 1.442695, %v980_v59  ;;  %v1063_v23 = vsub.f32 %v2915_v7, %v3044_v58  ;;  %v3223_v59 = vpop.f32.mrf.mxu2 }
 0x1df   : > { %v1363_v50 = vadd.f32 %v3197_v17, %v1362_v48  ;;  %2257 = vpow2.f32 %v1239_v32  ;;  %v1255_v11 = vmul.f32 1.442695, %v1047_v37  ;;  %v3215_v24 = vpop.eup %2247  ;;  %v3217_v48 = vpop.f32.mrf.mxu3  ;;  %v1067_v20 = vsub.f32 %v2927_v45, %v3044_v58 }
 0x1e0   : > { %4416 = vst [vmem:[#allocation68_spill] sm:$0xff] %v3215_v24  ;;  %v992_v14 = vsub.f32 %v4417_v1, %v3145_v15  ;;  %2259 = vpow2.f32 %v1113_v39  ;;  %v1129_v8 = vmul.f32 1.442695, %v984_v54  ;;  %v3225_v10 = vpop.eup %2249  ;;  %v1071_v7 = vsub.f32 %v2939_v57, %v3044_v58 }
 0x1e1   : > { %v1364_v26 = vadd.f32 %v3206_v3, %v1363_v50  ;;  %4418 = vst [vmem:[#allocation12_spill] sm:$0xff] %v3225_v10  ;;  %2261 = vpow2.f32 %v1247_v52  ;;  %v1263_v37 = vmul.f32 1.442695, %v1051_v4  ;;  %v3230_v50 = vpop.eup %2251  ;;  %v1075_v45 = vsub.f32 %v2952_v2, %v3044_v58 }
 0x1e2   : > { %4419 = vst [vmem:[#allocation15_spill] sm:$0xff] %v3230_v50  ;;  %v996_v39 = vsub.f32 %v2772_v56, %v3145_v15  ;;  %2263 = vpow2.f32 %v1121_v16  ;;  %v1137_v54 = vmul.f32 1.442695, %v988_v55  ;;  %v1271_v17 = vmul.f32 1.442695, %v1055_v53 }
 0x1e3   : > { %v1365_v32 = vadd.f32 %v3215_v24, %v1364_v26  ;;  %v3236_v1 = vpop.eup %2253  ;;  %2265 = vpow2.f32 %v1255_v11  ;;  %v923_v4 = vmax.f32 %v922_v21, %v3223_v59  ;;  %v1279_v26 = vmul.f32 1.442695, %v1059_v41  ;;  %v4424_v41 = vld [vmem:[#allocation27_spill] sm:$0xff] }
 0x1e4   : > { %4420 = vst [vmem:[#allocation18_spill] sm:$0xff] %v3236_v1  ;;  %v3240_v52 = vpop.eup %2255  ;;  %v1000_v42 = vsub.f32 %v2779_v60, %v3145_v15  ;;  %2267 = vpow2.f32 %v1129_v8  ;;  %v1145_v2 = vmul.f32 1.442695, %v992_v14  ;;  %v1079_v21 = vsub.f32 %v2966_v40, %v3044_v58 }
 0x1e5   : > { %v1366_v57 = vadd.f32 %v3225_v10, %v1365_v32  ;;  %4421 = vst [vmem:[#allocation21_spill] sm:$0xff] %v3240_v52  ;;  %v3244_v24 = vpop.eup %2257  ;;  %2269 = vpow2.f32 %v1263_v37  ;;  %v1388_v53 = vadd.f32 %v3240_v52, %v3236_v1  ;;  %v924_v55 = vrot.slane %v923_v4, 4  ;;  %v4427_v1 = vld [vmem:[#allocation31_spill] sm:$0xff] }
 0x1e6   : > { %4422 = vst [vmem:[#allocation80_spill] sm:$0xff] %v3244_v24  ;;  %v3249_v16 = vpop.eup %2259  ;;  %v1004_v11 = vsub.f32 %v4424_v41, %v3145_v15  ;;  %2271 = vpow2.f32 %v1137_v54  ;;  %v1153_v60 = vmul.f32 1.442695, %v996_v39  ;;  %v1287_v8 = vmul.f32 1.442695, %v1063_v23 }
 0x1e7   : > { %v1367_v56 = vadd.f32 %v3230_v50, %v1366_v57  ;;  %4423 = vst [vmem:[#allocation81_spill] sm:$0xff] %v3249_v16  ;;  %v3255_v14 = vpop.eup %2261  ;;  %2273 = vpow2.f32 %v1271_v17  ;;  %v1389_v32 = vadd.f32 %v3249_v16, %v1388_v53  ;;  %v1295_v52 = vmul.f32 1.442695, %v1067_v20  ;;  %v4430_v53 = vld [vmem:[#allocation34_spill] sm:$0xff]  ;;  %v4438_v16 = vld [vmem:[#allocation40_spill] sm:$0xff] }
 0x1e8   : > { %4425 = vst [vmem:[#allocation27_spill] sm:$0xff] %v3255_v14  ;;  %v3259_v57 = vpop.eup %2263  ;;  %v1008_v50 = vsub.f32 %v4427_v1, %v3145_v15  ;;  %2275 = vpow2.f32 %v1145_v2  ;;  %v1161_v40 = vmul.f32 1.442695, %v1000_v42  ;;  %v925_v23 = vmax.f32 %v923_v4, %v924_v55 }
 0x1e9   : > { %v1368_v37 = vadd.f32 %v3244_v24, %v1367_v56  ;;  %4426 = vst [vmem:[#allocation82_spill] sm:$0xff] %v3259_v57  ;;  %v3263_v10 = vpop.eup %2265  ;;  %2277 = vpow2.f32 %v1279_v26  ;;  %v1390_v17 = vadd.f32 %v3259_v57, %v1389_v32  ;;  %v3269_v56 = vpop.f32.mrf.mxu3  ;;  %v1083_v20 = vsub.f32 %v2982_v0, %v3044_v58 }
 0x1ea   : > { %4428 = vst [vmem:[#allocation31_spill] sm:$0xff] %v3263_v10  ;;  %v3267_v54 = vpop.eup %2267  ;;  %v1012_v1 = vsub.f32 %v4430_v53, %v3145_v15  ;;  %2279 = vpow2.f32 %v1153_v60  ;;  %v1169_v42 = vmul.f32 1.442695, %v1004_v11  ;;  %v1303_v26 = vmul.f32 1.442695, %v1071_v7 }
 0x1eb   : > { %v1369_v39 = vadd.f32 %v3255_v14, %v1368_v37  ;;  %4429 = vst [vmem:[#allocation83_spill] sm:$0xff] %v3267_v54  ;;  %v3275_v2 = vpop.eup %2269  ;;  %2281 = vpow2.f32 %v1287_v8  ;;  %v1391_v4 = vadd.f32 %v3267_v54, %v1390_v17  ;;  %v1311_v37 = vmul.f32 1.442695, %v1075_v45  ;;  %v4435_v45 = vld [vmem:[#allocation37_spill] sm:$0xff] }
 0x1ec   : > { %4431 = vst [vmem:[#allocation34_spill] sm:$0xff] %v3275_v2  ;;  %v3279_v55 = vpop.eup %2271  ;;  %v1016_v32 = vsub.f32 %v2819_v13, %v3145_v15  ;;  %2283 = vpow2.f32 %v1161_v40  ;;  %v1177_v0 = vmul.f32 1.442695, %v1008_v50  ;;  %v926_v7 = vrot.slane %v925_v23, 2 }
 0x1ed   : > { %v1370_v41 = vadd.f32 %v3263_v10, %v1369_v39  ;;  %4432 = vst [vmem:[#allocation84_spill] sm:$0xff] %v3279_v55  ;;  %v3283_v57 = vpop.eup %2273  ;;  %2285 = vpow2.f32 %v1295_v52  ;;  %v1392_v60 = vadd.f32 %v3279_v55, %v1391_v4  ;;  %v1087_v39 = vsub.f32 %v3000_v44, %v3044_v58 }
 0x1ee   : > { %4433 = vst [vmem:[#allocation85_spill] sm:$0xff] %v3283_v57  ;;  %v3287_v8 = vpop.eup %2275  ;;  %v1020_v17 = vsub.f32 %v4435_v45, %v3145_v15  ;;  %2287 = vpow2.f32 %v1169_v42  ;;  %v1185_v13 = vmul.f32 1.442695, %v1012_v1  ;;  %v1319_v50 = vmul.f32 1.442695, %v1079_v21 }
 0x1ef   : > { %v1371_v11 = vadd.f32 %v3275_v2, %v1370_v41  ;;  %4434 = vst [vmem:[#allocation86_spill] sm:$0xff] %v3287_v8  ;;  %v3293_v40 = vpop.eup %2277  ;;  %2289 = vpow2.f32 %v1303_v26  ;;  %v1393_v53 = vadd.f32 %v3287_v8, %v1392_v60  ;;  %v1327_v4 = vmul.f32 1.442695, %v1083_v20  ;;  %v4442_v20 = vld [vmem:[#allocation43_spill] sm:$0xff] }
 0x1f0   : > { %4436 = vst [vmem:[#allocation37_spill] sm:$0xff] %v3293_v40  ;;  %v3297_v41 = vpop.eup %2279  ;;  %v1024_v14 = vsub.f32 %v4438_v16, %v3145_v15  ;;  %2291 = vpow2.f32 %v1177_v0  ;;  %v1193_v44 = vmul.f32 1.442695, %v1016_v32  ;;  %v927_v21 = vmax.f32 %v925_v23, %v926_v7  ;;  %v4445_v23 = vld [vmem:[#allocation74_spill] sm:$0xff] }
 0x1f1   : > { %v1372_v52 = vadd.f32 %v3283_v57, %v1371_v11  ;;  %4437 = vst [vmem:[#allocation87_spill] sm:$0xff] %v3297_v41  ;;  %v3301_v24 = vpop.eup %2281  ;;  %2293 = vpow2.f32 %v1311_v37  ;;  %v1394_v42 = vadd.f32 %v3297_v41, %v1393_v53  ;;  %v4441_v11 = vld [vmem:[#allocation72_spill] sm:$0xff]  ;;  %v1028_v45 = vsub.f32 %v4442_v20, %v3145_v15  ;;  %v3318_v55 = vpop.f32.mrf.mxu3 }
 0x1f2   : > { %4439 = vst [vmem:[#allocation40_spill] sm:$0xff] %v3301_v24  ;;  %v3305_v26 = vpop.eup %2283  ;;  %v948_v60 = vmax.f32 %v3184_v34, %v4441_v11  ;;  %2295 = vpow2.f32 %v1185_v13  ;;  %v1201_v16 = vmul.f32 1.442695, %v1020_v17  ;;  %v1335_v32 = vmul.f32 1.442695, %v1087_v39  ;;  %v4446_v34 = vld [vmem:[#allocation46_spill] sm:$0xff] }
 0x1f3   : > { %v1373_v1 = vadd.f32 %v3293_v40, %v1372_v52  ;;  %4440 = vst [vmem:[#allocation88_spill] sm:$0xff] %v3305_v26  ;;  %v3311_v0 = vpop.eup %2285  ;;  %2297 = vpow2.f32 %v1319_v50  ;;  %v1395_v52 = vadd.f32 %v3305_v26, %v1394_v42  ;;  %v1032_v54 = vsub.f32 %v4446_v34, %v3145_v15  ;;  %v4449_v20 = vld [vmem:[#allocation76_spill] sm:$0xff] }
 0x1f4   : > { %4443 = vst [vmem:[#allocation72_spill] sm:$0xff] %v3311_v0  ;;  %v3315_v53 = vpop.eup %2287  ;;  %v949_v7 = vmax.f32 %v948_v60, %v4445_v23  ;;  %2299 = vpow2.f32 %v1193_v44  ;;  %v1209_v13 = vmul.f32 1.442695, %v1024_v14  ;;  %v4450_v60 = vld [vmem:[#allocation48_spill] sm:$0xff]  ;;  %v1217_v41 = vmul.f32 1.442695, %v1028_v45 }
 0x1f5   : > { %v1374_v37 = vadd.f32 %v3301_v24, %v1373_v1  ;;  %4444 = vst [vmem:[#allocation43_spill] sm:$0xff] %v3315_v53  ;;  %v3322_v17 = vpop.eup %2289  ;;  %2301 = vpow2.f32 %v1327_v4  ;;  %v1396_v50 = vadd.f32 %v3315_v53, %v1395_v52  ;;  %v928_v1 = vrot.slane %v927_v21, 1  ;;  %v4453_v52 = vld [vmem:[#allocation50_spill] sm:$0xff] }
 0x1f6   : > { %4447 = vst [vmem:[#allocation74_spill] sm:$0xff] %v3322_v17  ;;  %v3326_v42 = vpop.eup %2291  ;;  %v950_v2 = vmax.f32 %v949_v7, %v4449_v20  ;;  %v1036_v10 = vsub.f32 %v4450_v60, %v3145_v15  ;;  %2303 = vpow2.f32 %v1201_v16  ;;  %v1040_v8 = vsub.f32 %v4453_v52, %v3145_v15  ;;  %v4456_v60 = vld [vmem:[#allocation53_spill] sm:$0xff]  ;;  %v4461_v53 = vld [vmem:[#allocation6_spill] sm:$0xff] }
 0x1f7   : > { %v1375_v39 = vadd.f32 %v3311_v0, %v1374_v37  ;;  %4448 = vst [vmem:[#allocation46_spill] sm:$0xff] %v3326_v42  ;;  %v3331_v34 = vpop.eup %2293  ;;  %2305 = vpow2.f32 %v1335_v32  ;;  %v1397_v4 = vadd.f32 %v3326_v42, %v1396_v50  ;;  %v1225_v7 = vmul.f32 1.442695, %v1032_v54 }
 0x1f8   : > { %4451 = vst [vmem:[#allocation76_spill] sm:$0xff] %v3331_v34  ;;  %v3335_v44 = vpop.eup %2295  ;;  %v951_v37 = vmax.f32 %v950_v2, %v3033_v46  ;;  %2307 = vpow2.f32 %v1209_v13  ;;  %v3344_v32 = vmax.f32 %v927_v21, %v928_v1  ;;  %v1044_v2 = vsub.f32 %v4456_v60, %v3145_v15  ;;  %v4458_v13 = vld [vmem:[#allocation56_spill] sm:$0xff] }
 0x1f9   : > { %v1376_v14 = vadd.f32 %v3322_v17, %v1375_v39  ;;  %4452 = vst [vmem:[#allocation48_spill] sm:$0xff] %v3335_v44  ;;  %v3340_v40 = vpop.eup %2297  ;;  %v1398_v16 = vadd.f32 %v3335_v44, %v1397_v4  ;;  %2309 = vpow2.f32 %v1217_v41  ;;  %v1233_v57 = vmul.f32 1.442695, %v1036_v10  ;;  %v3371_v0 = vpop.f32.mrf.mxu3  ;;  %v4468_v17 = vld [vmem:[#allocation64_spill] sm:$0xff] }
 0x1fa   : > { %4454 = vst [vmem:[#allocation50_spill] sm:$0xff] %v3340_v40  ;;  %v3346_v39 = vpop.eup %2299  ;;  %v952_v50 = vmax.f32 %v951_v37, %v3058_v25  ;;  %v1052_v37 = vsub.f32 %v2894_v22, %v3145_v15  ;;  %2311 = vpow2.f32 %v1225_v7  ;;  %v1241_v60 = vmul.f32 1.442695, %v1040_v8  ;;  %v4463_v22 = vld [vmem:[#allocation8_spill] sm:$0xff] }
 0x1fb   : > { %v1377_v45 = vadd.f32 %v3331_v34, %v1376_v14  ;;  %4455 = vst [vmem:[#allocation89_spill] sm:$0xff] %v3346_v39  ;;  %v3351_v52 = vpop.eup %2301  ;;  %v1048_v14 = vsub.f32 %v4458_v13, %v3145_v15  ;;  %v1399_v4 = vadd.f32 %v3346_v39, %v1398_v16  ;;  %v969_v13 = vsub.f32 %v4461_v53, %v3344_v32 }
 0x1fc   : > { %4457 = vst [vmem:[#allocation53_spill] sm:$0xff] %v3351_v52  ;;  %v3357_v21 = vpop.eup %2303  ;;  %v953_v1 = vmax.f32 %v952_v50, %v3082_v63  ;;  %2313 = vpow2.f32 %v1233_v57  ;;  %v1249_v50 = vmul.f32 1.442695, %v1044_v2  ;;  %v973_v8 = vsub.f32 %v4463_v22, %v3344_v32  ;;  %v4465_v57 = vld [vmem:[#allocation61_spill] sm:$0xff] }
 0x1fd   : > { %v1378_v54 = vadd.f32 %v3340_v40, %v1377_v45  ;;  %4459 = vst [vmem:[#allocation56_spill] sm:$0xff] %v3357_v21  ;;  %v3362_v41 = vpop.eup %2305  ;;  %v1400_v45 = vadd.f32 %v3357_v21, %v1399_v4  ;;  %2315 = vpow2.f32 %v1241_v60  ;;  %v1265_v44 = vmul.f32 1.442695, %v1052_v37 }
 0x1fe   : > { %4460 = vst [vmem:[#allocation90_spill] sm:$0xff] %v3362_v41  ;;  %v3368_v26 = vpop.eup %2307  ;;  %v954_v16 = vmax.f32 %v953_v1, %v3123_v51  ;;  %v1056_v1 = vsub.f32 %v2900_v18, %v3145_v15  ;;  %v1060_v2 = vsub.f32 %v4465_v57, %v3145_v15  ;;  %v1099_v42 = vmul.f32 1.442695, %v969_v13  ;;  %v4470_v57 = vld [vmem:[#allocation13_spill] sm:$0xff] }
 0x1ff   : > { %v1379_v10 = vadd.f32 %v3351_v52, %v1378_v54  ;;  %4462 = vst [vmem:[#allocation6_spill] sm:$0xff] %v3368_v26  ;;  %v1257_v54 = vmul.f32 1.442695, %v1048_v14  ;;  %v1401_v4 = vadd.f32 %v3368_v26, %v1400_v45  ;;  %v3379_v24 = vpop.eup %2309  ;;  %2317 = vpow2.f32 %v1249_v50  ;;  %v4467_v45 = vld [vmem:[#allocation10_spill] sm:$0xff]  ;;  %v4471_v50 = vld [vmem:[#allocation67_spill] sm:$0xff] }
 0x200   : > { %4464 = vst [vmem:[#allocation8_spill] sm:$0xff] %v3379_v24  ;;  %v955_v53 = vmax.f32 %v954_v16, %v3167_v28  ;;  %v977_v34 = vsub.f32 %v4467_v45, %v3344_v32  ;;  %v1107_v16 = vmul.f32 1.442695, %v973_v8  ;;  %v1064_v18 = vsub.f32 %v4468_v17, %v3145_v15 }
 0x201   : > { %v3376_v7 = vadd.f32 %v3362_v41, %v1379_v10  ;;  %v1402_v22 = vadd.f32 %v3379_v24, %v1401_v4  ;;  %v3387_v10 = vpop.eup %2311  ;;  %2319 = vpow2.f32 %v1257_v54  ;;  %v1273_v13 = vmul.f32 1.442695, %v1056_v1  ;;  %v4474_v1 = vld [vmem:[#allocation70_spill] sm:$0xff] }
 0x202   : > { %4466 = vst [vmem:[#allocation61_spill] sm:$0xff] %v3387_v10  ;;  %v956_v14 = vmax.f32 %v955_v53, %v3217_v48  ;;  %v3395_v60 = vpop.eup %2313  ;;  %2321 = vpow2.f32 %v1265_v44  ;;  %v981_v53 = vsub.f32 %v4470_v57, %v3344_v32  ;;  %v1068_v21 = vsub.f32 %v4471_v50, %v3145_v15 }
 0x203   : > { %v1403_v37 = vadd.f32 %v3387_v10, %v1402_v22  ;;  %4469 = vst [vmem:[#allocation10_spill] sm:$0xff] %v3395_v60  ;;  %v1281_v45 = vmul.f32 1.442695, %v1060_v2  ;;  %2323 = vpow2.f32 %v1099_v42  ;;  %v3403_v17 = vpop.eup %2315  ;;  %v4473_v22 = vld [vmem:[#allocation17_spill] sm:$0xff]  ;;  %v1115_v44 = vmul.f32 1.442695, %v977_v34 }
 0x204   : > { %v957_v4 = vmax.f32 %v956_v14, %v3269_v56  ;;  %4472 = vst [vmem:[#allocation64_spill] sm:$0xff] %v3403_v17  ;;  %v985_v10 = vsub.f32 %v4473_v22, %v3344_v32  ;;  %2325 = vpow2.f32 %v1107_v16  ;;  %v1072_v14 = vsub.f32 %v4474_v1, %v3145_v15  ;;  %v4476_v42 = vld [vmem:[#allocation20_spill] sm:$0xff]  ;;  %v4478_v34 = vld [vmem:[#allocation71_spill] sm:$0xff] }
 0x205   : > { %v1404_v8 = vadd.f32 %v3395_v60, %v1403_v37  ;;  %v1289_v57 = vmul.f32 1.442695, %v1064_v18  ;;  %v3411_v50 = vpop.eup %2317  ;;  %2327 = vpow2.f32 %v1273_v13  ;;  %v989_v37 = vsub.f32 %v4476_v42, %v3344_v32  ;;  %v3416_v60 = vpop.f32.mrf.mxu3 }
 0x206   : > { %v958_v54 = vmax.f32 %v957_v4, %v3318_v55  ;;  %4475 = vst [vmem:[#allocation13_spill] sm:$0xff] %v3411_v50  ;;  %v1123_v4 = vmul.f32 1.442695, %v981_v53  ;;  %v1076_v16 = vsub.f32 %v4478_v34, %v3145_v15  ;;  %2329 = vpow2.f32 %v1281_v45 }
 0x207   : > { %v1405_v39 = vadd.f32 %v3403_v17, %v1404_v8  ;;  %v3418_v22 = vpop.eup %2319  ;;  %v1297_v18 = vmul.f32 1.442695, %v1068_v21  ;;  %v4481_v17 = vld [vmem:[#allocation23_spill] sm:$0xff]  ;;  %2331 = vpow2.f32 %v1115_v44  ;;  %v1131_v53 = vmul.f32 1.442695, %v985_v10  ;;  %v4486_v10 = vld [vmem:[#allocation78_spill] sm:$0xff] }
 0x208   : > { %v959_v2 = vmax.f32 %v958_v54, %v3371_v0  ;;  %4477 = vst [vmem:[#allocation67_spill] sm:$0xff] %v3418_v22  ;;  %v3423_v1 = vpop.eup %2321  ;;  %v4480_v54 = vld [vmem:[#allocation73_spill] sm:$0xff]  ;;  %v993_v42 = vsub.f32 %v4481_v17, %v3344_v32  ;;  %2333 = vpow2.f32 %v1289_v57  ;;  %v1305_v40 = vmul.f32 1.442695, %v1072_v14 }
 0x209   : > { %v1406_v8 = vadd.f32 %v3411_v50, %v1405_v39  ;;  %4479 = vst [vmem:[#allocation17_spill] sm:$0xff] %v3423_v1  ;;  %v1080_v13 = vsub.f32 %v4480_v54, %v3145_v15  ;;  %v3429_v52 = vpop.eup %2323  ;;  %v4484_v39 = vld [vmem:[#allocation75_spill] sm:$0xff]  ;;  %v4485_v54 = vld [vmem:[#allocation25_spill] sm:$0xff]  ;;  %2335 = vpow2.f32 %v1123_v4  ;;  %v1139_v17 = vmul.f32 1.442695, %v989_v37 }
 0x20a   : > { %4482 = vst [vmem:[#allocation70_spill] sm:$0xff] %v3429_v52  ;;  %v960_v21 = vmax.f32 %v959_v2, %v3416_v60  ;;  %v3433_v45 = vpop.eup %2325  ;;  %v1084_v50 = vsub.f32 %v4484_v39, %v3145_v15  ;;  %v997_v24 = vsub.f32 %v4485_v54, %v3344_v32  ;;  %v1088_v44 = vsub.f32 %v4486_v10, %v3145_v15  ;;  %v4491_v54 = vld [vmem:[#allocation33_spill] sm:$0xff] }
 0x20b   : > { %v1407_v34 = vadd.f32 %v3418_v22, %v1406_v8  ;;  %4483 = vst [vmem:[#allocation20_spill] sm:$0xff] %v3433_v45  ;;  %2337 = vpow2.f32 %v1297_v18  ;;  %v1313_v57 = vmul.f32 1.442695, %v1076_v16  ;;  %v3442_v8 = vpop.eup %2327  ;;  %v1321_v2 = vmul.f32 1.442695, %v1080_v13  ;;  %v4488_v22 = vld [vmem:[#allocation29_spill] sm:$0xff] }
 0x20c   : > { %4487 = vst [vmem:[#allocation71_spill] sm:$0xff] %v3442_v8  ;;  %v1001_v26 = vsub.f32 %v4488_v22, %v3344_v32  ;;  %2339 = vpow2.f32 %v1131_v53  ;;  %v1147_v39 = vmul.f32 1.442695, %v993_v42  ;;  %v3446_v41 = vpop.eup %2329  ;;  %v1425_v4 = vadd.f32 %v3433_v45, %v3429_v52  ;;  %v4493_v45 = vld [vmem:[#allocation36_spill] sm:$0xff] }
 0x20d   : > { %v1408_v14 = vadd.f32 %v3423_v1, %v1407_v34  ;;  %4489 = vst [vmem:[#allocation73_spill] sm:$0xff] %v3446_v41  ;;  %2341 = vpow2.f32 %v1305_v40  ;;  %v961_v18 = vrot.slane %v960_v21, 4  ;;  %v3451_v16 = vpop.eup %2331  ;;  %v1329_v34 = vmul.f32 1.442695, %v1084_v50 }
 0x20e   : > { %4490 = vst [vmem:[#allocation23_spill] sm:$0xff] %v3451_v16  ;;  %v1005_v13 = vsub.f32 %v4491_v54, %v3344_v32  ;;  %2343 = vpow2.f32 %v1139_v17  ;;  %v1155_v10 = vmul.f32 1.442695, %v997_v24  ;;  %v3455_v22 = vpop.eup %2333  ;;  %v1426_v40 = vadd.f32 %v3451_v16, %v1425_v4 }
 0x20f   : > { %v1409_v37 = vadd.f32 %v3442_v8, %v1408_v14  ;;  %2345 = vpow2.f32 %v1313_v57  ;;  %v962_v53 = vmax.f32 %v960_v21, %v961_v18  ;;  %v3459_v14 = vpop.eup %2335  ;;  %v1009_v52 = vsub.f32 %v4493_v45, %v3344_v32 }
 0x210   : > { %4492 = vst [vmem:[#allocation75_spill] sm:$0xff] %v3459_v14  ;;  %2347 = vpow2.f32 %v1147_v39  ;;  %v1163_v50 = vmul.f32 1.442695, %v1001_v26  ;;  %v1337_v17 = vmul.f32 1.442695, %v1088_v44  ;;  %v1427_v57 = vadd.f32 %v3459_v14, %v1426_v40 }
 0x211   : > { %v1410_v42 = vadd.f32 %v3446_v41, %v1409_v37  ;;  %v3463_v1 = vpop.eup %2337  ;;  %2349 = vpow2.f32 %v1321_v2  ;;  %v4496_v37 = vld [vmem:[#allocation39_spill] sm:$0xff]  ;;  %v1171_v4 = vmul.f32 1.442695, %v1005_v13  ;;  %v963_v18 = vrot.slane %v962_v53, 2  ;;  %v4498_v2 = vld [vmem:[#allocation42_spill] sm:$0xff] }
 0x212   : > { %4494 = vst [vmem:[#allocation25_spill] sm:$0xff] %v3463_v1  ;;  %v3467_v54 = vpop.eup %2339  ;;  %v1013_v21 = vsub.f32 %v4496_v37, %v3344_v32  ;;  %2351 = vpow2.f32 %v1155_v10  ;;  %v1017_v39 = vsub.f32 %v4498_v2, %v3344_v32 }
 0x213   : > { %v1411_v24 = vadd.f32 %v3455_v22, %v1410_v42  ;;  %4495 = vst [vmem:[#allocation78_spill] sm:$0xff] %v3467_v54  ;;  %v3471_v16 = vpop.eup %2341  ;;  %2353 = vpow2.f32 %v1329_v34  ;;  %v1428_v45 = vadd.f32 %v3467_v54, %v1427_v57  ;;  %v1179_v42 = vmul.f32 1.442695, %v1009_v52  ;;  %v4500_v34 = vld [vmem:[#allocation45_spill] sm:$0xff] }
 0x214   : > { %v3475_v44 = vpop.eup %2343  ;;  %2355 = vpow2.f32 %v1163_v50  ;;  %v1187_v57 = vmul.f32 1.442695, %v1013_v21  ;;  %v964_v14 = vmax.f32 %v962_v53, %v963_v18 }
 0x215   : > { %v1412_v26 = vadd.f32 %v3463_v1, %v1411_v24  ;;  %4497 = vst [vmem:[#allocation29_spill] sm:$0xff] %v3475_v44  ;;  %v3479_v40 = vpop.eup %2345  ;;  %2357 = vpow2.f32 %v1337_v17  ;;  %v1429_v10 = vadd.f32 %v3475_v44, %v1428_v45  ;;  %v1021_v24 = vsub.f32 %v4500_v34, %v3344_v32 }
 0x216   : > { %v3483_v37 = vpop.eup %2347  ;;  %2359 = vpow2.f32 %v1171_v4  ;;  %v1025_v17 = vsub.f32 %v4370_v6, %v3344_v32  ;;  %v4503_v4 = vld [vmem:[#allocation52_spill] sm:$0xff] }
 0x217   : > { %v1413_v13 = vadd.f32 %v3471_v16, %v1412_v26  ;;  %4499 = vst [vmem:[#allocation33_spill] sm:$0xff] %v3483_v37  ;;  %v3487_v54 = vpop.eup %2349  ;;  %v1430_v52 = vadd.f32 %v3483_v37, %v1429_v10  ;;  %2361 = vpow2.f32 %v1179_v42  ;;  %v1195_v26 = vmul.f32 1.442695, %v1017_v39 }
 0x218   : > { %v3491_v2 = vpop.eup %2351  ;;  %v1029_v18 = vsub.f32 %v4503_v4, %v3344_v32  ;;  %2363 = vpow2.f32 %v1187_v57  ;;  %v965_v10 = vrot.slane %v964_v14, 1  ;;  %v4507_v4 = vld [vmem:[#allocation58_spill] sm:$0xff] }
 0x219   : > { %v1414_v50 = vadd.f32 %v3479_v40, %v1413_v13  ;;  %4501 = vst [vmem:[#allocation36_spill] sm:$0xff] %v3491_v2  ;;  %v3495_v45 = vpop.eup %2353  ;;  %v1431_v21 = vadd.f32 %v3491_v2, %v1430_v52  ;;  %v1203_v13 = vmul.f32 1.442695, %v1021_v24  ;;  %2365 = vpow2.f32 %v1195_v26 }
 0x21a   : > { %v3499_v53 = vpop.eup %2355  ;;  %v1211_v52 = vmul.f32 1.442695, %v1025_v17  ;;  %v1037_v41 = vsub.f32 %v4507_v4, %v3344_v32  ;;  %v4514_v4 = vld [vmem:[#allocation19_spill] sm:$0xff] }
 0x21b   : > { %v1415_v34 = vadd.f32 %v3487_v54, %v1414_v50  ;;  %4502 = vst [vmem:[#allocation39_spill] sm:$0xff] %v3499_v53  ;;  %v3503_v44 = vpop.eup %2357  ;;  %v1432_v39 = vadd.f32 %v3499_v53, %v1431_v21  ;;  %v4505_v50 = vld [vmem:[#allocation55_spill] sm:$0xff]  ;;  %2367 = vpow2.f32 %v1203_v13  ;;  %v3519_v21 = vmax.f32 %v964_v14, %v965_v10  ;;  %v4508_v53 = vld [vmem:[#allocation77_spill] sm:$0xff] }
 0x21c   : > { %v3507_v42 = vpop.eup %2359  ;;  %v1033_v37 = vsub.f32 %v4505_v50, %v3344_v32  ;;  %v1091_v8 = vsub.f32 %v4508_v53, %v3044_v58  ;;  %2369 = vpow2.f32 %v1211_v52  ;;  %v1235_v14 = vmul.f32 1.442695, %v1037_v41  ;;  %v4513_v58 = vld [vmem:[#allocation16_spill] sm:$0xff] }
 0x21d   : > { %v1416_v6 = vadd.f32 %v3495_v45, %v1415_v34  ;;  %4504 = vst [vmem:[#allocation42_spill] sm:$0xff] %v3507_v42  ;;  %v1433_v57 = vadd.f32 %v3507_v42, %v1432_v39  ;;  %v3515_v24 = vpop.eup %2361  ;;  %v1219_v34 = vmul.f32 1.442695, %v1029_v18  ;;  %v4511_v42 = vld [vmem:[#allocation63_spill] sm:$0xff]  ;;  %v970_v53 = vsub.f32 %v4513_v58, %v3519_v21 }
 0x21e   : > { %4506 = vst [vmem:[#allocation45_spill] sm:$0xff] %v3515_v24  ;;  %v3524_v17 = vpop.eup %2363  ;;  %v1227_v39 = vmul.f32 1.442695, %v1033_v37  ;;  %v1045_v1 = vsub.f32 %v4511_v42, %v3344_v32  ;;  %v1343_v10 = vmul.f32 1.442695, %v1091_v8  ;;  %v4515_v37 = vld [vmem:[#allocation66_spill] sm:$0xff]  ;;  %v1053_v8 = vsub.f32 %v4391_v33, %v3344_v32 }
 0x21f   : > { %v3512_v2 = vadd.f32 %v3503_v44, %v1416_v6  ;;  %v1434_v26 = vadd.f32 %v3515_v24, %v1433_v57  ;;  %4509 = vst [vmem:[#allocation52_spill] sm:$0xff] %v3524_v17  ;;  %v4510_v6 = vld [vmem:[#allocation60_spill] sm:$0xff]  ;;  %v3531_v18 = vpop.eup %2365  ;;  %2371 = vpow2.f32 %v1219_v34  ;;  %v1049_v42 = vsub.f32 %v4515_v37, %v3344_v32  ;;  %v4517_v37 = vld [vmem:[#allocation22_spill] sm:$0xff] }
 0x220   : > { %v1041_v50 = vsub.f32 %v4510_v6, %v3344_v32  ;;  %4512 = vst [vmem:[#allocation55_spill] sm:$0xff] %v3531_v18  ;;  %v974_v6 = vsub.f32 %v4514_v4, %v3519_v21  ;;  %2373 = vpow2.f32 %v1227_v39  ;;  %v1251_v41 = vmul.f32 1.442695, %v1045_v1 }
 0x221   : > { %v1435_v13 = vadd.f32 %v3524_v17, %v1434_v26  ;;  %v3538_v52 = vpop.eup %2367  ;;  %v4516_v17 = vld [vmem:[#allocation79_spill] sm:$0xff]  ;;  %2375 = vpow2.f32 %v1235_v14  ;;  %v978_v39 = vsub.f32 %v4517_v37, %v3519_v21  ;;  %v1259_v1 = vmul.f32 1.442695, %v1049_v42  ;;  %v4518_v14 = vld [vmem:[#allocation24_spill] sm:$0xff] }
 0x222   : > { %v1243_v26 = vmul.f32 1.442695, %v1041_v50  ;;  %v1092_v34 = vsub.f32 %v4516_v17, %v3145_v15  ;;  %v3545_v58 = vpop.eup %2369  ;;  %2377 = vpow2.f32 %v1343_v10  ;;  %v1109_v50 = vmul.f32 1.442695, %v974_v6 }
 0x223   : > { %v1436_v57 = vadd.f32 %v3531_v18, %v1435_v13  ;;  %v1101_v13 = vmul.f32 1.442695, %v970_v53  ;;  %v1057_v15 = vsub.f32 %v2958_v62, %v3344_v32  ;;  %v982_v53 = vsub.f32 %v4518_v14, %v3519_v21  ;;  %v4520_v62 = vld [vmem:[#allocation28_spill] sm:$0xff] }
 0x224   : > { %2379 = vpow2.f32 %v1243_v26  ;;  %v1345_v17 = vmul.f32 1.442695, %v1092_v34  ;;  %v986_v26 = vsub.f32 %v4520_v62, %v3519_v21  ;;  %v1117_v42 = vmul.f32 1.442695, %v978_v39 }
 0x225   : > { %v1437_v24 = vadd.f32 %v3538_v52, %v1436_v57  ;;  %v3552_v18 = vpop.eup %2371  ;;  %2381 = vpow2.f32 %v1251_v41  ;;  %v1267_v57 = vmul.f32 1.442695, %v1053_v8  ;;  %v1065_v41 = vsub.f32 %v2996_v27, %v3344_v32  ;;  %v4522_v8 = vld [vmem:[#allocation32_spill] sm:$0xff] }
 0x226   : > { %v3559_v10 = vpop.eup %2373  ;;  %2383 = vpow2.f32 %v1101_v13  ;;  %v990_v13 = vsub.f32 %v4522_v8, %v3519_v21  ;;  %v1069_v39 = vsub.f32 %v3016_v36, %v3344_v32  ;;  %v1133_v62 = vmul.f32 1.442695, %v986_v26 }
 0x227   : > { %v1438_v4 = vadd.f32 %v3545_v58, %v1437_v24  ;;  %4519 = vst [vmem:[#allocation58_spill] sm:$0xff] %v3559_v10  ;;  %v1061_v24 = vsub.f32 %v2976_v49, %v3344_v32  ;;  %2385 = vpow2.f32 %v1109_v50  ;;  %v3566_v34 = vpop.eup %2375  ;;  %v1073_v50 = vsub.f32 %v3035_v43, %v3344_v32 }
 0x228   : > { %4521 = vst [vmem:[#allocation77_spill] sm:$0xff] %v3566_v34  ;;  %2387 = vpow2.f32 %v1259_v1  ;;  %v3570_v37 = vpop.eup %2377  ;;  %v1077_v8 = vsub.f32 %v3060_v31, %v3344_v32  ;;  %v1081_v36 = vsub.f32 %v3084_v9, %v3344_v32  ;;  %v1291_v43 = vmul.f32 1.442695, %v1065_v41 }
 0x229   : > { %v1439_v33 = vadd.f32 %v3552_v18, %v1438_v4  ;;  %v1275_v4 = vmul.f32 1.442695, %v1057_v15  ;;  %2389 = vpow2.f32 %v1345_v17  ;;  %v1283_v27 = vmul.f32 1.442695, %v1061_v24  ;;  %v4525_v17 = vld [vmem:[#allocation35_spill] sm:$0xff] }
 0x22a   : > { %v3575_v14 = vpop.eup %2379  ;;  %2391 = vpow2.f32 %v1267_v57  ;;  %v1089_v31 = vsub.f32 %v3170_v61, %v3344_v32  ;;  %v1299_v9 = vmul.f32 1.442695, %v1069_v39 }
 0x22b   : > { %v1440_v6 = vadd.f32 %v3559_v10, %v1439_v33  ;;  %v1125_v33 = vmul.f32 1.442695, %v982_v53  ;;  %4523 = vst [vmem:[#allocation60_spill] sm:$0xff] %v3575_v14  ;;  %v3581_v15 = vpop.eup %2381  ;;  %2393 = vpow2.f32 %v1117_v42  ;;  %v1141_v42 = vmul.f32 1.442695, %v990_v13 }
 0x22c   : > { %4524 = vst [vmem:[#allocation63_spill] sm:$0xff] %v3581_v15  ;;  %v3586_v53 = vpop.eup %2383  ;;  %2395 = vpow2.f32 %v1275_v4 }
 0x22d   : > { %v1441_v49 = vadd.f32 %v3566_v34, %v1440_v6  ;;  %v994_v6 = vsub.f32 %v4525_v17, %v3519_v21  ;;  %4526 = vst [vmem:[#allocation16_spill] sm:$0xff] %v3586_v53  ;;  %v3592_v24 = vpop.eup %2385  ;;  %2397 = vpow2.f32 %v1125_v33  ;;  %v1085_v17 = vsub.f32 %v3125_v12, %v3344_v32 }
 0x22e   : > { %4527 = vst [vmem:[#allocation19_spill] sm:$0xff] %v3592_v24  ;;  %v3597_v26 = vpop.eup %2387  ;;  %2399 = vpow2.f32 %v1283_v27  ;;  %v1307_v12 = vmul.f32 1.442695, %v1073_v50  ;;  %v1462_v61 = vadd.f32 %v3592_v24, %v3586_v53 }
 0x22f   : > { %v1442_v1 = vadd.f32 %v3575_v14, %v1441_v49  ;;  %v4528_v49 = vld [vmem:[#allocation38_spill] sm:$0xff]  ;;  %v3603_v41 = vpop.eup %2389  ;;  %2401 = vpow2.f32 %v1133_v62  ;;  %v1149_v33 = vmul.f32 1.442695, %v994_v6  ;;  %v1331_v53 = vmul.f32 1.442695, %v1085_v17 }
 0x230   : > { %v998_v34 = vsub.f32 %v4528_v49, %v3519_v21  ;;  %v3608_v13 = vpop.eup %2391  ;;  %v1093_v49 = vsub.f32 %v3223_v59, %v3344_v32  ;;  %2403 = vpow2.f32 %v1291_v43  ;;  %v1315_v59 = vmul.f32 1.442695, %v1077_v8 }
 0x231   : > { %v1443_v57 = vadd.f32 %v3581_v15, %v1442_v1  ;;  %v4529_v1 = vld [vmem:[#allocation41_spill] sm:$0xff]  ;;  %v3614_v39 = vpop.eup %2393  ;;  %2405 = vpow2.f32 %v1141_v42 }
 0x232   : > { %v1002_v10 = vsub.f32 %v4529_v1, %v3519_v21  ;;  %4530 = vst [vmem:[#allocation66_spill] sm:$0xff] %v3614_v39  ;;  %v1157_v62 = vmul.f32 1.442695, %v998_v34  ;;  %v3619_v6 = vpop.eup %2395  ;;  %v1381_v1 = vadd.f32 %v3570_v37, %v3376_v7  ;;  %2407 = vpow2.f32 %v1299_v9 }
 0x233   : > { %v1444_v4 = vadd.f32 %v3597_v26, %v1443_v57  ;;  %v1006_v57 = vsub.f32 %v4389_v35, %v3519_v21  ;;  %v1463_v32 = vadd.f32 %v3614_v39, %v1462_v61  ;;  %v3624_v50 = vpop.eup %2397  ;;  %2409 = vpow2.f32 %v1149_v33 }
 0x234   : > { %4531 = vst [vmem:[#allocation79_spill] sm:$0xff] %v3624_v50  ;;  %v1165_v35 = vmul.f32 1.442695, %v1002_v10  ;;  %v3629_v42 = vpop.eup %2399  ;;  %v1418_v34 = vadd.f32 %v3603_v41, %v3512_v2  ;;  %2411 = vpow2.f32 %v1307_v12  ;;  %v1323_v7 = vmul.f32 1.442695, %v1081_v36 }
 0x235   : > { %v1445_v27 = vadd.f32 %v3608_v13, %v1444_v4  ;;  %v1010_v4 = vsub.f32 %v4393_v38, %v3519_v21  ;;  %v1464_v8 = vadd.f32 %v3624_v50, %v1463_v32  ;;  %v3634_v9 = vpop.eup %2401  ;;  %2413 = vpow2.f32 %v1157_v62  ;;  %v4535_v32 = vld [vmem:[#allocation54_spill] sm:$0xff] }
 0x236   : > { %4532 = vst [vmem:[#allocation22_spill] sm:$0xff] %v3634_v9  ;;  %v1173_v38 = vmul.f32 1.442695, %v1006_v57  ;;  %v3639_v33 = vpop.eup %2403  ;;  %v1382_v10 = vrot.slane %v1381_v1, 4  ;;  %2415 = vpow2.f32 %v1315_v59  ;;  %v1018_v50 = vsub.f32 %v4535_v32, %v3519_v21 }
 0x237   : > { %v1446_v43 = vadd.f32 %v3619_v6, %v1445_v27  ;;  %v4533_v27 = vld [vmem:[#allocation51_spill] sm:$0xff]  ;;  %v1465_v2 = vadd.f32 %v3634_v9, %v1464_v8  ;;  %v3642_v12 = vpop.eup %2405  ;;  %2417 = vpow2.f32 %v1165_v35  ;;  %v1419_v62 = vrot.slane %v1418_v34, 4 }
 0x238   : > { %v1014_v24 = vsub.f32 %v4533_v27, %v3519_v21  ;;  %4534 = vst [vmem:[#allocation24_spill] sm:$0xff] %v3642_v12  ;;  %v3647_v39 = vpop.eup %2407  ;;  %2419 = vpow2.f32 %v1323_v7  ;;  %v1339_v57 = vmul.f32 1.442695, %v1089_v31  ;;  %v1022_v8 = vsub.f32 %v4399_v47, %v3519_v21 }
 0x239   : > { %v1447_v61 = vadd.f32 %v3629_v42, %v1446_v43  ;;  %v1181_v43 = vmul.f32 1.442695, %v1010_v4  ;;  %v1466_v27 = vadd.f32 %v3642_v12, %v1465_v2  ;;  %v3650_v59 = vpop.eup %2409  ;;  %2421 = vpow2.f32 %v1173_v38 }
 0x23a   : > { %4536 = vst [vmem:[#allocation28_spill] sm:$0xff] %v3650_v59  ;;  %v3655_v9 = vpop.eup %2411  ;;  %v1383_v35 = vadd.f32 %v1382_v10, %v1381_v1  ;;  %2423 = vpow2.f32 %v1331_v53  ;;  %v1347_v4 = vmul.f32 1.442695, %v1093_v49  ;;  %v1026_v2 = vsub.f32 %v4401_v29, %v3519_v21 }
 0x23b   : > { %v1448_v36 = vadd.f32 %v3639_v33, %v1447_v61  ;;  %v1189_v61 = vmul.f32 1.442695, %v1014_v24  ;;  %v1467_v32 = vadd.f32 %v3650_v59, %v1466_v27  ;;  %v3658_v7 = vpop.eup %2413  ;;  %2425 = vpow2.f32 %v1181_v43 }
 0x23c   : > { %4537 = vst [vmem:[#allocation32_spill] sm:$0xff] %v3658_v7  ;;  %v3663_v12 = vpop.eup %2415  ;;  %v1420_v47 = vadd.f32 %v1419_v62, %v1418_v34  ;;  %2427 = vpow2.f32 %v1339_v57  ;;  %v1030_v49 = vsub.f32 %v4403_v19, %v3519_v21  ;;  %v1205_v38 = vmul.f32 1.442695, %v1022_v8  ;;  %v4538_v62 = vld [vmem:[#allocation65_spill] sm:$0xff] }
 0x23d   : > { %v1449_v17 = vadd.f32 %v3647_v39, %v1448_v36  ;;  %v1197_v36 = vmul.f32 1.442695, %v1018_v50  ;;  %v1468_v24 = vadd.f32 %v3658_v7, %v1467_v32  ;;  %v3666_v1 = vpop.eup %2417  ;;  %2429 = vpow2.f32 %v1189_v61 }
 0x23e   : > { %v3671_v10 = vpop.eup %2419  ;;  %v1384_v29 = vrot.slane %v1383_v35, 2  ;;  %2431 = vpow2.f32 %v1347_v4  ;;  %v1034_v57 = vsub.f32 %v4538_v62, %v3519_v21  ;;  %v1213_v27 = vmul.f32 1.442695, %v1026_v2 }
 0x23f   : > { %v1450_v31 = vadd.f32 %v3655_v9, %v1449_v17  ;;  %v1469_v50 = vadd.f32 %v3666_v1, %v1468_v24  ;;  %v3674_v43 = vpop.eup %2421  ;;  %2433 = vpow2.f32 %v1197_v36  ;;  %v1421_v19 = vrot.slane %v1420_v47, 2 }
 0x240   : > { %v3679_v17 = vpop.eup %2423  ;;  %v1038_v32 = vsub.f32 %v4409_v5, %v3519_v21  ;;  %2435 = vpow2.f32 %v1205_v38  ;;  %v1229_v15 = vmul.f32 1.442695, %v1034_v57  ;;  %v1046_v38 = vsub.f32 %v4441_v11, %v3519_v21 }
 0x241   : > { %v1451_v53 = vadd.f32 %v3663_v12, %v1450_v31  ;;  %v1470_v8 = vadd.f32 %v3674_v43, %v1469_v50  ;;  %v3682_v61 = vpop.eup %2425  ;;  %v1221_v31 = vmul.f32 1.442695, %v1030_v49  ;;  %v1042_v50 = vsub.f32 %v2956_v30, %v3519_v21 }
 0x242   : > { %v3687_v24 = vpop.eup %2427  ;;  %2437 = vpow2.f32 %v1213_v27  ;;  %v1422_v14 = vadd.f32 %v1421_v19, %v1420_v47  ;;  %v1050_v47 = vsub.f32 %v4445_v23, %v3519_v21  ;;  %v1054_v11 = vsub.f32 %v4449_v20, %v3519_v21 }
 0x243   : > { %v1452_v34 = vadd.f32 %v3671_v10, %v1451_v53  ;;  %v1385_v53 = vadd.f32 %v1384_v29, %v1383_v35  ;;  %v1471_v36 = vadd.f32 %v3682_v61, %v1470_v8  ;;  %v3690_v2 = vpop.eup %2429  ;;  %2439 = vpow2.f32 %v1221_v31 }
 0x244   : > { %v1237_v29 = vmul.f32 1.442695, %v1038_v32  ;;  %2441 = vpow2.f32 %v1229_v15  ;;  %v1245_v27 = vmul.f32 1.442695, %v1042_v50  ;;  %v1423_v19 = vrot.slane %v1422_v14, 1 }
 0x245   : > { %v1453_v4 = vadd.f32 %v3679_v17, %v1452_v34  ;;  %v3695_v34 = vpop.eup %2431  ;;  %v1472_v5 = vadd.f32 %v3690_v2, %v1471_v36  ;;  %v1386_v8 = vrot.slane %v1385_v53, 1  ;;  %v1253_v32 = vmul.f32 1.442695, %v1046_v38 }
 0x246   : > { %v3698_v49 = vpop.eup %2433  ;;  %2443 = vpow2.f32 %v1237_v29  ;;  %v1062_v15 = vsub.f32 %v3058_v25, %v3519_v21  ;;  %v1261_v50 = vmul.f32 1.442695, %v1050_v47  ;;  %v1269_v29 = vmul.f32 1.442695, %v1054_v11 }
 0x247   : > { %v1454_v62 = vadd.f32 %v3687_v24, %v1453_v4  ;;  %v1473_v4 = vadd.f32 %v3698_v49, %v1472_v5  ;;  %v3704_v30 = vpop.eup %2435  ;;  %v1387_v31 = vadd.f32 %v1386_v8, %v1385_v53  ;;  %v1058_v5 = vsub.f32 %v3033_v46, %v3519_v21 }
 0x248   : > { %2445 = vpow2.f32 %v1245_v27  ;;  %v1070_v46 = vsub.f32 %v3123_v51, %v3519_v21  ;;  %v1074_v25 = vsub.f32 %v3167_v28, %v3519_v21  ;;  %v1082_v51 = vsub.f32 %v3269_v56, %v3519_v21 }
 0x249   : > { %v1455_v35 = vadd.f32 %v3695_v34, %v1454_v62  ;;  %v1474_v36 = vadd.f32 %v3704_v30, %v1473_v4  ;;  %v3709_v62 = vpop.eup %2437  ;;  %v1424_v4 = vadd.f32 %v1423_v19, %v1422_v14  ;;  %2447 = vpow2.f32 %v1253_v32 }
 0x24a   : > { %v3716_v23 = vpop.eup %2439  ;;  %2449 = vrcp.f32 %v1387_v31  ;;  %v1277_v8 = vmul.f32 1.442695, %v1058_v5  ;;  %v1301_v11 = vmul.f32 1.442695, %v1070_v46  ;;  %v1309_v32 = vmul.f32 1.442695, %v1074_v25 }
 0x24b   : > { %v1456_v57 = vrot.slane %v1455_v35, 4  ;;  %v1475_v59 = vadd.f32 %v3709_v62, %v1474_v36  ;;  %v3723_v38 = vpop.eup %2441  ;;  %2451 = vpow2.f32 %v1261_v50  ;;  %v1086_v36 = vsub.f32 %v3318_v55, %v3519_v21 }
 0x24c   : > { %4539 = vst [vmem:[#allocation35_spill] sm:$0xff] %v3723_v38  ;;  %2453 = vrcp.f32 %v1424_v4 }
 0x24d   : > { %v1457_v7 = vadd.f32 %v1456_v57, %v1455_v35  ;;  %v1066_v35 = vsub.f32 %v3082_v63, %v3519_v21  ;;  %v1476_v20 = vadd.f32 %v3716_v23, %v1475_v59  ;;  %v3730_v57 = vpop.eup %2443  ;;  %v1078_v63 = vsub.f32 %v3217_v48, %v3519_v21 }
 0x24e   : > { %4540 = vst [vmem:[#allocation38_spill] sm:$0xff] %v3730_v57  ;;  %v1285_v59 = vmul.f32 1.442695, %v1062_v15  ;;  %v3737_v19 = vpop.eup %2445  ;;  %2455 = vpow2.f32 %v1269_v29  ;;  %v1090_v15 = vsub.f32 %v3371_v0, %v3519_v21 }
 0x24f   : > { %v1458_v53 = vrot.slane %v1457_v7, 2  ;;  %v1477_v14 = vadd.f32 %v3723_v38, %v1476_v20  ;;  %v1293_v47 = vmul.f32 1.442695, %v1066_v35  ;;  %2457 = vpow2.f32 %v1277_v8  ;;  %v3742_v31 = vpop.eup %2447 }
 0x250   : > { %2459 = vpow2.f32 %v1285_v59  ;;  %v1317_v5 = vmul.f32 1.442695, %v1078_v63  ;;  %v3744_v56 = vpop.eup %2449  ;;  %v1094_v35 = vsub.f32 %v3416_v60, %v3519_v21  ;;  %v1333_v20 = vmul.f32 1.442695, %v1086_v36  ;;  %v4544_v36 = vld [vmem:[#allocation90_spill] sm:$0xff] }
 0x251   : > { %v1478_v27 = vadd.f32 %v3730_v57, %v1477_v14  ;;  %v1459_v28 = vadd.f32 %v1458_v53, %v1457_v7  ;;  %2461 = vpow2.f32 %v1293_v47  ;;  %v1325_v7 = vmul.f32 1.442695, %v1082_v51  ;;  %v3749_v55 = vpop.eup %2451  ;;  %v4543_v47 = vld [vmem:[#allocation68_spill] sm:$0xff]  ;;  %v4549_v57 = vld [vmem:[#allocation50_spill] sm:$0xff] }
 0x252   : > { %2463 = vpow2.f32 %v1301_v11  ;;  %v3753_v53 = vpop.eup %2453  ;;  %v1341_v60 = vmul.f32 1.442695, %v1090_v15  ;;  %v1349_v21 = vmul.f32 1.442695, %v1094_v35  ;;  %v1559_v51 = vmul.f32 %v3744_v56, %v3206_v3  ;;  %v4546_v15 = vld [vmem:[#allocation8_spill] sm:$0xff] }
 0x253   : > { %v1479_v48 = vadd.f32 %v3737_v19, %v1478_v27  ;;  %v1460_v4 = vrot.slane %v1459_v28, 1  ;;  %2465 = vpow2.f32 %v1309_v32  ;;  %v1563_v27 = vmul.f32 %v3744_v56, %v4543_v47 }
 0x254   : > { %v3756_v29 = vpop.eup %2455  ;;  %2467 = vpow2.f32 %v1317_v5  ;;  %v1623_v11 = vmul.f32 %v3744_v56, %v4544_v36  ;;  %v1624_v3 = vmul.f32 %v3753_v53, %v3503_v44  ;;  %v1615_v44 = vmul.f32 %v3744_v56, %v4549_v57 }
 0x255   : > { %v1480_v50 = vadd.f32 %v3742_v31, %v1479_v48  ;;  %v3758_v0 = vpop.eup %2457  ;;  %2469 = vpow2.f32 %v1325_v7  ;;  %v3763_v14 = vadd.f32 %v1460_v4, %v1459_v28  ;;  %v1627_v28 = vmul.f32 %v3744_v56, %v3570_v37  ;;  %v4545_v48 = vld [vmem:[#allocation6_spill] sm:$0xff] }
 0x256   : > { %4541 = vst [vmem:[#allocation41_spill] sm:$0xff] %v3758_v0  ;;  %v3761_v8 = vpop.eup %2459  ;;  %2471 = vpow2.f32 %v1333_v20  ;;  %v1560_v5 = vmul.f32 %v3753_v53, %v4545_v48  ;;  %v1564_v7 = vmul.f32 %v3753_v53, %v4546_v15  ;;  %v1659_v35 = vpack.c.bf16 %v1563_v27, %v1559_v51  ;;  %v4548_v48 = vld [vmem:[#allocation7_spill] sm:$0xff] }
 0x257   : > { %v1481_v46 = vadd.f32 %v3749_v55, %v1480_v50  ;;  %4542 = vst [vmem:[#allocation51_spill] sm:$0xff] %v3761_v8  ;;  %v3765_v63 = vpop.eup %2461  ;;  %v1628_v20 = vmul.f32 %v3753_v53, %v3603_v41  ;;  %v1691_v47 = vpack.c.bf16 %v1627_v28, %v1623_v11  ;;  %v1555_v15 = vmul.f32 %v3744_v56, %v4548_v48  ;;  %v4550_v41 = vld [vmem:[#allocation53_spill] sm:$0xff] }
 0x258   : > { %v3774_v32 = vpop.eup %2463  ;;  %v1660_v36 = vpack.c.bf16 %v1564_v7, %v1560_v5  ;;  %1705 = vmatpush.bf16.msrb.mxu0 %v1659_v35  ;;  %v1619_v27 = vmul.f32 %v3744_v56, %v4550_v41  ;;  %2473 = vpow2.f32 %v1341_v60  ;;  %v4552_v5 = vld [vmem:[#allocation56_spill] sm:$0xff]  ;;  %v1616_v7 = vmul.f32 %v3753_v53, %v3487_v54 }
 0x259   : > { %v1482_v25 = vadd.f32 %v3756_v29, %v1481_v46  ;;  %v3784_v50 = vpop.eup %2465  ;;  %v4547_v46 = vld [vmem:[#allocation5_spill] sm:$0xff]  ;;  %v1692_v51 = vpack.c.bf16 %v1628_v20, %v1624_v3  ;;  %1719 = vmatpush.bf16.msrb.mxu1 %v1691_v47  ;;  %v1556_v57 = vmul.f32 %v3753_v53, %v4552_v5  ;;  %v1620_v35 = vmul.f32 %v3753_v53, %v3495_v45  ;;  %v4553_v20 = vld [vmem:[#allocation59_spill] sm:$0xff]  ;;  %v4554_v47 = vld [vmem:[#allocation62_spill] sm:$0xff] }
 0x25a   : > { %v1551_v37 = vmul.f32 %v3744_v56, %v4547_v46  ;;  %v4551_v46 = vld [vmem:[#allocation89_spill] sm:$0xff]  ;;  %1733 = vmatpush.bf16.msrb.mxu2 %v1660_v36  ;;  %v1543_v48 = vmul.f32 %v3744_v56, %v4553_v20  ;;  %v4555_v36 = vld [vmem:[#allocation74_spill] sm:$0xff]  ;;  %v4556_v41 = vld [vmem:[#allocation76_spill] sm:$0xff]  ;;  %2475 = vpow2.f32 %v1349_v21 }
 0x25b   : > { %v1483_v59 = vadd.f32 %v3758_v0, %v1482_v25  ;;  %v3791_v25 = vpop.eup %2467  ;;  %1747 = vmatpush.bf16.msrb.mxu3 %v1692_v51  ;;  %v1611_v54 = vmul.f32 %v3744_v56, %v4556_v41  ;;  %v4557_v51 = vld [vmem:[#allocation46_spill] sm:$0xff]  ;;  %v4560_v21 = vld [vmem:[#allocation57_spill] sm:$0xff]  ;;  %2477 = vrcp.f32 %v3763_v14  ;;  %v4593_v0 = vld [vmem:[#allocation15_spill] sm:$0xff] }
 0x25c   : > { %v3797_v38 = vpop.eup %2469  ;;  %v1655_v28 = vpack.c.bf16 %v1555_v15, %v1551_v37  ;;  %v1547_v37 = vmul.f32 %v3744_v56, %v4554_v47  ;;  %v1607_v15 = vmul.f32 %v3744_v56, %v4555_v36  ;;  %v1544_v45 = vmul.f32 %v3753_v53, %v4557_v51  ;;  %v4563_v36 = vld [vmem:[#allocation88_spill] sm:$0xff] }
 0x25d   : > { %v1484_v4 = vadd.f32 %v3761_v8, %v1483_v59  ;;  %v1552_v8 = vmul.f32 %v3753_v53, %v4551_v46  ;;  %v3804_v11 = vpop.eup %2471 }
 0x25e   : > { %1706 = vmatpush.bf16.msrb.mxu0 %v1655_v28  ;;  %v1683_v5 = vpack.c.bf16 %v1611_v54, %v1607_v15  ;;  %v1612_v28 = vmul.f32 %v3753_v53, %v3479_v40  ;;  %v3833_v47 = vpop.eup %2473  ;;  %v1536_v15 = vmul.f32 %v3753_v53, %v4563_v36  ;;  %v4564_v54 = vld [vmem:[#allocation43_spill] sm:$0xff] }
 0x25f   : > { %v1485_v59 = vadd.f32 %v3765_v63, %v1484_v4  ;;  %v1687_v4 = vpack.c.bf16 %v1619_v27, %v1615_v44  ;;  %v1656_v60 = vpack.c.bf16 %v1556_v57, %v1552_v8  ;;  %v1688_v44 = vpack.c.bf16 %v1620_v35, %v1616_v7  ;;  %v4558_v27 = vld [vmem:[#allocation48_spill] sm:$0xff]  ;;  %v4559_v7 = vld [vmem:[#allocation47_spill] sm:$0xff] }
 0x260   : > { %v1548_v46 = vmul.f32 %v3753_v53, %v4558_v27  ;;  %v1651_v8 = vpack.c.bf16 %v1547_v37, %v1543_v48  ;;  %v1608_v57 = vmul.f32 %v3753_v53, %v3471_v16  ;;  %v1535_v35 = vmul.f32 %v3744_v56, %v4559_v7  ;;  %v4561_v48 = vld [vmem:[#allocation40_spill] sm:$0xff]  ;;  %v4565_v27 = vld [vmem:[#allocation25_spill] sm:$0xff] }
 0x261   : > { %v1486_v3 = vadd.f32 %v3774_v32, %v1485_v59  ;;  %1720 = vmatpush.bf16.msrb.mxu1 %v1687_v4  ;;  %1734 = vmatpush.bf16.msrb.mxu2 %v1656_v60  ;;  %v1539_v4 = vmul.f32 %v3744_v56, %v4560_v21  ;;  %v1599_v60 = vmul.f32 %v3744_v56, %v4561_v48  ;;  %v4562_v37 = vld [vmem:[#allocation72_spill] sm:$0xff]  ;;  %v3855_v48 = vpop.eup %2475 }
 0x262   : > { %1748 = vmatpush.bf16.msrb.mxu3 %v1688_v44  ;;  %v1603_v16 = vmul.f32 %v3744_v56, %v4562_v37  ;;  %1707 = vmatpush.bf16.msrb.mxu0 %v1651_v8  ;;  %v1684_v40 = vpack.c.bf16 %v1612_v28, %v1608_v57  ;;  %v1600_v44 = vmul.f32 %v3753_v53, %v3455_v22  ;;  %v4567_v57 = vld [vmem:[#allocation30_spill] sm:$0xff] }
 0x263   : > { %v1487_v59 = vadd.f32 %v3784_v50, %v1486_v3  ;;  %v1652_v3 = vpack.c.bf16 %v1548_v46, %v1544_v45  ;;  %v1647_v51 = vpack.c.bf16 %v1539_v4, %v1535_v35  ;;  %v1604_v46 = vmul.f32 %v3753_v53, %v4565_v27  ;;  %v4569_v35 = vld [vmem:[#allocation37_spill] sm:$0xff] }
 0x264   : > { %v1679_v45 = vpack.c.bf16 %v1603_v16, %v1599_v60  ;;  %v1531_v28 = vmul.f32 %v3744_v56, %v4567_v57  ;;  %v1595_v4 = vmul.f32 %v3744_v56, %v4569_v35  ;;  %v4570_v60 = vld [vmem:[#allocation86_spill] sm:$0xff] }
 0x265   : > { %v1488_v20 = vadd.f32 %v3791_v25, %v1487_v59  ;;  %v1540_v59 = vmul.f32 %v3753_v53, %v4564_v54  ;;  %1721 = vmatpush.bf16.msrb.mxu1 %v1683_v5  ;;  %1735 = vmatpush.bf16.msrb.mxu2 %v1652_v3  ;;  %v1680_v22 = vpack.c.bf16 %v1604_v46, %v1600_v44  ;;  %v4568_v5 = vld [vmem:[#allocation85_spill] sm:$0xff]  ;;  %v4574_v46 = vld [vmem:[#allocation26_spill] sm:$0xff] }
 0x266   : > { %1749 = vmatpush.bf16.msrb.mxu3 %v1684_v40  ;;  %v1591_v3 = vmul.f32 %v3744_v56, %v4568_v5  ;;  %v1528_v37 = vmul.f32 %v3753_v53, %v4570_v60  ;;  %1708 = vmatpush.bf16.msrb.mxu0 %v1647_v51  ;;  %v4572_v40 = vld [vmem:[#allocation71_spill] sm:$0xff]  ;;  %v4573_v44 = vld [vmem:[#allocation73_spill] sm:$0xff] }
 0x267   : > { %v1489_v41 = vadd.f32 %v3797_v38, %v1488_v20  ;;  %v1648_v21 = vpack.c.bf16 %v1540_v59, %v1536_v15  ;;  %v4566_v20 = vld [vmem:[#allocation69_spill] sm:$0xff]  ;;  %v4571_v15 = vld [vmem:[#allocation87_spill] sm:$0xff]  ;;  %v1592_v54 = vmul.f32 %v3753_v53, %v4572_v40  ;;  %v1596_v27 = vmul.f32 %v3753_v53, %v4573_v44 }
 0x268   : > { %v1527_v8 = vmul.f32 %v3744_v56, %v4566_v20  ;;  %v1675_v59 = vpack.c.bf16 %v1595_v4, %v1591_v3  ;;  %v1519_v20 = vmul.f32 %v3744_v56, %v4574_v46  ;;  %v4578_v3 = vld [vmem:[#allocation83_spill] sm:$0xff]  ;;  %v4579_v4 = vld [vmem:[#allocation84_spill] sm:$0xff] }
 0x269   : > { %v1490_v7 = vadd.f32 %v3804_v11, %v1489_v41  ;;  %v1532_v41 = vmul.f32 %v3753_v53, %v4571_v15  ;;  %1722 = vmatpush.bf16.msrb.mxu1 %v1679_v45  ;;  %1736 = vmatpush.bf16.msrb.mxu2 %v1648_v21  ;;  %v1676_v14 = vpack.c.bf16 %v1596_v27, %v1592_v54  ;;  %v4577_v45 = vld [vmem:[#allocation34_spill] sm:$0xff]  ;;  %v4582_v27 = vld [vmem:[#allocation11_spill] sm:$0xff] }
 0x26a   : > { %v1643_v36 = vpack.c.bf16 %v1531_v28, %v1527_v8  ;;  %1750 = vmatpush.bf16.msrb.mxu3 %v1680_v22  ;;  %v4575_v8 = vld [vmem:[#allocation44_spill] sm:$0xff]  ;;  %v4576_v28 = vld [vmem:[#allocation31_spill] sm:$0xff]  ;;  %v1587_v21 = vmul.f32 %v3744_v56, %v4577_v45  ;;  %v1520_v35 = vmul.f32 %v3753_v53, %v4578_v3  ;;  %v1524_v60 = vmul.f32 %v3753_v53, %v4579_v4  ;;  %v4583_v45 = vld [vmem:[#allocation14_spill] sm:$0xff]  ;;  %v3894_v3 = vpop.eup %2477 }
 0x26b   : > { %v1491_v16 = vadd.f32 %v3833_v47, %v1490_v7  ;;  %v1644_v7 = vpack.c.bf16 %v1532_v41, %v1528_v37  ;;  %v1523_v57 = vmul.f32 %v3744_v56, %v4575_v8  ;;  %v1583_v5 = vmul.f32 %v3744_v56, %v4576_v28  ;;  %v4580_v37 = vld [vmem:[#allocation67_spill] sm:$0xff]  ;;  %v4581_v41 = vld [vmem:[#allocation17_spill] sm:$0xff] }
 0x26c   : > { %1709 = vmatpush.bf16.msrb.mxu0 %v1643_v36  ;;  %v1588_v40 = vmul.f32 %v3753_v53, %v4581_v41  ;;  %v1640_v44 = vpack.c.bf16 %v1524_v60, %v1520_v35  ;;  %v1511_v46 = vmul.f32 %v3744_v56, %v4582_v27  ;;  %v1515_v36 = vmul.f32 %v3744_v56, %v4583_v45  ;;  %v4585_v4 = vld [vmem:[#allocation27_spill] sm:$0xff] }
 0x26d   : > { %v1492_v51 = vadd.f32 %v3855_v48, %v1491_v16  ;;  %v1639_v22 = vpack.c.bf16 %v1523_v57, %v1519_v20  ;;  %v1584_v16 = vmul.f32 %v3753_v53, %v4580_v37  ;;  %1723 = vmatpush.bf16.msrb.mxu1 %v1675_v59  ;;  %1737 = vmatpush.bf16.msrb.mxu2 %v1644_v7  ;;  %v4584_v20 = vld [vmem:[#allocation80_spill] sm:$0xff]  ;;  %v4586_v7 = vld [vmem:[#allocation81_spill] sm:$0xff] }
 0x26e   : > { %v1671_v54 = vpack.c.bf16 %v1587_v21, %v1583_v5  ;;  %1751 = vmatpush.bf16.msrb.mxu3 %v1676_v14  ;;  %v1575_v57 = vmul.f32 %v3744_v56, %v4584_v20  ;;  %v1579_v59 = vmul.f32 %v3744_v56, %v4585_v4  ;;  %v1512_v5 = vmul.f32 %v3753_v53, %v4586_v7  ;;  %v4587_v21 = vld [vmem:[#allocation82_spill] sm:$0xff]  ;;  %v4591_v7 = vld [vmem:[#allocation49_spill] sm:$0xff] }
 0x26f   : > { %v1493_v15 = vrot.slane %v1492_v51, 4  ;;  %v1672_v28 = vpack.c.bf16 %v1588_v40, %v1584_v16  ;;  %v1516_v35 = vmul.f32 %v3753_v53, %v4587_v21  ;;  %v1635_v16 = vpack.c.bf16 %v1515_v36, %v1511_v46  ;;  %v4590_v40 = vld [vmem:[#allocation9_spill] sm:$0xff] }
 0x270   : > { %1710 = vmatpush.bf16.msrb.mxu0 %v1639_v22  ;;  %v1667_v41 = vpack.c.bf16 %v1579_v59, %v1575_v57  ;;  %v1503_v27 = vmul.f32 %v3744_v56, %v4590_v40  ;;  %v1507_v21 = vmul.f32 %v3744_v56, %v4591_v7  ;;  %v4595_v46 = vld [vmem:[#allocation21_spill] sm:$0xff]  ;;  %v4597_v59 = vld [vmem:[#allocation10_spill] sm:$0xff] }
 0x271   : > { %v1494_v8 = vadd.f32 %v1493_v15, %v1492_v51  ;;  %v4588_v51 = vld [vmem:[#allocation64_spill] sm:$0xff]  ;;  %v4589_v15 = vld [vmem:[#allocation13_spill] sm:$0xff]  ;;  %1724 = vmatpush.bf16.msrb.mxu1 %v1671_v54  ;;  %1738 = vmatpush.bf16.msrb.mxu2 %v1640_v44  ;;  %v1636_v20 = vpack.c.bf16 %v1516_v35, %v1512_v5  ;;  %v4594_v54 = vld [vmem:[#allocation18_spill] sm:$0xff]  ;;  %v1508_v36 = vmul.f32 %v3753_v53, %v4595_v46 }
 0x272   : > { %v1576_v14 = vmul.f32 %v3753_v53, %v4588_v51  ;;  %v1580_v37 = vmul.f32 %v3753_v53, %v4589_v15  ;;  %1752 = vmatpush.bf16.msrb.mxu3 %v1672_v28  ;;  %v4592_v51 = vld [vmem:[#allocation12_spill] sm:$0xff]  ;;  %v1571_v15 = vmul.f32 %v3744_v56, %v4593_v0  ;;  %v1504_v44 = vmul.f32 %v3753_v53, %v4594_v54 }
 0x273   : > { %v1495_v60 = vrot.slane %v1494_v8, 2  ;;  %v1567_v22 = vmul.f32 %v3744_v56, %v4592_v51  ;;  %v1572_v5 = vmul.f32 %v3753_v53, %v4597_v59  ;;  %v1561_v35 = vmul.f32 %v3894_v3, %v3545_v58 }
 0x274   : > { %v1668_v4 = vpack.c.bf16 %v1580_v37, %v1576_v14  ;;  %1711 = vmatpush.bf16.msrb.mxu0 %v1635_v16  ;;  %v1565_v56 = vmul.f32 %v3894_v3, %v3552_v18  ;;  %v1625_v0 = vmul.f32 %v3894_v3, %v3687_v24  ;;  %v1629_v37 = vmul.f32 %v3894_v3, %v3695_v34  ;;  %v4598_v16 = vld [vmem:[#allocation55_spill] sm:$0xff] }
 0x275   : > { %v1496_v45 = vadd.f32 %v1495_v60, %v1494_v8  ;;  %v4596_v8 = vld [vmem:[#allocation61_spill] sm:$0xff]  ;;  %1725 = vmatpush.bf16.msrb.mxu1 %v1667_v41  ;;  %1739 = vmatpush.bf16.msrb.mxu2 %v1636_v20  ;;  %v1631_v60 = vpack.c.bf16 %v1507_v21, %v1503_v27  ;;  %v1663_v40 = vpack.c.bf16 %v1571_v15, %v1567_v22 }
 0x276   : > { %v1568_v28 = vmul.f32 %v3753_v53, %v4596_v8  ;;  %1753 = vmatpush.bf16.msrb.mxu3 %v1668_v4  ;;  %v1553_v53 = vmul.f32 %v3894_v3, %v4598_v16  ;;  %v1632_v7 = vpack.c.bf16 %v1508_v36, %v1504_v44  ;;  %v1557_v58 = vmul.f32 %v3894_v3, %v3538_v52  ;;  %v4599_v20 = vld [vmem:[#allocation45_spill] sm:$0xff]  ;;  %v4600_v52 = vld [vmem:[#allocation52_spill] sm:$0xff] }
 0x277   : > { %v1497_v57 = vrot.slane %v1496_v45, 1  ;;  %v1661_v41 = vpack.c.bf16 %v1565_v56, %v1561_v35  ;;  %v1617_v24 = vmul.f32 %v3894_v3, %v3671_v10  ;;  %v1693_v27 = vpack.c.bf16 %v1629_v37, %v1625_v0  ;;  %v4603_v56 = vld [vmem:[#allocation33_spill] sm:$0xff] }
 0x278   : > { %1712 = vmatpush.bf16.msrb.mxu0 %v1631_v60  ;;  %v1664_v18 = vpack.c.bf16 %v1572_v5, %v1568_v28  ;;  %v1621_v34 = vmul.f32 %v3894_v3, %v3679_v17  ;;  %v1545_v4 = vmul.f32 %v3894_v3, %v4599_v20  ;;  %v1549_v21 = vmul.f32 %v3894_v3, %v4600_v52 }
 0x279   : > { %v1498_v14 = vadd.f32 %v1497_v57, %v1496_v45  ;;  %1726 = vmatpush.bf16.msrb.mxu1 %v1663_v40  ;;  %1740 = vmatpush.bf16.msrb.mxu2 %v1632_v7  ;;  %v1657_v45 = vpack.c.bf16 %v1557_v58, %v1553_v53  ;;  %v1609_v15 = vmul.f32 %v3894_v3, %v3655_v9  ;;  %v4605_v7 = vld [vmem:[#allocation78_spill] sm:$0xff] }
 0x27a   : > { %1754 = vmatpush.bf16.msrb.mxu3 %v1664_v18  ;;  %v1689_v51 = vpack.c.bf16 %v1621_v34, %v1617_v24  ;;  %v1653_v10 = vpack.c.bf16 %v1549_v21, %v1545_v4  ;;  %v1613_v17 = vmul.f32 %v3894_v3, %v3663_v12  ;;  %v4601_v12 = vld [vmem:[#allocation39_spill] sm:$0xff]  ;;  %v1605_v35 = vmul.f32 %v3894_v3, %v3647_v39  ;;  %v2129_v21 = vld [vmem:[%s285_s10] sm:$0xf] }
 0x27b   : > { %2479 = vrcp.f32 %v1498_v14  ;;  %v1537_v8 = vmul.f32 %v3894_v3, %v4601_v12  ;;  %v1529_v0 = vmul.f32 %v3894_v3, %v4603_v56  ;;  %v4604_v14 = vld [vmem:[#allocation36_spill] sm:$0xff]  ;;  %v1593_v37 = vmul.f32 %v3894_v3, %v3619_v6  ;;  %v4616_v56 = vld [vmem:[#allocation70_spill] sm:$0xff] }
 0x27c   : > { %1761 = vmatpush.bf16.msra.mxu0 %v1661_v41  ;;  %v1521_v58 = vmul.f32 %v3894_v3, %v4605_v7  ;;  %v4621_v7 = vld [vmem:[#allocation66_spill] sm:$0xff] }
 0x27d   : > { %1775 = vmatpush.bf16.msra.mxu1 %v1693_v27 }
 0x280   : > { %1762 = vmatpush.bf16.msra.mxu0 %v1657_v45 }
 0x281   : > { %v3942_v22 = vpop.eup %2479  ;;  %1776 = vmatpush.bf16.msra.mxu1 %v1689_v51  ;;  %v4608_v51 = vld [vmem:[#allocation32_spill] sm:$0xff] }
 0x282   : > { %v1562_v54 = vmul.f32 %v3942_v22, %v3709_v62  ;;  %v1566_v44 = vmul.f32 %v3942_v22, %v3716_v23  ;;  %v1626_v46 = vmul.f32 %v3942_v22, %v3833_v47  ;;  %v1630_v36 = vmul.f32 %v3942_v22, %v3855_v48  ;;  %v4602_v62 = vld [vmem:[#allocation42_spill] sm:$0xff] }
 0x283   : > { %v1554_v57 = vmul.f32 %v3942_v22, %v3698_v49  ;;  %v1558_v9 = vmul.f32 %v3942_v22, %v3704_v30  ;;  %v1541_v28 = vmul.f32 %v3894_v3, %v4602_v62  ;;  %v1618_v47 = vmul.f32 %v3942_v22, %v3797_v38 }
 0x284   : > { %v1662_v23 = vpack.c.bf16 %v1566_v44, %v1562_v54  ;;  %v1694_v59 = vpack.c.bf16 %v1630_v36, %v1626_v46  ;;  %v1622_v48 = vmul.f32 %v3942_v22, %v3804_v11  ;;  %1763 = vmatpush.bf16.msra.mxu0 %v1653_v10  ;;  %v1685_v49 = vpack.c.bf16 %v1613_v17, %v1609_v15  ;;  %v4609_v15 = vld [vmem:[#allocation23_spill] sm:$0xff]  ;;  %v2159_v44 = vld [vmem:[%s285_s10 + $0x4] sm:$0xf]  ;;  %v2131_v46 = vld [vmem:[%s285_s10 + $0x8] sm:$0xf0] }
 0x285   : > { %v1658_v5 = vpack.c.bf16 %v1558_v9, %v1554_v57  ;;  %v1601_v30 = vmul.f32 %v3894_v3, %v3639_v33  ;;  %v1533_v38 = vmul.f32 %v3894_v3, %v4604_v14  ;;  %v1546_v11 = vmul.f32 %v3942_v22, %v3682_v61  ;;  %v4611_v57 = vld [vmem:[#allocation41_spill] sm:$0xff]  ;;  %v4617_v14 = vld [vmem:[#allocation20_spill] sm:$0xff] }
 0x286   : > { %1789 = vmatpush.bf16.msra.mxu2 %v1662_v23  ;;  %1803 = vmatpush.bf16.msra.mxu3 %v1694_v59  ;;  %v1649_v60 = vpack.c.bf16 %v1541_v28, %v1537_v8  ;;  %v1597_v33 = vmul.f32 %v3894_v3, %v3629_v42  ;;  %v1690_v39 = vpack.c.bf16 %v1622_v48, %v1618_v47  ;;  %v4613_v28 = vld [vmem:[#allocation60_spill] sm:$0xff]  ;;  %v4614_v59 = vld [vmem:[#allocation63_spill] sm:$0xff] }
 0x287   : > { %1777 = vmatpush.bf16.msra.mxu1 %v1685_v49  ;;  %v1550_v16 = vmul.f32 %v3942_v22, %v3690_v2  ;;  %v1610_v53 = vmul.f32 %v3942_v22, %v3784_v50  ;;  %v1614_v40 = vmul.f32 %v3942_v22, %v3791_v25  ;;  %v1681_v61 = vpack.c.bf16 %v1605_v35, %v1601_v30  ;;  %v4606_v2 = vld [vmem:[#allocation29_spill] sm:$0xff] }
 0x288   : > { %1764 = vmatpush.bf16.msra.mxu0 %v1649_v60  ;;  %v1538_v6 = vmul.f32 %v3942_v22, %v3666_v1  ;;  %v1542_v42 = vmul.f32 %v3942_v22, %v3674_v43  ;;  %v1525_v50 = vmul.f32 %v3894_v3, %v4606_v2  ;;  %v1645_v18 = vpack.c.bf16 %v1533_v38, %v1529_v0 }
 0x289   : > { %v1677_v25 = vpack.c.bf16 %v1597_v33, %v1593_v37  ;;  %v3999_v41 = vmul.f32 %v3942_v22, %v3749_v55  ;;  %v4003_v24 = vmul.f32 %v3942_v22, %v3756_v29  ;;  %v1654_v1 = vpack.c.bf16 %v1550_v16, %v1546_v11  ;;  %v4618_v37 = vld [vmem:[#allocation24_spill] sm:$0xff]  ;;  %v4619_v16 = vld [vmem:[#allocation58_spill] sm:$0xff] }
 0x28a   : > { %1790 = vmatpush.bf16.msra.mxu2 %v1658_v5  ;;  %1804 = vmatpush.bf16.msra.mxu3 %v1690_v39  ;;  %v1686_v43 = vpack.c.bf16 %v1614_v40, %v1610_v53  ;;  %v1602_v27 = vmul.f32 %v3942_v22, %v3765_v63  ;;  %v1606_v45 = vmul.f32 %v3942_v22, %v3774_v32  ;;  %v4607_v63 = vld [vmem:[#allocation28_spill] sm:$0xff]  ;;  %v4615_v5 = vld [vmem:[#allocation22_spill] sm:$0xff]  ;;  %v4620_v40 = vld [vmem:[#allocation77_spill] sm:$0xff] }
 0x28b   : > { %1778 = vmatpush.bf16.msra.mxu1 %v1681_v61  ;;  %v1585_v55 = vmul.f32 %v3894_v3, %v3597_v26  ;;  %v1589_v29 = vmul.f32 %v3894_v3, %v3608_v13  ;;  %v1674_v34 = vpack.c.bf16 %v4003_v24, %v3999_v41  ;;  %v1578_v20 = vmul.f32 %v3942_v22, %v3737_v19  ;;  %v2160_v26 = vld [vmem:[%s285_s10 + $0x4] sm:$0xf0]  ;;  %v4610_v19 = vld [vmem:[#allocation75_spill] sm:$0xff]  ;;  %v4623_v41 = vld [vmem:[#allocation16_spill] sm:$0xff] }
 0x28c   : > { %1765 = vmatpush.bf16.msra.mxu0 %v1645_v18  ;;  %v1650_v4 = vpack.c.bf16 %v1542_v42, %v1538_v6  ;;  %v1530_v52 = vmul.f32 %v3942_v22, %v4607_v63  ;;  %v1582_v32 = vmul.f32 %v3942_v22, %v3742_v31  ;;  %v1534_v13 = vmul.f32 %v3942_v22, %v4608_v51  ;;  %v4612_v31 = vld [vmem:[#allocation51_spill] sm:$0xff] }
 0x28d   : > { %v1641_v10 = vpack.c.bf16 %v1525_v50, %v1521_v58  ;;  %v1513_v17 = vmul.f32 %v3894_v3, %v4609_v15  ;;  %v1517_v54 = vmul.f32 %v3894_v3, %v4610_v19  ;;  %v1682_v36 = vpack.c.bf16 %v1606_v45, %v1602_v27  ;;  %v4622_v6 = vld [vmem:[#allocation79_spill] sm:$0xff]  ;;  %v4626_v45 = vld [vmem:[#allocation38_spill] sm:$0xff] }
 0x28e   : > { %1791 = vmatpush.bf16.msra.mxu2 %v1654_v1  ;;  %1805 = vmatpush.bf16.msra.mxu3 %v1686_v43  ;;  %v1594_v9 = vmul.f32 %v3942_v22, %v4611_v57  ;;  %v1598_v12 = vmul.f32 %v3942_v22, %v4612_v31  ;;  %v1670_v8 = vpack.c.bf16 %v1582_v32, %v1578_v20  ;;  %v4624_v24 = vld [vmem:[#allocation19_spill] sm:$0xff]  ;;  %v1818_v63 = vstv %s1817_s11  ;;  %v2483_v57 = vld [vmem:[%s2645_s26 + $0x20] sm:$0xff] }
 0x28f   : > { %1779 = vmatpush.bf16.msra.mxu1 %v1677_v25  ;;  %v1673_v62 = vpack.c.bf16 %v1589_v29, %v1585_v55  ;;  %v1577_v23 = vmul.f32 %v3894_v3, %v4613_v28  ;;  %v1581_v47 = vmul.f32 %v3894_v3, %v4614_v59  ;;  %v2130_v48 = vor.u32 %v2160_v26, %v2129_v21  ;;  %v4625_v43 = vld [vmem:[#allocation35_spill] sm:$0xff]  ;;  %v2481_v21 = vld [vmem:[%s2645_s26] sm:$0xff] }
 0x290   : > { %1766 = vmatpush.bf16.msra.mxu0 %v1641_v10  ;;  %v1522_v49 = vmul.f32 %v3942_v22, %v4615_v5  ;;  %v2134_v30 = vor.u32 %v2159_v44, %v2131_v46  ;;  %v1637_v35 = vpack.c.bf16 %v1517_v54, %v1513_v17  ;;  %v1505_v0 = vmul.f32 %v3894_v3, %v4616_v56  ;;  %v2482_v54 = vld [vmem:[%s2645_s26 + $0x8] sm:$0xff]  ;;  %v2485_v5 = vld [vmem:[%s2645_s26 + $0x10] sm:$0xff] }
 0x291   : > { %v1509_v38 = vmul.f32 %v3894_v3, %v4617_v14  ;;  %1741 = vmatmul.bf16.vlgmr.msrb.gmra.mxu2 %v2130_v48  ;;  %v1646_v11 = vpack.c.bf16 %v1534_v13, %v1530_v52  ;;  %v1678_v60 = vpack.c.bf16 %v1598_v12, %v1594_v9  ;;  %v1526_v33 = vmul.f32 %v3942_v22, %v4618_v37 }
 0x292   : > { %1792 = vmatpush.bf16.msra.mxu2 %v1650_v4  ;;  %1806 = vmatpush.bf16.msra.mxu3 %v1682_v36  ;;  %v1669_v39 = vpack.c.bf16 %v1581_v47, %v1577_v23  ;;  %v1569_v53 = vmul.f32 %v3894_v3, %v4619_v16  ;;  %v1573_v61 = vmul.f32 %v3894_v3, %v4620_v40  ;;  %v2484_v23 = vld [vmem:[%s2645_s26 + $0x28] sm:$0xff] }
 0x293   : > { %1780 = vmatpush.bf16.msra.mxu1 %v1673_v62  ;;  %1755 = vmatmul.bf16.vlgmr.msrb.gmra.mxu3 %v2134_v30  ;;  %v1514_v58 = vmul.f32 %v3942_v22, %v4621_v7  ;;  %v1518_v42 = vmul.f32 %v3942_v22, %v4622_v6  ;;  %v1633_v2 = vpack.c.bf16 %v1509_v38, %v1505_v0 }
 0x294   : > { %1713 = vmatmul.bf16.vlgmr.msrb.gmra.mxu0 %v2130_v48  ;;  %1727 = vmatmul.bf16.vlgmr.msrb.gmra.mxu1 %v2134_v30  ;;  %v1642_v50 = vpack.c.bf16 %v1526_v33, %v1522_v49  ;;  %v1665_v18 = vpack.c.bf16 %v1573_v61, %v1569_v53  ;;  %v1506_v3 = vmul.f32 %v3942_v22, %v4623_v41 }
 0x295   : > { %1767 = vmatpush.bf16.msra.mxu0 %v1637_v35  ;;  %v1638_v25 = vpack.c.bf16 %v1518_v42, %v1514_v58  ;;  %v1510_v1 = vmul.f32 %v3942_v22, %v4624_v24  ;;  %v1570_v27 = vmul.f32 %v3942_v22, %v4625_v43  ;;  %v1574_v55 = vmul.f32 %v3942_v22, %v4626_v45  ;;  %v2488_v58 = vld [vmem:[%s2645_s26 + $0x38] sm:$0xff] }
 0x296   : > { %1793 = vmatpush.bf16.msra.mxu2 %v1646_v11  ;;  %1807 = vmatpush.bf16.msra.mxu3 %v1678_v60  ;;  %v2486_v60 = vld [vmem:[%s2645_s26 + $0x18] sm:$0xff] }
 0x297   : > { %1781 = vmatpush.bf16.msra.mxu1 %v1669_v39  ;;  %v1634_v29 = vpack.c.bf16 %v1510_v1, %v1506_v3  ;;  %v1666_v20 = vpack.c.bf16 %v1574_v55, %v1570_v27  ;;  %v2487_v39 = vld [vmem:[%s2645_s26 + $0x30] sm:$0xff] }
 0x299   : > { %1768 = vmatpush.bf16.msra.mxu0 %v1633_v2 }
 0x29a   : > { %1794 = vmatpush.bf16.msra.mxu2 %v1642_v50  ;;  %1808 = vmatpush.bf16.msra.mxu3 %v1674_v34 }
 0x29b   : > { %1782 = vmatpush.bf16.msra.mxu1 %v1665_v18 }
 0x29e   : > { %1795 = vmatpush.bf16.msra.mxu2 %v1638_v25  ;;  %1809 = vmatpush.bf16.msra.mxu3 %v1670_v8 }
 0x2a2   : > { %1796 = vmatpush.bf16.msra.mxu2 %v1634_v29  ;;  %1810 = vmatpush.bf16.msra.mxu3 %v1666_v20 }
 0x2a4   : > { %1769 = vmatmul.bf16.vlgmr.msra.gmra.mxu0 %v2130_v48  ;;  %1783 = vmatmul.bf16.vlgmr.msra.gmra.mxu1 %v2134_v30 }
 0x2a5   : > { %1797 = vmatmul.bf16.vlgmr.msra.gmra.mxu2 %v2130_v48  ;;  %1811 = vmatmul.bf16.vlgmr.msra.gmra.mxu3 %v2134_v30 }
 0x311   : > { %v1714_v34 = vpop.f32.mrf.mxu0  ;;  %v1728_v4 = vpop.f32.mrf.mxu1 }
 0x312   : > { %v1729_v52 = vadd.f32 %v1728_v4, %v1714_v34 }
 0x314   : > { %v1819_v32 = vmul.f32 %v1818_v63, %v1729_v52  ;;  %v1742_v22 = vpop.f32.mrf.mxu2 }
 0x316   : > { %v1827_v26 = vadd.f32 %v2481_v21, %v1819_v32  ;;  %v1756_v51 = vpop.f32.mrf.mxu3 }
 0x317   : > { %v1757_v13 = vadd.f32 %v1756_v51, %v1742_v22 }
 0x318   : > { %1835 = vst [vmem:[%s4064_s12] sm:$0xff] %v1827_v26 }
 0x319   : > { %v1716_v10 = vpop.f32.mrf.mxu0  ;;  %v1820_v15 = vmul.f32 %v1818_v63, %v1757_v13  ;;  %v1730_v17 = vpop.f32.mrf.mxu1 }
 0x31a   : > { %v1731_v19 = vadd.f32 %v1730_v17, %v1716_v10 }
 0x31b   : > { %v1828_v44 = vadd.f32 %v2482_v54, %v1820_v15 }
 0x31c   : > { %v1823_v46 = vmul.f32 %v1818_v63, %v1731_v19  ;;  %v1744_v36 = vpop.f32.mrf.mxu2 }
 0x31d   : > { %1836 = vst [vmem:[%s4064_s12 + $0x8] sm:$0xff] %v1828_v44 }
 0x31e   : > { %v1831_v9 = vadd.f32 %v2483_v57, %v1823_v46  ;;  %v1758_v31 = vpop.f32.mrf.mxu3 }
 0x31f   : > { %v1759_v12 = vadd.f32 %v1758_v31, %v1744_v36  ;;  %v1867_v42 = vld [vmem:[%s4064_s12] sm:$0xff] (%p2621_p6) }
 0x320   : > { %1839 = vst [vmem:[%s4064_s12 + $0x20] sm:$0xff] %v1831_v9 }
 0x321   : > { %v1770_v8 = vpop.f32.mrf.mxu0  ;;  %v1824_v62 = vmul.f32 %v1818_v63, %v1759_v12  ;;  %v1784_v28 = vpop.f32.mrf.mxu1  ;;  %1868 = vst [vmem:[%s1854_s27] sm:$0xff] (%p2621_p6), %v1867_v42 }
 0x322   : > { %v1785_v47 = vadd.f32 %v1784_v28, %v1770_v8 }
 0x323   : > { %v1832_v59 = vadd.f32 %v2484_v23, %v1824_v62 }
 0x324   : > { %v1821_v48 = vmul.f32 %v1818_v63, %v1785_v47  ;;  %v1869_v2 = vld [vmem:[%s4064_s12 + $0x8] sm:$0xff] (%p2621_p6) }
 0x325   : > { %1840 = vst [vmem:[%s4064_s12 + $0x28] sm:$0xff] %v1832_v59 }
 0x326   : > { %v1829_v49 = vadd.f32 %v2485_v5, %v1821_v48  ;;  %1870 = vst [vmem:[%s1854_s27 + $0x8] sm:$0xff] (%p2621_p6), %v1869_v2 }
 0x327   : > { %v1875_v25 = vld [vmem:[%s4064_s12 + $0x20] sm:$0xff] (%p2621_p6) }
 0x328   : > { %v1798_v30 = vpop.f32.mrf.mxu2  ;;  %v1812_v35 = vpop.f32.mrf.mxu3  ;;  %1837 = vst [vmem:[%s4064_s12 + $0x10] sm:$0xff] %v1829_v49 }
 0x329   : > { %v1813_v56 = vadd.f32 %v1812_v35, %v1798_v30  ;;  %v1772_v0 = vpop.f32.mrf.mxu0  ;;  %v1786_v38 = vpop.f32.mrf.mxu1  ;;  %1876 = vst [vmem:[%s1854_s27 + $0x40] sm:$0xff] (%p2621_p6), %v1875_v25 }
 0x32a   : > { %v1787_v11 = vadd.f32 %v1786_v38, %v1772_v0 }
 0x32b   : > { %v1822_v14 = vmul.f32 %v1818_v63, %v1813_v56 }
 0x32c   : > { %v1825_v33 = vmul.f32 %v1818_v63, %v1787_v11  ;;  %v1877_v41 = vld [vmem:[%s4064_s12 + $0x28] sm:$0xff] (%p2621_p6) }
 0x32d   : > { %v1830_v37 = vadd.f32 %v2486_v60, %v1822_v14  ;;  %1878 = vst [vmem:[%s1854_s27 + $0x48] sm:$0xff] (%p2621_p6), %v1877_v41 }
 0x32e   : > { %v1833_v16 = vadd.f32 %v2487_v39, %v1825_v33 }
 0x32f   : > { %1838 = vst [vmem:[%s4064_s12 + $0x18] sm:$0xff] %v1830_v37  ;;  %v1871_v50 = vld [vmem:[%s4064_s12 + $0x10] sm:$0xff] (%p2621_p6) }
 0x330   : > { %v1800_v53 = vpop.f32.mrf.mxu2  ;;  %v1814_v40 = vpop.f32.mrf.mxu3  ;;  %1841 = vst [vmem:[%s4064_s12 + $0x30] sm:$0xff] %v1833_v16 }
 0x331   : > { %v1815_v61 = vadd.f32 %v1814_v40, %v1800_v53  ;;  %1872 = vst [vmem:[%s1854_s27 + $0x10] sm:$0xff] (%p2621_p6), %v1871_v50 }
 0x333   : > { %v1826_v7 = vmul.f32 %v1818_v63, %v1815_v61  ;;  %1849 = sbr.rel (!%p2621_p6) target bundleno = 832 (0x340), region = 63 }
 0x335   : > { %v1834_v6 = vadd.f32 %v2488_v58, %v1826_v7 }
 0x336   : > { %v1873_v18 = vld [vmem:[%s4064_s12 + $0x18] sm:$0xff] (%p2621_p6) }
 0x337   : > { %1842 = vst [vmem:[%s4064_s12 + $0x38] sm:$0xff] %v1834_v6  ;;  %v1879_v3 = vld [vmem:[%s4064_s12 + $0x30] sm:$0xff] (%p2621_p6) }
 0x338   : > { %1874 = vst [vmem:[%s1854_s27 + $0x18] sm:$0xff] %v1873_v18 }
 0x339   : > { %1880 = vst [vmem:[%s1854_s27 + $0x50] sm:$0xff] %v1879_v3 }
 0x33e   : > { %v1881_v24 = vld [vmem:[%s4064_s12 + $0x38] sm:$0xff] }
 0x33f   : > { %1882 = vst [vmem:[%s1854_s27 + $0x58] sm:$0xff] %v1881_v24 }
 0x340 PF: > { %s15_s23 = sadd.s32 1, %s2543_s23   ;;  %s4627_s17 = smov %s2523_s18 }
 0x341   : > { %p12_p13 = scmp.ge.s32.totalorder %s15_s23, 6   ;;  %s4628_s18 = smov %s2629_s5 }
 0x342   : > { %s4629_s19 = smov %s2535_s21  ;;  %s4630_s20 = smov %s2539_s22 }
 0x343   : > { %s4631_s21 = smov %s4634_s3  ;;  %s4632_s22 = smov %s4638_s24 }
 0x344   :  { %14 = sbr.rel (!%p12_p13) target bundleno = 6 (0x6), region = 123 }

</bundles_post_ra>
